<compile_context>
chip_gen: v7x
topology: tpu7x:2x2x1
jax: 0.10.0
libtpu: 0.0.40
codegen_flags: <defaults>
</compile_context>

<pallas_src>
import functools
import math

import jax
import jax.numpy as jnp
from jax.experimental import pallas as pl
from jax.experimental.pallas import tpu as pltpu


# ----------------------------------------------------------------------------
# Kernels
# ----------------------------------------------------------------------------
def _sinusoidal_kernel_fast(t_ref, f_ref, o_ref, *, half, res):
    """Lane-dense compute + in-kernel XLU transpose.

    t_ref: (1, TN)  f32  timesteps, lane-dense
    f_ref: (half,1) f32  frequency column (resident: constant index_map)
    o_ref: (TN,dim) f32  embedding rows [cos | sin | zero-pad]
    """
    # (half, TN): one sublane-broadcast of t, one lane-broadcast of f per tile.
    args = f_ref[...] * t_ref[...]
    # TODO(synk): a hand-fused sincos with shared range reduction would cut
    # VALU work ~30-40% in the compute-bound regime (v6e/v7x).
    slab = jnp.concatenate([jnp.cos(args), jnp.sin(args)], axis=0)  # (2*half, TN)
    # Transpose on the otherwise-idle XLU; store (TN, dim) directly so no
    # wrapper-side HBM round trip is needed to restore the (..., dim) layout.
    if res == 0:
        o_ref[...] = slab.T
    else:
        o_ref[:, :2 * half] = slab.T
        o_ref[:, 2 * half:] = jnp.zeros((o_ref.shape[0], res), o_ref.dtype)


def _sinusoidal_kernel_direct(t_ref, f_ref, o_ref, *, half, res):
    """Row-major fallback (general half): single HBM pass, no transpose.

    t_ref: (TN, 1) f32, f_ref: (1, half) f32, o_ref: (TN, dim) f32.
    """
    args = t_ref[...] * f_ref[...]                       # (TN, half)
    o_ref[:, :half] = jnp.cos(args)
    o_ref[:, half:2 * half] = jnp.sin(args)
    if res:
        o_ref[:, 2 * half:] = jnp.zeros((args.shape[0], res), o_ref.dtype)


# ----------------------------------------------------------------------------
# Tiling
# ----------------------------------------------------------------------------
def _choose_row_tile(n, dim):
    """Rows of the (N, dim) output handled per grid step.

    Sized so each step writes ~1 MiB of output (amortizes the ~0.35 us
    per-grid-step cost), capped at 8192 rows so the double-buffered output
    block plus in-kernel temporaries stay far below the scoped-VMEM limits on
    every generation (incl. v7x's 64 MiB physical VMEM), and capped at half
    the padded problem so the "parallel" grid keeps >= 2 steps whenever there
    is enough work (lets v7x shard across both TensorCores).
    """
    lane = 128
    n_up = ((n + lane - 1) // lane) * lane
    tn = (1024 * 1024) // (dim * 4)              # ~1 MiB of payload per step
    tn = max(lane, min((tn // lane) * lane, 8192))
    tn = min(tn, n_up)
    if n_up >= 2 * lane:                         # never collapse to 1 step
        tn = min(tn, max(lane, ((n_up // 2) // lane) * lane))
    return tn


_COMPILER_PARAMS = pltpu.CompilerParams(
    dimension_semantics=("parallel",),
    vmem_limit_bytes=32 * 1024 * 1024,           # explicit; safe on v5e/v6e/v7x
)


# ----------------------------------------------------------------------------
# Wrappers
# ----------------------------------------------------------------------------
def _encode_fast(t_flat, freqs, dim, half, res):
    n = t_flat.shape[0]
    tn = _choose_row_tile(n, dim)
    grid = (pl.cdiv(n, tn),)
    n_pad = grid[0] * tn
    if n_pad != n:                               # cheap: O(N*4) bytes
        t_flat = jnp.pad(t_flat, (0, n_pad - n))
    t2d = t_flat.reshape(1, n_pad)               # lane-dense timesteps
    f2d = freqs.reshape(half, 1)                 # sublane freq column

    kernel = functools.partial(_sinusoidal_kernel_fast, half=half, res=res)
    return pl.pallas_call(
        kernel,
        out_shape=jax.ShapeDtypeStruct((n, dim), jnp.float32),
        grid_spec=pltpu.PrefetchScalarGridSpec(
            num_scalar_prefetch=0,
            grid=grid,
            in_specs=[
                pl.BlockSpec((1, tn), lambda i: (0, i)),      # timesteps tile
                pl.BlockSpec((half, 1), lambda i: (0, 0)),    # freqs (resident)
            ],
            # Last block may be partial; Pallas masks the out-of-range rows on
            # writeback, so no wrapper-side slice/copy is needed.
            out_specs=pl.BlockSpec((tn, dim), lambda i: (i, 0)),
        ),
        compiler_params=_COMPILER_PARAMS,
    )(t2d, f2d)


def _encode_direct(t_flat, freqs, dim, half, res):
    n = t_flat.shape[0]
    tn = _choose_row_tile(n, dim)
    grid = (pl.cdiv(n, tn),)
    n_pad = grid[0] * tn
    if n_pad != n:
        t_flat = jnp.pad(t_flat, (0, n_pad - n))
    t2d = t_flat.reshape(n_pad, 1)
    f2d = freqs.reshape(1, half)

    kernel = functools.partial(_sinusoidal_kernel_direct, half=half, res=res)
    return pl.pallas_call(
        kernel,
        out_shape=jax.ShapeDtypeStruct((n, dim), jnp.float32),
        grid_spec=pltpu.PrefetchScalarGridSpec(
            num_scalar_prefetch=0,
            grid=grid,
            in_specs=[
                pl.BlockSpec((tn, 1), lambda i: (i, 0)),
                pl.BlockSpec((1, half), lambda i: (0, 0)),
            ],
            out_specs=pl.BlockSpec((tn, dim), lambda i: (i, 0)),
        ),
        compiler_params=_COMPILER_PARAMS,
    )(t2d, f2d)


def sinusoidal_encode(timesteps, freqs, dim):
    """Pallas implementation of SinusoidalEncoder.forward.

    timesteps: float array of arbitrary shape (...,)
    freqs:     float32 array of shape (half,)
    dim:       full embedding dim (2*half + res)
    """
    freqs = jnp.asarray(freqs, jnp.float32)
    half = int(freqs.shape[0])
    res = dim % 2
    assert dim == 2 * half + res and half >= 1

    timesteps = jnp.asarray(timesteps, jnp.float32)
    orig_shape = timesteps.shape
    t_flat = timesteps.reshape(-1)

    if half % 8 == 0:
        # Fast path: lane-dense compute, sublane-aligned cos|sin slab, XLU
        # transpose in-kernel.  Defensive fallback keeps the script runnable
        # even if the in-kernel transpose fails to lower on some toolchain.
        try:
            out = _encode_fast(t_flat, freqs, dim, half, res)
        except Exception:
            out = _encode_direct(t_flat, freqs, dim, half, res)
    else:
        # Unaligned half: sublane-granule slab tricks don't apply; use the
        # simple row-major kernel (still a single HBM pass).
        out = _encode_direct(t_flat, freqs, dim, half, res)

    return out.reshape(orig_shape + (dim,))


# ----------------------------------------------------------------------------
# Parameter init + plain-JAX reference (mirror the PyTorch module)
# ----------------------------------------------------------------------------
def make_freqs(dim, max_period=10000.0):
    half = dim // 2
    return jnp.exp(
        -math.log(max_period) * jnp.arange(half, dtype=jnp.float32) / half)


def reference_encode(timesteps, freqs, dim):
    res = dim % 2
    args = timesteps[..., None] * freqs
    emb = jnp.concatenate([jnp.cos(args), jnp.sin(args)], axis=-1)
    if res:
        emb = jnp.concatenate(
            [emb, jnp.zeros(emb.shape[:-1] + (res,), emb.dtype)], axis=-1)
    return emb


if __name__ == "__main__":
    key = jax.random.PRNGKey(0)

    def check(shape, dim, k):
        freqs = make_freqs(dim)
        t = jax.random.uniform(k, shape, jnp.float32, 0.0, 1000.0)
        out = jax.block_until_ready(sinusoidal_encode(t, freqs, dim))
        ref = reference_encode(t, freqs, dim)
        assert out.shape == shape + (dim,), (out.shape, shape, dim)
        assert jnp.allclose(out, ref, atol=1e-5, rtol=1e-5), (shape, dim)

    k1, k2, k3, k4 = jax.random.split(key, 4)
    check((2, 8), 32, k1)      # primary case: batch=2, seq=8, dim=32 (fast path)
    check((3, 100), 32, k2)    # multi-step grid + partial last output block
    check((2, 8), 33, k3)      # odd dim: trailing zero column
    check((2, 8), 6, k4)       # half % 8 != 0: row-major fallback path

    print("KERNEL_OK")
</pallas_src>

<mosaic_0001>
module attributes {stable_mosaic.version = 11 : i64} {
  func.func @_sinusoidal_kernel_fast(%arg0: i32, %arg1: memref<1x128xf32, #tpu.memory_space<vmem>>, %arg2: memref<16x1xf32, #tpu.memory_space<vmem>>, %arg3: memref<128x32xf32, #tpu.memory_space<vmem>>) attributes {dimension_semantics = [#tpu.dimension_semantics<parallel>], iteration_bounds = array<i64: 1>, scalar_prefetch = 0 : i64, scratch_operands = 0 : i64, tpu.core_type = #tpu.core_type<tc>, window_params = [{transform_indices = @transform_0, window_bounds = array<i64: 1, 128>}, {pipeline_mode = #tpu.pipeline_mode<synchronous>, transform_indices = @transform_1, window_bounds = array<i64: 16, 1>}, {transform_indices = @transform_2, window_bounds = array<i64: 128, 32>}]} {
    %c0 = arith.constant 0 : index
    %c0_0 = arith.constant 0 : index
    %0 = vector.load %arg2[%c0, %c0_0] : memref<16x1xf32, #tpu.memory_space<vmem>>, vector<16x1xf32>
    %c0_1 = arith.constant 0 : index
    %c0_2 = arith.constant 0 : index
    %1 = vector.load %arg1[%c0_1, %c0_2] : memref<1x128xf32, #tpu.memory_space<vmem>>, vector<1x128xf32>
    %2 = vector.broadcast %0 : vector<16x1xf32> to vector<16x128xf32>
    %3 = vector.broadcast %1 : vector<1x128xf32> to vector<16x128xf32>
    %4 = arith.mulf %2, %3 : vector<16x128xf32>
    %5 = math.cos %4 : vector<16x128xf32>
    %6 = math.sin %4 : vector<16x128xf32>
    %7 = tpu.concatenate %5, %6 in 0 : vector<16x128xf32>, vector<16x128xf32> -> vector<32x128xf32>
    %8 = tpu.transpose %7, [1, 0] : vector<32x128xf32> -> vector<128x32xf32>
    %c0_3 = arith.constant 0 : index
    %c0_4 = arith.constant 0 : index
    %9 = vector.load %arg3[%c0_3, %c0_4] : memref<128x32xf32, #tpu.memory_space<vmem>>, vector<128x32xf32>
    tpu.vector_store %arg3[%c0_3, %c0_4], %8 {strides = array<i32>} : memref<128x32xf32, #tpu.memory_space<vmem>>, vector<128x32xf32>,
    return
  }
  func.func @transform_0(%arg0: i32) -> (i32, i32) {
    %c0_i32 = arith.constant 0 : i32
    %c0_i32_0 = arith.constant 0 : i32
    return %c0_i32, %arg0 : i32, i32
  }
  func.func @transform_1(%arg0: i32) -> (i32, i32) {
    %c0_i32 = arith.constant 0 : i32
    %c0_i32_0 = arith.constant 0 : i32
    %c0_i32_1 = arith.constant 0 : i32
    return %c0_i32, %c0_i32_0 : i32, i32
  }
  func.func @transform_2(%arg0: i32) -> (i32, i32) {
    %c0_i32 = arith.constant 0 : i32
    %c0_i32_0 = arith.constant 0 : i32
    return %arg0, %c0_i32 : i32, i32
  }
}

module attributes {stable_mosaic.version = 11 : i64} {
  func.func @_sinusoidal_kernel_direct(%arg0: i32, %arg1: memref<128x1xf32, #tpu.memory_space<vmem>>, %arg2: memref<1x16xf32, #tpu.memory_space<vmem>>, %arg3: memref<128x32xf32, #tpu.memory_space<vmem>>) attributes {dimension_semantics = [#tpu.dimension_semantics<parallel>], iteration_bounds = array<i64: 1>, scalar_prefetch = 0 : i64, scratch_operands = 0 : i64, tpu.core_type = #tpu.core_type<tc>, window_params = [{transform_indices = @transform_0, window_bounds = array<i64: 128, 1>}, {pipeline_mode = #tpu.pipeline_mode<synchronous>, transform_indices = @transform_1, window_bounds = array<i64: 1, 16>}, {transform_indices = @transform_2, window_bounds = array<i64: 128, 32>}]} {
    %c0 = arith.constant 0 : index
    %c0_0 = arith.constant 0 : index
    %0 = vector.load %arg1[%c0, %c0_0] : memref<128x1xf32, #tpu.memory_space<vmem>>, vector<128x1xf32>
    %c0_1 = arith.constant 0 : index
    %c0_2 = arith.constant 0 : index
    %1 = vector.load %arg2[%c0_1, %c0_2] : memref<1x16xf32, #tpu.memory_space<vmem>>, vector<1x16xf32>
    %2 = vector.broadcast %0 : vector<128x1xf32> to vector<128x16xf32>
    %3 = vector.broadcast %1 : vector<1x16xf32> to vector<128x16xf32>
    %4 = arith.mulf %2, %3 : vector<128x16xf32>
    %5 = math.cos %4 : vector<128x16xf32>
    %c0_3 = arith.constant 0 : index
    %c0_4 = arith.constant 0 : index
    %6 = vector.load %arg3[%c0_3, %c0_4] : memref<128x32xf32, #tpu.memory_space<vmem>>, vector<128x16xf32>
    tpu.vector_store %arg3[%c0_3, %c0_4], %5 {strides = array<i32>} : memref<128x32xf32, #tpu.memory_space<vmem>>, vector<128x16xf32>,
    %7 = math.sin %4 : vector<128x16xf32>
    %c0_5 = arith.constant 0 : index
    %c16 = arith.constant 16 : index
    %8 = vector.load %arg3[%c0_5, %c16] : memref<128x32xf32, #tpu.memory_space<vmem>>, vector<128x16xf32>
    tpu.vector_store %arg3[%c0_5, %c16], %7 {strides = array<i32>} : memref<128x32xf32, #tpu.memory_space<vmem>>, vector<128x16xf32>,
    return
  }
  func.func @transform_0(%arg0: i32) -> (i32, i32) {
    %c0_i32 = arith.constant 0 : i32
    %c0_i32_0 = arith.constant 0 : i32
    return %arg0, %c0_i32 : i32, i32
  }
  func.func @transform_1(%arg0: i32) -> (i32, i32) {
    %c0_i32 = arith.constant 0 : i32
    %c0_i32_0 = arith.constant 0 : i32
    %c0_i32_1 = arith.constant 0 : i32
    return %c0_i32, %c0_i32_0 : i32, i32
  }
  func.func @transform_2(%arg0: i32) -> (i32, i32) {
    %c0_i32 = arith.constant 0 : i32
    %c0_i32_0 = arith.constant 0 : i32
    return %arg0, %c0_i32 : i32, i32
  }
}

</mosaic_0001>

<bundles_post_ra>
// kernel: tpu_custom_call.1
= control target key start
LH: loop header
LB: loop body
LE: loop exit
PB: predicated region body
PF: predicated region fallthrough
CT: control target
= control target key end

     0   :  { %v581_v1 = vmov 0   ;;  %s741_s0 = inlined_call_operand.vmem [shape: f32[1,128], index: 0, kind: input, shape index: {}]   ;;  %s742_s1 = inlined_call_operand.vmem [shape: f32[16,1], index: 1, kind: input, shape index: {}]   ;;  %s743_s2 = inlined_call_operand.hbm [shape: f32[16,32], index: 2, kind: output, shape index: {}]  }
   0x1   :  { %v12_v0 = vld [vmem:[%s742_s1] sm:$0xff]  ;;  %548 = vset.pattern.permute.xlu0 %v581_v1 }
   0x2   :  { %17 = vperm.xlu0 %548, %v12_v0  }
   0x3   :  { %7 = vsyncpa [#allocation3], 0  ;;  %v13_v2 = vld [vmem:[%s742_s1 + $0x8] sm:$0xff]  ;;  %v512_v3 = vld [vmem:[%s741_s0] ss:$0 sm:$0xff] }
   0x4   :  { %v582_v26 = vmov 2102212464   ;;  %v583_v28 = vmov 920167782   ;;  %v584_v32 = vmov 1326507024  }
   0x5   :  { %v585_v36 = vmov 683565275   ;;  %v586_v38 = vmov 2475754826   ;;  %v587_v40 = vmov 2131351028  }
   0x6   :  { %22 = vperm.xlu0 %548, %v13_v2  }
  0x81   :  { %v18_v4 = vpop.permute.xlu0 %17 }
  0x82   :  { %v615_v5 = vmul.f32 %v512_v3, %v18_v4 }
  0x84   :  { %v36_v6 = vand.u32 2139095040, %v615_v5  ;;  %v33_v7 = vand.u32 2147483647, %v615_v5  ;;  %vm35_vm14 = vcmp.lt.s32.totalorder %v615_v5, 0 }
  0x85   :  { %v23_v8 = vpop.permute.xlu0 %22 }
  0x86   :  { %v37_v9 = vshrl.u32 %v36_v6, 23  ;;  %v619_v10 = vmul.f32 %v512_v3, %v23_v8  ;;  %v40_v13 = vand.u32 8388607, %v33_v7  ;;  %vm34_vm15 = vcmp.le.f32.partialorder %v33_v7, 0.7853982 }
  0x88   :  { %v513_v11 = vadd.s32 4294967169, %v37_v9  ;;  %v139_v12 = vand.u32 2139095040, %v619_v10  ;;  %v136_v14 = vand.u32 2147483647, %v619_v10  ;;  %v41_v18 = vor.u32 8388608, %v40_v13 }
  0x8a   :  { %v43_v15 = vadd.s32 1, %v513_v11  ;;  %v140_v16 = vshrl.u32 %v139_v12, 23  ;;  %v627_v20 = vand.u32 8388607, %v136_v14  ;;  %v629_v25 = vshll.u32 %v41_v18, 8 }
  0x8c   :  { %vm44_vm0 = vcmp.gt.s32.totalorder %v43_v15, 0  ;;  %v517_v17 = vadd.s32 4294967169, %v140_v16  ;;  %v144_v30 = vor.u32 8388608, %v627_v20 }
  0x8d   :  { %v45_v19 = vsel %vm44_vm0, %v43_v15, 0  ;;  %vm138_vm0 = vcmp.lt.s32.totalorder %v619_v10, 0 }
  0x8e   :  { %v46_v21 = vshrl.u32 %v45_v19, 5  ;;  %v47_v22 = vand.u32 31, %v45_v19  ;;  %v146_v23 = vadd.s32 1, %v517_v17 }
  0x90   :  { %v48_v24 = vsub.s32 32, %v47_v22  ;;  %v59_v27 = vshll.u32 %v582_v26, %v47_v22  ;;  %v62_v29 = vshll.u32 %v583_v28, %v47_v22  ;;  %vm147_vm1 = vcmp.gt.s32.totalorder %v146_v23, 0 }
  0x91   :  { %vm68_vm2 = vcmp.lt.s32.totalorder %v46_v21, 4  ;;  %v148_v34 = vsel %vm147_vm1, %v146_v23, 0  ;;  %v50_v37 = vshll.u32 %v585_v36, %v47_v22  ;;  %v53_v44 = vshll.u32 %v586_v38, %v47_v22 }
  0x92   :  { %v60_v31 = vshrl.u32 %v583_v28, %v48_v24  ;;  %v63_v33 = vshrl.u32 %v584_v32, %v48_v24  ;;  %v150_v35 = vand.u32 31, %v148_v34  ;;  %v51_v39 = vshrl.u32 %v586_v38, %v48_v24 }
  0x93   :  { %v54_v41 = vshrl.u32 %v587_v40, %v48_v24  ;;  %v57_v45 = vshrl.u32 %v582_v26, %v48_v24  ;;  %v633_v46 = vshrl.u32 %v148_v34, 5  ;;  %v56_v48 = vshll.u32 %v587_v40, %v47_v22 }
  0x94   :  { %v61_v42 = vor.u32 %v60_v31, %v59_v27  ;;  %v64_v43 = vor.u32 %v63_v33, %v62_v29  ;;  %v151_v47 = vsub.s32 32, %v150_v35  ;;  %vm65_vm3 = vcmp.lt.s32.totalorder %v46_v21, 1 }
  0x95   :  { %v165_v50 = vshll.u32 %v583_v28, %v150_v35  ;;  %v52_v51 = vor.u32 %v51_v39, %v50_v37  ;;  %v55_v52 = vor.u32 %v54_v41, %v53_v44  ;;  %v58_v56 = vor.u32 %v57_v45, %v56_v48 }
  0x96   :  { %v74_v49 = vsel %vm68_vm2, %v61_v42, 920167782  ;;  %v78_v53 = vsel %vm68_vm2, %v64_v43, 1326507024  ;;  %v163_v54 = vshrl.u32 %v583_v28, %v151_v47  ;;  %v166_v55 = vshrl.u32 %v584_v32, %v151_v47 }
  0x97   :  { %v162_v57 = vshll.u32 %v582_v26, %v150_v35  ;;  %v49_v58 = vshrl.u32 %v585_v36, %v48_v24  ;;  %vm67_vm4 = vcmp.lt.s32.totalorder %v46_v21, 3  ;;  %v73_v59 = vsel %vm65_vm3, %v52_v51, %v55_v52 }
  0x98   :  { %v167_v60 = vor.u32 %v166_v55, %v165_v50  ;;  %vm66_vm5 = vcmp.lt.s32.totalorder %v46_v21, 2  ;;  %v70_v61 = vsel %vm68_vm2, %v58_v56, 2102212464  ;;  %v75_v62 = vsel %vm67_vm4, %v58_v56, %v74_v49 }
  0x99   :  { %vm171_vm6 = vcmp.lt.s32.totalorder %v633_v46, 4  ;;  %v76_v63 = vsel %vm66_vm5, %v73_v59, %v75_v62  ;;  %v77_v0 = vsel %vm65_vm3, %v55_v52, %v58_v56  ;;  %v79_v1 = vsel %vm67_vm4, %v61_v42, %v78_v53 }
  0x9a   :  { %v164_v2 = vor.u32 %v163_v54, %v162_v57  ;;  %v69_v3 = vsel %vm65_vm3, %v49_v58, %v52_v51  ;;  %v71_v4 = vsel %vm67_vm4, %v55_v52, %v70_v61  ;;  %v80_v6 = vsel %vm66_vm5, %v77_v0, %v79_v1 }
  0x9b   :  { %v646_v8 = vmul.u32.u64.low %v629_v25, %v80_v6  ;;  %v647_v9 = vmul.u32.u64.high %v629_v25, %v80_v6, %v646_v8  ;;  %v650_v11 = vmul.u32.u64.low %v629_v25, %v76_v63  ;;  %v651_v12 = vmul.u32.u64.high %v629_v25, %v76_v63, %v650_v11 }
  0x9c   :  { %v181_v13 = vsel %vm171_vm6, %v167_v60, 1326507024  ;;  %v153_v15 = vshll.u32 %v585_v36, %v150_v35  ;;  %v154_v16 = vshrl.u32 %v586_v38, %v151_v47  ;;  %v72_v17 = vsel %vm66_vm5, %v69_v3, %v71_v4 }
  0x9d   :  { %v156_v18 = vshll.u32 %v586_v38, %v150_v35  ;;  %v157_v19 = vshrl.u32 %v587_v40, %v151_v47  ;;  %v160_v20 = vshrl.u32 %v582_v26, %v151_v47  ;;  %v177_v22 = vsel %vm171_vm6, %v164_v2, 920167782 }
  0x9e   :  { %v155_v23 = vor.u32 %v154_v16, %v153_v15  ;;  %v159_v24 = vshll.u32 %v587_v40, %v150_v35  ;;  %v184_v27 = vshll.u32 %v144_v30, 8  ;;  %vm90_vm7 = vc.u32 %v647_v9, %v650_v11 }
  0x9f   :  { %v91_v28 = vadd.s32 1, %v651_v12  ;;  %v158_v29 = vor.u32 %v157_v19, %v156_v18  ;;  %vm170_vm8 = vcmp.lt.s32.totalorder %v633_v46, 3  ;;  %v88_v31 = vmul.u32 %v629_v25, %v72_v17 }
  0xa0   :  { %v161_v21 = vor.u32 %v160_v20, %v159_v24  ;;  %vm168_vm9 = vcmp.lt.s32.totalorder %v633_v46, 1  ;;  %v182_v26 = vsel %vm170_vm8, %v164_v2, %v181_v13  ;;  %v152_v33 = vshrl.u32 %v585_v36, %v151_v47 }
  0xa1   :  { %v92_v32 = vsel %vm90_vm7, %v91_v28, %v651_v12  ;;  %vm169_vm10 = vcmp.lt.s32.totalorder %v633_v46, 2  ;;  %v176_v30 = vsel %vm168_vm9, %v155_v23, %v158_v29  ;;  %v89_v63 = vadd.s32 %v650_v11, %v647_v9 }
  0xa2   :  { %v93_v34 = vadd.s32 %v92_v32, %v88_v31  ;;  %v173_v35 = vsel %vm171_vm6, %v161_v21, 2102212464  ;;  %v178_v25 = vsel %vm170_vm8, %v161_v21, %v177_v22  ;;  %v180_v37 = vsel %vm168_vm9, %v158_v29, %v161_v21 }
  0xa3   :  { %v172_v38 = vsel %vm168_vm9, %v152_v33, %v155_v23  ;;  %v179_v39 = vsel %vm169_vm10, %v176_v30, %v178_v25  ;;  %v183_v40 = vsel %vm169_vm10, %v180_v37, %v182_v26  ;;  %v174_v42 = vsel %vm170_vm8, %v158_v29, %v173_v35 }
  0xa4   :  { %v94_v41 = vadd.s32 536870912, %v93_v34  ;;  %v675_v43 = vmul.u32.u64.low %v184_v27, %v183_v40  ;;  %v676_v36 = vmul.u32.u64.high %v184_v27, %v183_v40, %v675_v43  ;;  %v175_v48 = vsel %vm169_vm10, %v172_v38, %v174_v42 }
  0xa5   :  { %v678_v44 = vmul.u32.u64.low %v184_v27, %v179_v39  ;;  %v679_v45 = vmul.u32.u64.high %v184_v27, %v179_v39, %v678_v44  ;;  %v191_v52 = vmul.u32 %v184_v27, %v175_v48  ;;  %vm696_vm1 = vcmp.le.f32.partialorder %v136_v14, 0.7853982 }
  0xa6   :  { %v95_v47 = vshrl.u32 %v94_v41, 30  ;;  %vm125_vm5 = vweird.f32 %v615_v5 }
  0xa7   :  { %vm193_vm11 = vc.u32 %v676_v36, %v678_v44  ;;  %v194_v50 = vadd.s32 1, %v679_v45  ;;  %v192_v23 = vadd.s32 %v678_v44, %v676_v36 }
  0xa8   :  { %v96_v49 = vshll.u32 %v95_v47, 30  ;;  %v119_v21 = vsub.s32 4, %v95_v47 }
  0xa9   :  { %v195_v53 = vsel %vm193_vm11, %v194_v50, %v679_v45  ;;  %vm228_vm11 = vweird.f32 %v619_v10 }
  0xaa   :  { %v97_v51 = vsub.s32 %v93_v34, %v96_v49  ;;  %v196_v46 = vadd.s32 %v195_v53, %v191_v52  ;;  %v120_v34 = vsel %vm35_vm14, %v119_v21, %v95_v47 }
  0xab   :  { %v122_v37 = vsel %vm34_vm15, 0, %v120_v34 }
  0xac   :  { %v99_v54 = vsub.s32 0, %v97_v51  ;;  %v197_v56 = vadd.s32 536870912, %v196_v46  ;;  %v126_v40 = vand.u32 3, %v122_v37 }
  0xae   :  { %v514_v55 = vmin.u32 %v99_v54, %v97_v51  ;;  %v684_v58 = vshrl.u32 %v197_v56, 30  ;;  %vm131_vm2 = vcmp.eq.s32.totalorder %v126_v40, 2  ;;  %vm128_vm3 = vcmp.eq.s32.totalorder %v126_v40, 0 }
  0xaf   :  { %vm127_vm4 = vcmp.lt.s32.totalorder %v126_v40, 2 }
  0xb0   :  { %v101_v57 = vclz %v514_v55  ;;  %v199_v60 = vshll.u32 %v684_v58, 30  ;;  %v222_v42 = vsub.s32 4, %v684_v58 }
  0xb2   :  { %v515_v59 = vadd.s32 4294967294, %v101_v57  ;;  %v200_v62 = vsub.s32 %v196_v46, %v199_v60  ;;  %v223_v14 = vsel %vm138_vm0, %v222_v42, %v684_v58 }
  0xb3   :  { %v225_v53 = vsel %vm696_vm1, 0, %v223_v14 }
  0xb4   :  { %vm516_vm12 = vcmp.lt.s32.totalorder %v515_v59, 0  ;;  %v202_v2 = vsub.s32 0, %v200_v62  ;;  %v229_v54 = vand.u32 3, %v225_v53  ;;  %v436_v55 = vadd.s32 3, %v225_v53 }
  0xb5   :  { %v104_v61 = vsel %vm516_vm12, 0, %v515_v59 }
  0xb6   :  { %v105_v0 = vsub.s32 32, %v104_v61  ;;  %v109_v1 = vsub.s32 4294967266, %v104_v61  ;;  %v106_v3 = vshll.u32 %v97_v51, %v104_v61  ;;  %v518_v8 = vmin.u32 %v202_v2, %v200_v62 }
  0xb7   :  { %v332_v51 = vadd.s32 3, %v122_v37  ;;  %vm234_vm6 = vcmp.eq.s32.totalorder %v229_v54, 2  ;;  %vm231_vm8 = vcmp.eq.s32.totalorder %v229_v54, 0  ;;  %v437_v61 = vand.u32 3, %v436_v55 }
  0xb8   :  { %v107_v4 = vshrl.u32 %v89_v63, %v105_v0  ;;  %v110_v6 = vadd.s32 127, %v109_v1  ;;  %v204_v15 = vclz %v518_v8  ;;  %vm230_vm10 = vcmp.lt.s32.totalorder %v229_v54, 2 }
  0xb9   :  { %v333_v46 = vand.u32 3, %v332_v51 }
  0xba   :  { %v108_v12 = vor.u32 %v107_v4, %v106_v3  ;;  %v111_v13 = vshll.u32 %v110_v6, 23  ;;  %v519_v17 = vadd.s32 4294967294, %v204_v15 }
  0xbb   :  { %vm335_vm7 = vcmp.eq.s32.totalorder %v333_v46, 0  ;;  %vm338_vm9 = vcmp.eq.s32.totalorder %v333_v46, 2  ;;  %vm334_vm12 = vcmp.lt.s32.totalorder %v333_v46, 2 }
  0xbc   :  { %v112_v16 = vor.u32 4788187, %v111_v13  ;;  %v115_v19 = vcvt.s32.f32 %v108_v12  ;;  %vm520_vm13 = vcmp.lt.s32.totalorder %v519_v17, 0 }
  0xbd   :  { %v207_v22 = vsel %vm520_vm13, 0, %v519_v17  ;;  %vm439_vm13 = vcmp.eq.s32.totalorder %v437_v61, 0 }
  0xbe   :  { %v113_v18 = vand.u32 2147483647, %v112_v16  ;;  %v208_v9 = vsub.s32 32, %v207_v22  ;;  %v212_v11 = vsub.s32 4294967266, %v207_v22  ;;  %v209_v27 = vshll.u32 %v200_v62, %v207_v22 }
  0xc0   :  { %v116_v20 = vmul.f32 %v115_v19, %v113_v18  ;;  %v210_v28 = vshrl.u32 %v192_v23, %v208_v9  ;;  %v213_v29 = vadd.s32 127, %v212_v11 }
  0xc2   :  { %v117_v24 = vxor.u32 2147483648, %v116_v20  ;;  %v211_v32 = vor.u32 %v210_v28, %v209_v27  ;;  %v214_v33 = vshll.u32 %v213_v29, 23 }
  0xc4   :  { %v118_v31 = vsel %vm35_vm14, %v117_v24, %v116_v20  ;;  %v215_v30 = vor.u32 4788187, %v214_v33  ;;  %v218_v25 = vcvt.s32.f32 %v211_v32  ;;  %vm442_vm14 = vcmp.eq.s32.totalorder %v437_v61, 2 }
  0xc5   :  { %v121_v26 = vsel %vm34_vm15, %v615_v5, %v118_v31  ;;  %vm438_vm15 = vcmp.lt.s32.totalorder %v437_v61, 2 }
  0xc6   :  { %549 = vcosq.f32 %v121_v26  ;;  %v216_v35 = vand.u32 2147483647, %v215_v30 }
  0xc7   :  { %551 = vsinq.f32 %v121_v26 }
  0xc8   :  { %v219_v38 = vmul.f32 %v218_v25, %v216_v35 }
  0xca   :  { %v220_v39 = vxor.u32 2147483648, %v219_v38 }
  0xcc   :  { %v221_v41 = vsel %vm138_vm0, %v220_v39, %v219_v38  ;;  %vm479_vm0 = vcmask 261120  }
  0xcd   :  { %v224_v36 = vsel %vm696_vm1, %v619_v10, %v221_v41 }
  0xce   :  { %553 = vcosq.f32 %v224_v36 }
  0xcf   :  { %555 = vsinq.f32 %v224_v36 }
  0xd0   :  { %v550_v43 = vpop.eup %549 }
  0xd1   :  { %v552_v44 = vpop.eup %551  ;;  %v132_v45 = vxor.u32 2147483648, %v550_v43 }
  0xd2   :  { %v129_v47 = vxor.u32 2147483648, %v552_v44 }
  0xd3   :  { %v133_v48 = vsel %vm131_vm2, %v132_v45, %v552_v44  ;;  %v340_v0 = vsel %vm338_vm9, %v132_v45, %v552_v44 }
  0xd4   :  { %v130_v49 = vsel %vm128_vm3, %v550_v43, %v129_v47  ;;  %v337_v63 = vsel %vm335_vm7, %v550_v43, %v129_v47 }
  0xd5   :  { %v134_v50 = vsel %vm127_vm4, %v130_v49, %v133_v48  ;;  %v341_v3 = vsel %vm334_vm12, %v337_v63, %v340_v0 }
  0xd6   :  { %v135_v52 = vsel %vm125_vm5, nan, %v134_v50  ;;  %v342_v8 = vsel %vm125_vm5, nan, %v341_v3 }
  0xd7   :  { %447 = vxpose.xlu1.b32.start [1/4] (short) %v135_v52, 128 }
  0xd8   :  { %v554_v56 = vpop.eup %553 }
  0xd9   :  { %v556_v57 = vpop.eup %555  ;;  %v235_v59 = vxor.u32 2147483648, %v554_v56 }
  0xda   :  { %v232_v58 = vxor.u32 2147483648, %v556_v57 }
  0xdb   :  { %v236_v60 = vsel %vm234_vm6, %v235_v59, %v556_v57  ;;  %v444_v6 = vsel %vm442_vm14, %v235_v59, %v556_v57 }
  0xdc   :  { %v233_v62 = vsel %vm231_vm8, %v554_v56, %v232_v58  ;;  %v441_v4 = vsel %vm439_vm13, %v554_v56, %v232_v58 }
  0xdd   :  { %v237_v1 = vsel %vm230_vm10, %v233_v62, %v236_v60  ;;  %v445_v12 = vsel %vm438_vm15, %v441_v4, %v444_v6 }
  0xde   :  { %v238_v2 = vsel %vm228_vm11, nan, %v237_v1  ;;  %v446_v13 = vsel %vm228_vm11, nan, %v445_v12 }
  0xdf   :  { %448 = vxpose.xlu1.b32.cont [2/4] (short) %v238_v2, 128 }
  0xe3   :  { %449 = vxpose.xlu1.b32.cont [3/4] (short) %v342_v8, 128 }
  0xe7   :  { %450 = vxpose.xlu1.b32.end [4/4] (short) %v446_v13, 128 }
 0x15b   :  { %v463_v15 = vpop.trf.xlu1 }
 0x15c   :  { %480 = vst.msk [vmem:[#allocation2] sm:$0xff] %vm479_vm0, %v463_v15 }
 0x15f   :  { %v464_v10 = vpop.trf.xlu1 }
 0x160   :  { %481 = vst.msk [vmem:[#allocation2 + $0x8] sm:$0xff] %vm479_vm0, %v464_v10 }
 0x163   :  { %v465_v16 = vpop.trf.xlu1 }
 0x164   :  { %482 = vst.msk [vmem:[#allocation2 + $0x10] sm:$0xff] %vm479_vm0, %v465_v16 }
 0x167   :  { %v466_v17 = vpop.trf.xlu1 }
 0x168   :  { %483 = vst.msk [vmem:[#allocation2 + $0x18] sm:$0xff] %vm479_vm0, %v466_v17 }
 0x16b   :  { %v467_v5 = vpop.trf.xlu1 }
 0x16c   :  { %484 = vst.msk [vmem:[#allocation2 + $0x20] sm:$0xff] %vm479_vm0, %v467_v5 }
 0x16f   :  { %v468_v18 = vpop.trf.xlu1 }
 0x170   :  { %485 = vst.msk [vmem:[#allocation2 + $0x28] sm:$0xff] %vm479_vm0, %v468_v18 }
 0x173   :  { %v469_v19 = vpop.trf.xlu1 }
 0x174   :  { %486 = vst.msk [vmem:[#allocation2 + $0x30] sm:$0xff] %vm479_vm0, %v469_v19 }
 0x177   :  { %v470_v20 = vpop.trf.xlu1 }
 0x178   :  { %487 = vst.msk [vmem:[#allocation2 + $0x38] sm:$0xff] %vm479_vm0, %v470_v20 }
 0x17b   :  { %v471_v22 = vpop.trf.xlu1 }
 0x17c   :  { %488 = vst.msk [vmem:[#allocation2 + $0x40] sm:$0xff] %vm479_vm0, %v471_v22 }
 0x17f   :  { %v472_v23 = vpop.trf.xlu1 }
 0x180   :  { %489 = vst.msk [vmem:[#allocation2 + $0x48] sm:$0xff] %vm479_vm0, %v472_v23 }
 0x183   :  { %v473_v9 = vpop.trf.xlu1 }
 0x184   :  { %490 = vst.msk [vmem:[#allocation2 + $0x50] sm:$0xff] %vm479_vm0, %v473_v9 }
 0x187   :  { %v474_v11 = vpop.trf.xlu1 }
 0x188   :  { %491 = vst.msk [vmem:[#allocation2 + $0x58] sm:$0xff] %vm479_vm0, %v474_v11 }
 0x18b   :  { %v475_v24 = vpop.trf.xlu1 }
 0x18c   :  { %492 = vst.msk [vmem:[#allocation2 + $0x60] sm:$0xff] %vm479_vm0, %v475_v24 }
 0x18f   :  { %v476_v27 = vpop.trf.xlu1 }
 0x190   :  { %493 = vst.msk [vmem:[#allocation2 + $0x68] sm:$0xff] %vm479_vm0, %v476_v27 }
 0x193   :  { %v477_v28 = vpop.trf.xlu1 }
 0x194   :  { %494 = vst.msk [vmem:[#allocation2 + $0x70] sm:$0xff] %vm479_vm0, %v477_v28 }
 0x197   :  { %v478_v29 = vpop.trf.xlu1 }
 0x198   :  { %495 = vst.msk [vmem:[#allocation2 + $0x78] sm:$0xff] %vm479_vm0, %v478_v29 }
 0x199   :  { %500 = vsyncadd [#allocation3], 1792  ;;  %s588_s0 = smov [#allocation2]  }
 0x19a   :  { %s501_s1 = sshll.u32 %s588_s0, 4  ;;  %s502_s1 = int_to_ptr.vmem [resolvable:$true] %s501_s1 }
 0x19b   :  { %s557_s15 = scalar_lea.vmem %s502_s1, 256  ;;  %s561_s16 = scalar_lea.vmem %s502_s1, 2048 }
 0x19c   :  { %p558_p0 = scmp.ne.s32.totalorder %s502_s1, %s557_s15  ;;  %p562_p1 = scmp.lt.s32.totalorder %s502_s1, %s502_s1 }
 0x19d   :  { %p563_p2 = scmp.lt.s32.totalorder %s561_s16, %s557_s15 }
 0x19f   :  { %p564_p3 = por %p563_p2, %p562_p1 }
 0x1a1   :  { %p565_p4 = pnand %p564_p3, %p558_p0 }
 0x1a3   :  { %568 = shalt.err (!%p565_p4)
}
 0x1a4   :  { %s569_s19 = scalar_lea.hbm %s743_s2, 256 }
 0x1a5   :  { %p570_p5 = scmp.ne.s32.totalorder %s743_s2, %s569_s19  ;;  %p573_p6 = scmp.lt.u32.totalorder %s569_s19, %s743_s2 }
 0x1a7   :  { %p575_p7 = pnand %p573_p6, %p570_p5 }
 0x1a9   :  { %578 = shalt.err (!%p575_p7)
}
 0x1aa   :  { %s589_s24 = smov 128   ;;  %s590_s25 = smov 8  }
 0x1ab   :  { %507 = dma.vmem_to_hbm [thread:$0]  %s502_s1, 256, %s743_s2, [#allocation3], %s589_s24, %s589_s24, %s590_s25  }
 0x1ac   :  { %579 = dma.done.wait [#allocation3], 2048  }
 0x1ad   :  { %580 = vsyncadd [#allocation3], 4294965248 }
 0x1ae   :  { %511 = vsyncpa [#allocation3], 1 }

// kernel: tpu_custom_call.1
= control target key start
LH: loop header
LB: loop body
LE: loop exit
PB: predicated region body
PF: predicated region fallthrough
CT: control target
= control target key end

     0   :  { %v3852_v2 = vmov 0   ;;  %s5505_s0 = inlined_call_operand.vmem [shape: f32[128,1], index: 0, kind: input, shape index: {}]   ;;  %s5506_s1 = inlined_call_operand.vmem [shape: f32[1,16], index: 1, kind: input, shape index: {}]   ;;  %s5507_s2 = inlined_call_operand.hbm [shape: f32[16,32], index: 2, kind: output, shape index: {}]  }
   0x1   :  { %v14_v0 = vld [vmem:[%s5505_s0 + $0x10] sm:$0xff]  ;;  %v12_v1 = vld [vmem:[%s5505_s0] sm:$0xff]  ;;  %3762 = vset.pattern.permute.xlu1 %v3852_v2  ;;  %3761 = vset.pattern.permute.xlu0 %v3852_v2  ;;  %v15_v3 = vld [vmem:[%s5505_s0 + $0x18] sm:$0xff] }
   0x2   :  { %41 = vperm.xlu1 %3762, %v14_v0   ;;  %31 = vperm.xlu0 %3761, %v12_v1   ;;  %v13_v4 = vld [vmem:[%s5505_s0 + $0x8] sm:$0xff] }
   0x6   :  { %46 = vperm.xlu1 %3762, %v15_v3   ;;  %36 = vperm.xlu0 %3761, %v13_v4  }
   0x7   :  { %7 = vsyncpa [#allocation3], 0  ;;  %v17_v5 = vld [vmem:[%s5505_s0 + $0x28] sm:$0xff]  ;;  %v16_v6 = vld [vmem:[%s5505_s0 + $0x20] sm:$0xff]  ;;  %v5527_v55 = vmov 683565275  }
   0x8   :  { %v19_v7 = vld [vmem:[%s5505_s0 + $0x38] sm:$0xff]  ;;  %v18_v8 = vld [vmem:[%s5505_s0 + $0x30] sm:$0xff]  ;;  %v21_v9 = vld [vmem:[%s5505_s0 + $0x48] sm:$0xff]  ;;  %v5523_v57 = vmov 2475754826  }
   0x9   :  { %v20_v10 = vld [vmem:[%s5505_s0 + $0x40] sm:$0xff]  ;;  %v23_v11 = vld [vmem:[%s5505_s0 + $0x58] sm:$0xff]  ;;  %v22_v12 = vld [vmem:[%s5505_s0 + $0x50] sm:$0xff]  ;;  %v5525_v59 = vmov 2131351028  }
   0xa   :  { %56 = vperm.xlu1 %3762, %v17_v5   ;;  %51 = vperm.xlu0 %3761, %v16_v6   ;;  %v25_v13 = vld [vmem:[%s5505_s0 + $0x68] sm:$0xff]  ;;  %v24_v14 = vld [vmem:[%s5505_s0 + $0x60] sm:$0xff]  ;;  %v27_v15 = vld [vmem:[%s5505_s0 + $0x78] sm:$0xff]  ;;  %v5516_v61 = vmov 2102212464  }
   0xb   :  { %v26_v16 = vld [vmem:[%s5505_s0 + $0x70] sm:$0xff]  ;;  %v3929_v17 = vld [vmem:[%s5506_s1] ss:$0 sm:$0xff]  ;;  %v5520_v63 = vmov 920167782  }
   0xe   :  { %66 = vperm.xlu1 %3762, %v19_v7   ;;  %61 = vperm.xlu0 %3761, %v18_v8   ;;  %v5518_v7 = vmov 1326507024  }
  0x12   :  { %76 = vperm.xlu1 %3762, %v21_v9   ;;  %71 = vperm.xlu0 %3761, %v20_v10  }
  0x16   :  { %86 = vperm.xlu1 %3762, %v23_v11   ;;  %81 = vperm.xlu0 %3761, %v22_v12  }
  0x1a   :  { %96 = vperm.xlu1 %3762, %v25_v13   ;;  %91 = vperm.xlu0 %3761, %v24_v14  }
  0x1e   :  { %106 = vperm.xlu1 %3762, %v27_v15   ;;  %101 = vperm.xlu0 %3761, %v26_v16  }
  0x81   :  { %v42_v18 = vpop.permute.xlu1 %41  ;;  %v32_v19 = vpop.permute.xlu0 %31 }
  0x82   :  { %v3932_v20 = vmul.f32 %v3929_v17, %v42_v18  ;;  %v3935_v21 = vmul.f32 %v3929_v17, %v32_v19 }
  0x84   :  { %v5513_v22 = vand.u32 2147483647, %v3932_v20  ;;  %v340_v23 = vand.u32 2139095040, %v3932_v20  ;;  %v5515_v24 = vand.u32 2147483647, %v3935_v21  ;;  %v134_v25 = vand.u32 2139095040, %v3935_v21 }
  0x85   :  { %v47_v26 = vpop.permute.xlu1 %46  ;;  %v37_v33 = vpop.permute.xlu0 %36 }
  0x86   :  { %v341_v27 = vshrl.u32 %v340_v23, 23  ;;  %v344_v28 = vand.u32 8388607, %v5513_v22  ;;  %v138_v29 = vand.u32 8388607, %v5515_v24  ;;  %v3946_v30 = vmul.f32 %v3929_v17, %v47_v26 }
  0x87   :  { %v135_v31 = vshrl.u32 %v134_v25, 23  ;;  %v3951_v42 = vmul.f32 %v3929_v17, %v37_v33 }
  0x88   :  { %v3566_v32 = vadd.s32 4294967169, %v341_v27  ;;  %v345_v34 = vor.u32 8388608, %v344_v28  ;;  %v443_v36 = vand.u32 2139095040, %v3946_v30  ;;  %v139_v38 = vor.u32 8388608, %v138_v29 }
  0x89   :  { %v3558_v35 = vadd.s32 4294967169, %v135_v31  ;;  %v5511_v40 = vand.u32 2147483647, %v3946_v30  ;;  %v237_v53 = vand.u32 2139095040, %v3951_v42 }
  0x8a   :  { %v347_v37 = vadd.s32 1, %v3566_v32  ;;  %v444_v41 = vshrl.u32 %v443_v36, 23  ;;  %v3953_v44 = vshll.u32 %v345_v34, 8  ;;  %v3955_v49 = vshll.u32 %v139_v38, 8 }
  0x8b   :  { %v141_v39 = vadd.s32 1, %v3558_v35  ;;  %v3961_v52 = vand.u32 8388607, %v5511_v40 }
  0x8c   :  { %vm348_vm0 = vcmp.gt.s32.totalorder %v347_v37, 0  ;;  %v3570_v45 = vadd.s32 4294967169, %v444_v41 }
  0x8d   :  { %v349_v43 = vsel %vm348_vm0, %v347_v37, 0  ;;  %vm142_vm1 = vcmp.gt.s32.totalorder %v141_v39, 0 }
  0x8e   :  { %v350_v46 = vshrl.u32 %v349_v43, 5  ;;  %v351_v47 = vand.u32 31, %v349_v43  ;;  %v143_v48 = vsel %vm142_vm1, %v141_v39, 0  ;;  %v3969_v1 = vadd.s32 1, %v3570_v45 }
  0x8f   :  { %v3957_v50 = vshrl.u32 %v143_v48, 5  ;;  %v145_v51 = vand.u32 31, %v143_v48 }
  0x90   :  { %v352_v54 = vsub.s32 32, %v351_v47  ;;  %v354_v56 = vshll.u32 %v5527_v55, %v351_v47  ;;  %v357_v58 = vshll.u32 %v5523_v57, %v351_v47  ;;  %v360_v60 = vshll.u32 %v5525_v59, %v351_v47 }
  0x91   :  { %v363_v62 = vshll.u32 %v5516_v61, %v351_v47  ;;  %v366_v0 = vshll.u32 %v5520_v63, %v351_v47  ;;  %vm369_vm2 = vcmp.lt.s32.totalorder %v350_v46, 1  ;;  %vm370_vm3 = vcmp.lt.s32.totalorder %v350_v46, 2 }
  0x92   :  { %v353_v2 = vshrl.u32 %v5527_v55, %v352_v54  ;;  %v355_v3 = vshrl.u32 %v5523_v57, %v352_v54  ;;  %v358_v4 = vshrl.u32 %v5525_v59, %v352_v54  ;;  %v361_v5 = vshrl.u32 %v5516_v61, %v352_v54 }
  0x93   :  { %v364_v6 = vshrl.u32 %v5520_v63, %v352_v54  ;;  %v367_v8 = vshrl.u32 %v5518_v7, %v352_v54  ;;  %vm371_vm4 = vcmp.lt.s32.totalorder %v350_v46, 3  ;;  %v146_v12 = vsub.s32 32, %v145_v51 }
  0x94   :  { %v356_v9 = vor.u32 %v355_v3, %v354_v56  ;;  %v359_v10 = vor.u32 %v358_v4, %v357_v58  ;;  %v362_v11 = vor.u32 %v361_v5, %v360_v60  ;;  %vm372_vm5 = vcmp.lt.s32.totalorder %v350_v46, 4 }
  0x95   :  { %v365_v13 = vor.u32 %v364_v6, %v363_v62  ;;  %v368_v14 = vor.u32 %v367_v8, %v366_v0  ;;  %v148_v15 = vshll.u32 %v5527_v55, %v145_v51  ;;  %v151_v28 = vshll.u32 %v5523_v57, %v145_v51 }
  0x96   :  { %v373_v16 = vsel %vm369_vm2, %v353_v2, %v356_v9  ;;  %v374_v18 = vsel %vm372_vm5, %v362_v11, 2102212464  ;;  %v377_v19 = vsel %vm369_vm2, %v356_v9, %v359_v10  ;;  %v381_v23 = vsel %vm369_vm2, %v359_v10, %v362_v11 }
  0x97   :  { %v375_v25 = vsel %vm371_vm4, %v359_v10, %v374_v18  ;;  %v378_v26 = vsel %vm372_vm5, %v365_v13, 920167782  ;;  %v382_v27 = vsel %vm372_vm5, %v368_v14, 1326507024  ;;  %v147_v32 = vshrl.u32 %v5527_v55, %v146_v12 }
  0x98   :  { %v379_v29 = vsel %vm371_vm4, %v362_v11, %v378_v26  ;;  %v383_v31 = vsel %vm371_vm4, %v365_v13, %v382_v27  ;;  %v149_v33 = vshrl.u32 %v5523_v57, %v146_v12  ;;  %v376_v34 = vsel %vm370_vm3, %v373_v16, %v375_v25 }
  0x99   :  { %v380_v35 = vsel %vm370_vm3, %v377_v19, %v379_v29  ;;  %v384_v36 = vsel %vm370_vm3, %v381_v23, %v383_v31  ;;  %v152_v37 = vshrl.u32 %v5525_v59, %v146_v12  ;;  %v154_v48 = vshll.u32 %v5525_v59, %v145_v51 }
  0x9a   :  { %v3992_v38 = vmul.u32.u64.low %v3953_v44, %v384_v36  ;;  %v3993_v39 = vmul.u32.u64.high %v3953_v44, %v384_v36, %v3992_v38  ;;  %v3996_v41 = vmul.u32.u64.low %v3953_v44, %v380_v35  ;;  %v3997_v43 = vmul.u32.u64.high %v3953_v44, %v380_v35, %v3996_v41 }
  0x9b   :  { %v150_v45 = vor.u32 %v149_v33, %v148_v15  ;;  %v153_v47 = vor.u32 %v152_v37, %v151_v28  ;;  %v155_v54 = vshrl.u32 %v5516_v61, %v146_v12  ;;  %v392_v46 = vmul.u32 %v3953_v44, %v376_v34 }
  0x9c   :  { %v157_v56 = vshll.u32 %v5516_v61, %v145_v51  ;;  %v158_v58 = vshrl.u32 %v5520_v63, %v146_v12  ;;  %v161_v60 = vshrl.u32 %v5518_v7, %v146_v12  ;;  %v160_v0 = vshll.u32 %v5520_v63, %v145_v51 }
  0x9d   :  { %v156_v62 = vor.u32 %v155_v54, %v154_v48  ;;  %vm163_vm6 = vcmp.lt.s32.totalorder %v3957_v50, 1  ;;  %vm164_vm7 = vcmp.lt.s32.totalorder %v3957_v50, 2  ;;  %vm394_vm8 = vc.u32 %v3993_v39, %v3996_v41 }
  0x9e   :  { %v395_v2 = vadd.s32 1, %v3997_v43  ;;  %v159_v3 = vor.u32 %v158_v58, %v157_v56  ;;  %vm165_vm9 = vcmp.lt.s32.totalorder %v3957_v50, 3  ;;  %v162_v44 = vor.u32 %v161_v60, %v160_v0 }
  0x9f   :  { %vm166_vm10 = vcmp.lt.s32.totalorder %v3957_v50, 4  ;;  %v167_v4 = vsel %vm163_vm6, %v147_v32, %v150_v45  ;;  %v171_v5 = vsel %vm163_vm6, %v150_v45, %v153_v47  ;;  %v175_v9 = vsel %vm163_vm6, %v153_v47, %v156_v62 }
  0xa0   :  { %v396_v6 = vsel %vm394_vm8, %v395_v2, %v3997_v43  ;;  %v168_v51 = vsel %vm166_vm10, %v156_v62, 2102212464  ;;  %v172_v8 = vsel %vm166_vm10, %v159_v3, 920167782  ;;  %v176_v13 = vsel %vm166_vm10, %v162_v44, 1326507024 }
  0xa1   :  { %v397_v10 = vadd.s32 %v396_v6, %v392_v46  ;;  %v169_v11 = vsel %vm165_vm9, %v153_v47, %v168_v51  ;;  %v173_v12 = vsel %vm165_vm9, %v156_v62, %v172_v8  ;;  %v177_v15 = vsel %vm165_vm9, %v159_v3, %v176_v13 }
  0xa2   :  { %v174_v14 = vsel %vm164_vm7, %v171_v5, %v173_v12  ;;  %vm451_vm11 = vcmp.gt.s32.totalorder %v3969_v1, 0  ;;  %v238_v16 = vshrl.u32 %v237_v53, 23  ;;  %v178_v19 = vsel %vm164_vm7, %v175_v9, %v177_v15 }
  0xa3   :  { %v398_v18 = vadd.s32 536870912, %v397_v10  ;;  %v4023_v23 = vmul.u32.u64.low %v3955_v49, %v174_v14  ;;  %v4024_v25 = vmul.u32.u64.high %v3955_v49, %v174_v14, %v4023_v23  ;;  %v170_v26 = vsel %vm164_vm7, %v167_v4, %v169_v11 }
  0xa4   :  { %v4030_v27 = vmul.u32.u64.low %v3955_v49, %v178_v19  ;;  %v4031_v28 = vmul.u32.u64.high %v3955_v49, %v178_v19, %v4030_v27  ;;  %v452_v29 = vsel %vm451_vm11, %v3969_v1, 0  ;;  %v448_v32 = vor.u32 8388608, %v3961_v52 }
  0xa5   :  { %v4034_v31 = vshrl.u32 %v398_v18, 30  ;;  %v454_v53 = vand.u32 31, %v452_v29  ;;  %v5512_v33 = vand.u32 2147483647, %v3951_v42  ;;  %v3562_v34 = vadd.s32 4294967169, %v238_v16 }
  0xa6   :  { %v186_v36 = vmul.u32 %v3955_v49, %v170_v26  ;;  %v189_v50 = vadd.s32 1, %v4024_v25  ;;  %vm188_vm12 = vc.u32 %v4031_v28, %v4023_v23  ;;  %v453_v38 = vshrl.u32 %v452_v29, 5 }
  0xa7   :  { %v400_v35 = vshll.u32 %v4034_v31, 30  ;;  %v455_v37 = vsub.s32 32, %v454_v53  ;;  %v457_v1 = vshll.u32 %v5527_v55, %v454_v53  ;;  %v460_v43 = vshll.u32 %v5523_v57, %v454_v53 }
  0xa8   :  { %v190_v52 = vsel %vm188_vm12, %v189_v50, %v4024_v25  ;;  %v463_v48 = vshll.u32 %v5525_v59, %v454_v53  ;;  %v466_v56 = vshll.u32 %v5516_v61, %v454_v53  ;;  %v469_v0 = vshll.u32 %v5520_v63, %v454_v53 }
  0xa9   :  { %v4045_v45 = vsub.s32 %v397_v10, %v400_v35  ;;  %v458_v47 = vshrl.u32 %v5523_v57, %v455_v37  ;;  %v191_v49 = vadd.s32 %v190_v52, %v186_v36  ;;  %v461_v54 = vshrl.u32 %v5525_v59, %v455_v37 }
  0xaa   :  { %v464_v46 = vshrl.u32 %v5516_v61, %v455_v37  ;;  %v467_v62 = vshrl.u32 %v5520_v63, %v455_v37  ;;  %v470_v4 = vshrl.u32 %v5518_v7, %v455_v37  ;;  %v488_v51 = vshll.u32 %v448_v32, 8 }
  0xab   :  { %v403_v58 = vsub.s32 0, %v4045_v45  ;;  %v459_v60 = vor.u32 %v458_v47, %v457_v1  ;;  %v192_v2 = vadd.s32 536870912, %v191_v49  ;;  %v462_v3 = vor.u32 %v461_v54, %v460_v43 }
  0xac   :  { %v465_v44 = vor.u32 %v464_v46, %v463_v48  ;;  %v468_v6 = vor.u32 %v467_v62, %v466_v56  ;;  %v244_v8 = vadd.s32 1, %v3562_v34  ;;  %v471_v10 = vor.u32 %v470_v4, %v469_v0  ;;  %v57_v48 = vpop.permute.xlu1 %56 }
  0xad   :  { %v3567_v5 = vmin.u32 %v403_v58, %v4045_v45  ;;  %v4058_v9 = vshrl.u32 %v192_v2, 30  ;;  %vm472_vm13 = vcmp.lt.s32.totalorder %v453_v38, 1  ;;  %vm475_vm14 = vcmp.lt.s32.totalorder %v453_v38, 4 }
  0xae   :  { %v456_v12 = vshrl.u32 %v5527_v55, %v455_v37  ;;  %v477_v13 = vsel %vm475_vm14, %v465_v44, 2102212464  ;;  %v480_v14 = vsel %vm472_vm13, %v459_v60, %v462_v3  ;;  %vm474_vm15 = vcmp.lt.s32.totalorder %v453_v38, 3 }
  0xaf   :  { %v405_v11 = vclz %v3567_v5  ;;  %v194_v15 = vshll.u32 %v4058_v9, 30  ;;  %v481_v16 = vsel %vm475_vm14, %v468_v6, 920167782  ;;  %v484_v18 = vsel %vm472_vm13, %v462_v3, %v465_v44 }
  0xb0   :  { %vm473_vm0 = vcmp.lt.s32.totalorder %v453_v38, 2  ;;  %v476_v19 = vsel %vm472_vm13, %v456_v12, %v459_v60  ;;  %v482_v25 = vsel %vm474_vm15, %v465_v44, %v481_v16  ;;  %v485_v26 = vsel %vm475_vm14, %v471_v10, 1326507024 }
  0xb1   :  { %v4062_v27 = vsub.s32 %v191_v49, %v194_v15  ;;  %v478_v29 = vsel %vm474_vm15, %v462_v3, %v477_v13  ;;  %v483_v53 = vsel %vm473_vm0, %v480_v14, %v482_v25  ;;  %v486_v32 = vsel %vm474_vm15, %v468_v6, %v485_v26 }
  0xb2   :  { %v3568_v34 = vadd.s32 4294967294, %v405_v11  ;;  %v487_v35 = vsel %vm473_vm0, %v484_v18, %v486_v32  ;;  %v4064_v36 = vmul.u32.u64.low %v488_v51, %v483_v53  ;;  %v4065_v50 = vmul.u32.u64.high %v488_v51, %v483_v53, %v4064_v36 }
  0xb3   :  { %v197_v37 = vsub.s32 0, %v4062_v27  ;;  %v4069_v1 = vmul.u32.u64.low %v488_v51, %v487_v35  ;;  %v4070_v43 = vmul.u32.u64.high %v488_v51, %v487_v35, %v4069_v1  ;;  %v479_v38 = vsel %vm473_vm0, %v476_v19, %v478_v29 }
  0xb4   :  { %vm245_vm1 = vcmp.gt.s32.totalorder %v244_v8, 0  ;;  %vm3569_vm2 = vcmp.lt.s32.totalorder %v3568_v34, 0  ;;  %v498_v49 = vadd.s32 1, %v4065_v50  ;;  %v241_v54 = vand.u32 8388607, %v5512_v33 }
  0xb5   :  { %v3559_v52 = vmin.u32 %v197_v37, %v4062_v27  ;;  %v246_v47 = vsel %vm245_vm1, %v244_v8, 0  ;;  %v495_v56 = vmul.u32 %v488_v51, %v479_v38  ;;  %vm497_vm3 = vc.u32 %v4070_v43, %v4064_v36 }
  0xb6   :  { %v248_v58 = vand.u32 31, %v246_v47  ;;  %v499_v60 = vsel %vm497_vm3, %v498_v49, %v4065_v50  ;;  %v4080_v62 = vmul.f32 %v3929_v17, %v57_v48  ;;  %v4082_v0 = vsel %vm3569_vm2, 0, %v3568_v34 }
  0xb7   :  { %v199_v46 = vclz %v3559_v52  ;;  %v500_v2 = vadd.s32 %v499_v60, %v495_v56  ;;  %v393_v4 = vadd.s32 %v3996_v41, %v3993_v39  ;;  %v242_v6 = vor.u32 8388608, %v241_v54 }
  0xb8   :  { %5571 = vst [vmem:[#allocation5_spill] sm:$0xff] %v4080_v62  ;;  %v249_v3 = vsub.s32 32, %v248_v58  ;;  %v409_v8 = vsub.s32 32, %v4082_v0  ;;  %v649_v12 = vand.u32 2139095040, %v4080_v62  ;;  %v251_v14 = vshll.u32 %v5527_v55, %v248_v58 }
  0xb9   :  { %v3560_v44 = vadd.s32 4294967294, %v199_v46  ;;  %v501_v5 = vadd.s32 536870912, %v500_v2  ;;  %v254_v15 = vshll.u32 %v5523_v57, %v248_v58  ;;  %v257_v39 = vshll.u32 %v5525_v59, %v248_v58 }
  0xba   :  { %v252_v51 = vshrl.u32 %v5523_v57, %v249_v3  ;;  %v255_v10 = vshrl.u32 %v5525_v59, %v249_v3  ;;  %v258_v11 = vshrl.u32 %v5516_v61, %v249_v3  ;;  %v413_v41 = vsub.s32 4294967266, %v4082_v0 }
  0xbb   :  { %v4091_v13 = vshrl.u32 %v501_v5, 30  ;;  %vm3561_vm4 = vcmp.lt.s32.totalorder %v3560_v44, 0  ;;  %v247_v16 = vshrl.u32 %v246_v47, 5  ;;  %v5509_v18 = vand.u32 2147483647, %v4080_v62 }
  0xbc   :  { %v253_v25 = vor.u32 %v252_v51, %v251_v14  ;;  %v256_v26 = vor.u32 %v255_v10, %v254_v15  ;;  %v259_v29 = vor.u32 %v258_v11, %v257_v39  ;;  %v260_v53 = vshll.u32 %v5516_v61, %v248_v58 }
  0xbd   :  { %v503_v19 = vshll.u32 %v4091_v13, 30  ;;  %v261_v32 = vshrl.u32 %v5520_v63, %v249_v3  ;;  %v263_v34 = vshll.u32 %v5520_v63, %v248_v58  ;;  %v264_v35 = vshrl.u32 %v5518_v7, %v249_v3 }
  0xbe   :  { %v411_v50 = vshrl.u32 %v393_v4, %v409_v8  ;;  %v282_v1 = vshll.u32 %v242_v6, 8  ;;  %v650_v38 = vshrl.u32 %v649_v12, 23  ;;  %v414_v52 = vadd.s32 127, %v413_v41 }
  0xbf   :  { %v4103_v37 = vsub.s32 %v500_v2, %v503_v19  ;;  %v202_v47 = vsel %vm3561_vm4, 0, %v3560_v44  ;;  %v262_v48 = vor.u32 %v261_v32, %v260_v53  ;;  %v265_v49 = vor.u32 %v264_v35, %v263_v34 }
  0xc0   :  { %v250_v46 = vshrl.u32 %v5527_v55, %v249_v3  ;;  %vm266_vm5 = vcmp.lt.s32.totalorder %v247_v16, 1  ;;  %vm269_vm6 = vcmp.lt.s32.totalorder %v247_v16, 4  ;;  %vm268_vm7 = vcmp.lt.s32.totalorder %v247_v16, 3 }
  0xc1   :  { %v506_v54 = vsub.s32 0, %v4103_v37  ;;  %v271_v56 = vsel %vm269_vm6, %v259_v29, 2102212464  ;;  %v274_v58 = vsel %vm266_vm5, %v253_v25, %v256_v26  ;;  %v275_v60 = vsel %vm269_vm6, %v262_v48, 920167782 }
  0xc2   :  { %v207_v4 = vsub.s32 4294967266, %v202_v47  ;;  %vm267_vm8 = vcmp.lt.s32.totalorder %v247_v16, 2  ;;  %v276_v5 = vsel %vm268_vm7, %v259_v29, %v275_v60  ;;  %v415_v6 = vshll.u32 %v414_v52, 23 }
  0xc3   :  { %v3571_v2 = vmin.u32 %v506_v54, %v4103_v37  ;;  %v277_v44 = vsel %vm267_vm8, %v274_v58, %v276_v5  ;;  %v278_v51 = vsel %vm266_vm5, %v256_v26, %v259_v29  ;;  %v279_v8 = vsel %vm269_vm6, %v265_v49, 1326507024  ;;  %v67_v58 = vpop.permute.xlu1 %66 }
  0xc4   :  { %v270_v11 = vsel %vm266_vm5, %v250_v46, %v253_v25  ;;  %v272_v12 = vsel %vm268_vm7, %v256_v26, %v271_v56  ;;  %v280_v3 = vsel %vm268_vm7, %v262_v48, %v279_v8  ;;  %v3578_v41 = vadd.s32 4294967169, %v650_v38 }
  0xc5   :  { %v508_v10 = vclz %v3571_v2  ;;  %v281_v14 = vsel %vm267_vm8, %v278_v51, %v280_v3  ;;  %v4111_v15 = vmul.u32.u64.low %v282_v1, %v277_v44  ;;  %v4112_v39 = vmul.u32.u64.high %v282_v1, %v277_v44, %v4111_v15 }
  0xc6   :  { %v203_v19 = vsub.s32 32, %v202_v47  ;;  %v208_v53 = vadd.s32 127, %v207_v4  ;;  %v4115_v32 = vmul.u32.u64.low %v282_v1, %v281_v14  ;;  %v4116_v34 = vmul.u32.u64.high %v282_v1, %v281_v14, %v4115_v32 }
  0xc7   :  { %v410_v29 = vshll.u32 %v4045_v45, %v4082_v0  ;;  %v656_v35 = vadd.s32 1, %v3578_v41  ;;  %v187_v25 = vadd.s32 %v4023_v23, %v4031_v28  ;;  %v3572_v26 = vadd.s32 4294967294, %v508_v10  ;;  %v52_v28 = vpop.permute.xlu0 %51 }
  0xc8   :  { %v273_v52 = vsel %vm267_vm8, %v270_v11, %v272_v12  ;;  %v653_v48 = vand.u32 8388607, %v5509_v18  ;;  %v292_v38 = vadd.s32 1, %v4112_v39  ;;  %v4128_v54 = vor.u32 4788187, %v415_v6 }
  0xc9   :  { %v4125_v49 = vor.u32 %v411_v50, %v410_v29  ;;  %vm657_vm9 = vcmp.gt.s32.totalorder %v656_v35, 0  ;;  %v205_v46 = vshrl.u32 %v187_v25, %v203_v19  ;;  %v209_v56 = vshll.u32 %v208_v53, 23 }
  0xca   :  { %v289_v45 = vmul.u32 %v282_v1, %v273_v52  ;;  %vm291_vm10 = vc.u32 %v4116_v34, %v4111_v15  ;;  %v658_v23 = vsel %vm657_vm9, %v656_v35, 0  ;;  %v204_v0 = vshll.u32 %v4062_v27, %v202_v47 }
  0xcb   :  { %vm3573_vm11 = vcmp.lt.s32.totalorder %v3572_v26, 0  ;;  %v293_v16 = vsel %vm291_vm10, %v292_v38, %v4112_v39  ;;  %v654_v50 = vor.u32 8388608, %v653_v48  ;;  %v419_v60 = vcvt.s32.f32 %v4125_v49 }
  0xcc   :  { %v294_v4 = vadd.s32 %v293_v16, %v289_v45  ;;  %v660_v2 = vand.u32 31, %v658_v23  ;;  %v417_v5 = vand.u32 2147483647, %v4128_v54  ;;  %v4136_v6 = vor.u32 %v205_v46, %v204_v0 }
  0xcd   :  { %v4138_v1 = vor.u32 4788187, %v209_v56  ;;  %v4141_v44 = vmul.f32 %v3929_v17, %v52_v28  ;;  %v4143_v51 = vsel %vm3573_vm11, 0, %v3572_v26  ;;  %v4146_v8 = vmul.f32 %v3929_v17, %v67_v58 }
  0xce   :  { %v295_v27 = vadd.s32 536870912, %v294_v4  ;;  %v661_v47 = vsub.s32 32, %v660_v2  ;;  %v659_v10 = vshrl.u32 %v658_v23, 5  ;;  %v663_v11 = vshll.u32 %v5527_v55, %v660_v2 }
  0xcf   :  { %5572 = vst [vmem:[#allocation6_spill] sm:$0xff] %v4141_v44  ;;  %v666_v12 = vshll.u32 %v5523_v57, %v660_v2  ;;  %v4150_v3 = vshll.u32 %v654_v50, 8  ;;  %v669_v19 = vshll.u32 %v5525_v59, %v660_v2  ;;  %v672_v32 = vshll.u32 %v5516_v61, %v660_v2 }
  0xd0   :  { %v4152_v14 = vshrl.u32 %v295_v27, 30  ;;  %v664_v39 = vshrl.u32 %v5523_v57, %v661_v47  ;;  %v667_v41 = vshrl.u32 %v5525_v59, %v661_v47  ;;  %v670_v53 = vshrl.u32 %v5516_v61, %v661_v47 }
  0xd1   :  { %v673_v29 = vshrl.u32 %v5520_v63, %v661_v47  ;;  %v675_v35 = vshll.u32 %v5520_v63, %v660_v2  ;;  %v676_v48 = vshrl.u32 %v5518_v7, %v661_v47  ;;  %vm678_vm12 = vcmp.lt.s32.totalorder %v659_v10, 1 }
  0xd2   :  { %v297_v25 = vshll.u32 %v4152_v14, 30  ;;  %v665_v26 = vor.u32 %v664_v39, %v663_v11  ;;  %v668_v52 = vor.u32 %v667_v41, %v666_v12  ;;  %v671_v49 = vor.u32 %v670_v53, %v669_v19 }
  0xd3   :  { %v674_v38 = vor.u32 %v673_v29, %v672_v32  ;;  %v546_v54 = vand.u32 2139095040, %v4141_v44  ;;  %v662_v56 = vshrl.u32 %v5527_v55, %v661_v47  ;;  %v677_v45 = vor.u32 %v676_v48, %v675_v35 }
  0xd4   :  { %v4164_v46 = vsub.s32 %v294_v4, %v297_v25  ;;  %vm681_vm13 = vcmp.lt.s32.totalorder %v659_v10, 4  ;;  %vm680_vm14 = vcmp.lt.s32.totalorder %v659_v10, 3  ;;  %v686_v28 = vsel %vm678_vm12, %v665_v26, %v668_v52 }
  0xd5   :  { %v683_v23 = vsel %vm681_vm13, %v671_v49, 2102212464  ;;  %v687_v0 = vsel %vm681_vm13, %v674_v38, 920167782  ;;  %vm679_vm15 = vcmp.lt.s32.totalorder %v659_v10, 2  ;;  %v690_v58 = vsel %vm678_vm12, %v668_v52, %v671_v49 }
  0xd6   :  { %v300_v16 = vsub.s32 0, %v4164_v46  ;;  %v688_v50 = vsel %vm680_vm14, %v671_v49, %v687_v0  ;;  %v516_v2 = vsub.s32 4294967266, %v4143_v51  ;;  %v682_v27 = vsel %vm678_vm12, %v662_v56, %v665_v26 }
  0xd7   :  { %v689_v11 = vsel %vm679_vm15, %v686_v28, %v688_v50  ;;  %v691_v4 = vsel %vm681_vm13, %v677_v45, 1326507024  ;;  %v684_v12 = vsel %vm680_vm14, %v668_v52, %v683_v23  ;;  %v5510_v32 = vand.u32 2147483647, %v4141_v44 }
  0xd8   :  { %v692_v39 = vsel %vm680_vm14, %v674_v38, %v691_v4  ;;  %v4171_v47 = vmul.u32.u64.low %v4150_v3, %v689_v11  ;;  %v4172_v41 = vmul.u32.u64.high %v4150_v3, %v689_v11, %v4171_v47  ;;  %v3563_v19 = vmin.u32 %v300_v16, %v4164_v46  ;;  %v62_v4 = vpop.permute.xlu0 %61 }
  0xd9   :  { %v693_v53 = vsel %vm679_vm15, %v690_v58, %v692_v39  ;;  %v547_v29 = vshrl.u32 %v546_v54, 23  ;;  %v420_v35 = vmul.f32 %v419_v60, %v417_v5  ;;  %v211_v52 = vand.u32 2147483647, %v4138_v1 }
  0xda   :  { %v4179_v25 = vmul.u32.u64.low %v4150_v3, %v693_v53  ;;  %v4180_v26 = vmul.u32.u64.high %v4150_v3, %v693_v53, %v4179_v25  ;;  %v685_v48 = vsel %vm679_vm15, %v682_v27, %v684_v12  ;;  %v855_v38 = vand.u32 2139095040, %v4146_v8  ;;  %v77_v12 = vpop.permute.xlu1 %76 }
  0xdb   :  { %v3574_v49 = vadd.s32 4294967169, %v547_v29  ;;  %v213_v56 = vcvt.s32.f32 %v4136_v6  ;;  %v512_v45 = vsub.s32 32, %v4143_v51  ;;  %v517_v23 = vadd.s32 127, %v516_v2 }
  0xdc   :  { %v704_v28 = vadd.s32 1, %v4172_v41  ;;  %v302_v54 = vclz %v3563_v19  ;;  %v550_v60 = vand.u32 8388607, %v5510_v32  ;;  %v856_v0 = vshrl.u32 %v855_v38, 23 }
  0xdd   :  { %v553_v5 = vadd.s32 1, %v3574_v49  ;;  %v421_v16 = vxor.u32 2147483648, %v420_v35  ;;  %v496_v1 = vadd.s32 %v4064_v36, %v4070_v43  ;;  %v701_v10 = vmul.u32 %v4150_v3, %v685_v48 }
  0xde   :  { %vm703_vm0 = vc.u32 %v4180_v26, %v4171_v47  ;;  %vm339_vm1 = vcmp.lt.s32.totalorder %v3932_v20, 0  ;;  %v4196_v6 = vmul.f32 %v213_v56, %v211_v52  ;;  %v518_v2 = vshll.u32 %v517_v23, 23 }
  0xdf   :  { %v705_v50 = vsel %vm703_vm0, %v704_v28, %v4172_v41  ;;  %vm554_vm2 = vcmp.gt.s32.totalorder %v553_v5, 0  ;;  %v514_v58 = vshrl.u32 %v496_v1, %v512_v45  ;;  %v5508_v11 = vand.u32 2147483647, %v4146_v8 }
  0xe0   :  { %v706_v27 = vadd.s32 %v705_v50, %v701_v10  ;;  %v3564_v36 = vadd.s32 4294967294, %v302_v54  ;;  %v551_v43 = vor.u32 8388608, %v550_v60  ;;  %v555_v3 = vsel %vm554_vm2, %v553_v5, 0 }
  0xe1   :  { %v3586_v39 = vadd.s32 4294967169, %v856_v0  ;;  %v4202_v19 = vsel %vm339_vm1, %v421_v16, %v420_v35  ;;  %v513_v53 = vshll.u32 %v4103_v37, %v4143_v51  ;;  %v557_v25 = vand.u32 31, %v555_v3 }
  0xe2   :  { %v707_v41 = vadd.s32 536870912, %v706_v27  ;;  %v4208_v52 = vmul.f32 %v3929_v17, %v62_v4  ;;  %v4211_v48 = vmul.f32 %v3929_v17, %v77_v12  ;;  %v4215_v38 = vor.u32 4788187, %v518_v2 }
  0xe3   :  { %v4213_v49 = vor.u32 %v514_v58, %v513_v53  ;;  %v4221_v35 = vand.u32 8388607, %v5508_v11  ;;  %vm3565_vm3 = vcmp.lt.s32.totalorder %v3564_v36, 0  ;;  %v558_v37 = vsub.s32 32, %v557_v25 }
  0xe4   :  { %5573 = vst [vmem:[#allocation7_spill] sm:$0xff] %v4211_v48  ;;  %v4217_v56 = vshrl.u32 %v707_v41, 30  ;;  %v4223_v51 = vshll.u32 %v551_v43, 8  ;;  %v862_v45 = vadd.s32 1, %v3586_v39  ;;  %v556_v28 = vshrl.u32 %v555_v3, 5 }
  0xe5   :  { %v560_v17 = vshll.u32 %v5527_v55, %v557_v25  ;;  %v563_v54 = vshll.u32 %v5523_v57, %v557_v25  ;;  %v561_v60 = vshrl.u32 %v5523_v57, %v558_v37  ;;  %v564_v5 = vshrl.u32 %v5525_v59, %v558_v37 }
  0xe6   :  { %5574 = vst [vmem:[#allocation8_spill] sm:$0xff] %v4217_v56  ;;  %v709_v23 = vshll.u32 %v4217_v56, 30  ;;  %v566_v0 = vshll.u32 %v5525_v59, %v557_v25  ;;  %v567_v16 = vshrl.u32 %v5516_v61, %v558_v37  ;;  %v569_v10 = vshll.u32 %v5516_v61, %v557_v25 }
  0xe7   :  { %v570_v50 = vshrl.u32 %v5520_v63, %v558_v37  ;;  %v572_v58 = vshll.u32 %v5520_v63, %v557_v25  ;;  %v562_v2 = vor.u32 %v561_v60, %v560_v17  ;;  %v565_v4 = vor.u32 %v564_v5, %v563_v54 }
  0xe8   :  { %v4232_v1 = vsub.s32 %v706_v27, %v709_v23  ;;  %v568_v12 = vor.u32 %v567_v16, %v566_v0  ;;  %v573_v43 = vshrl.u32 %v5518_v7, %v558_v37  ;;  %v4239_v3 = vsel %vm3565_vm3, 0, %v3564_v36 }
  0xe9   :  { %v571_v53 = vor.u32 %v570_v50, %v569_v10  ;;  %v860_v27 = vor.u32 8388608, %v4221_v35  ;;  %vm575_vm4 = vcmp.lt.s32.totalorder %v556_v28, 1  ;;  %vm578_vm5 = vcmp.lt.s32.totalorder %v556_v28, 4 }
  0xea   :  { %v712_v39 = vsub.s32 0, %v4232_v1  ;;  %v574_v41 = vor.u32 %v573_v43, %v572_v58  ;;  %vm863_vm6 = vcmp.gt.s32.totalorder %v862_v45, 0  ;;  %v559_v25 = vshrl.u32 %v5527_v55, %v558_v37 }
  0xeb   :  { %v580_v17 = vsel %vm578_vm5, %v568_v12, 2102212464  ;;  %v583_v54 = vsel %vm575_vm4, %v562_v2, %v565_v4  ;;  %vm577_vm7 = vcmp.lt.s32.totalorder %v556_v28, 3  ;;  %v584_v60 = vsel %vm578_vm5, %v571_v53, 920167782 }
  0xec   :  { %v3579_v23 = vmin.u32 %v712_v39, %v4232_v1  ;;  %v587_v5 = vsel %vm575_vm4, %v565_v4, %v568_v12  ;;  %v588_v36 = vsel %vm578_vm5, %v574_v41, 1326507024  ;;  %v310_v0 = vsub.s32 4294967266, %v4239_v3 }
  0xed   :  { %vm576_vm8 = vcmp.lt.s32.totalorder %v556_v28, 2  ;;  %v579_v16 = vsel %vm575_vm4, %v559_v25, %v562_v2  ;;  %v585_v10 = vsel %vm577_vm7, %v568_v12, %v584_v60  ;;  %v581_v35 = vsel %vm577_vm7, %v565_v4, %v580_v17 }
  0xee   :  { %v586_v50 = vsel %vm576_vm8, %v583_v54, %v585_v10  ;;  %v589_v58 = vsel %vm577_vm7, %v571_v53, %v588_v36  ;;  %v864_v43 = vsel %vm863_vm6, %v862_v45, 0  ;;  %v714_v39 = vclz %v3579_v23 }
  0xef   :  { %v590_v37 = vsel %vm576_vm8, %v587_v5, %v589_v58  ;;  %v4250_v11 = vmul.u32.u64.low %v4223_v51, %v586_v50  ;;  %v4251_v18 = vmul.u32.u64.high %v4223_v51, %v586_v50, %v4250_v11  ;;  %v866_v2 = vand.u32 31, %v864_v43 }
  0xf0   :  { %v4255_v41 = vmul.u32.u64.low %v4223_v51, %v590_v37  ;;  %v4256_v32 = vmul.u32.u64.high %v4223_v51, %v590_v37, %v4255_v41  ;;  %v752_v4 = vand.u32 2139095040, %v4208_v52  ;;  %v520_v12 = vand.u32 2147483647, %v4215_v38 }
  0xf1   :  { %v522_v53 = vcvt.s32.f32 %v4213_v49  ;;  %v290_v45 = vadd.s32 %v4111_v15, %v4116_v34  ;;  %v582_v23 = vsel %vm576_vm8, %v579_v16, %v581_v35  ;;  %v306_v25 = vsub.s32 32, %v4239_v3 }
  0xf2   :  { %v307_v17 = vshll.u32 %v4164_v46, %v4239_v3  ;;  %v867_v54 = vsub.s32 32, %v866_v2  ;;  %v5514_v60 = vand.u32 2147483647, %v4208_v52  ;;  %v311_v5 = vadd.s32 127, %v310_v0 }
  0xf3   :  { %v3580_v36 = vadd.s32 4294967294, %v714_v39  ;;  %v601_v10 = vadd.s32 1, %v4251_v18  ;;  %v4269_v38 = vshll.u32 %v860_v27, 8  ;;  %v598_v49 = vmul.u32 %v4223_v51, %v582_v23 }
  0xf4   :  { %vm600_vm9 = vc.u32 %v4256_v32, %v4250_v11  ;;  %v870_v15 = vshrl.u32 %v5523_v57, %v867_v54  ;;  %v753_v34 = vshrl.u32 %v752_v4, 23  ;;  %v869_v46 = vshll.u32 %v5527_v55, %v866_v2 }
  0xf5   :  { %v602_v28 = vsel %vm600_vm9, %v601_v10, %v4251_v18  ;;  %v872_v3 = vshll.u32 %v5523_v57, %v866_v2  ;;  %v873_v0 = vshrl.u32 %v5525_v59, %v867_v54  ;;  %v308_v16 = vshrl.u32 %v290_v45, %v306_v25 }
  0xf6   :  { %v603_v35 = vadd.s32 %v602_v28, %v598_v49  ;;  %v875_v27 = vshll.u32 %v5525_v59, %v866_v2  ;;  %v876_v51 = vshrl.u32 %v5516_v61, %v867_v54  ;;  %vm3581_vm10 = vcmp.lt.s32.totalorder %v3580_v36, 0 }
  0xf7   :  { %v865_v50 = vshrl.u32 %v864_v43, 5  ;;  %v871_v58 = vor.u32 %v870_v15, %v869_v46  ;;  %v874_v39 = vor.u32 %v873_v0, %v872_v3  ;;  %v878_v18 = vshll.u32 %v5516_v61, %v866_v2 }
  0xf8   :  { %v604_v37 = vadd.s32 536870912, %v603_v35  ;;  %v877_v41 = vor.u32 %v876_v51, %v875_v27  ;;  %v879_v4 = vshrl.u32 %v5520_v63, %v867_v54  ;;  %v312_v23 = vshll.u32 %v311_v5, 23 }
  0xf9   :  { %v881_v10 = vshll.u32 %v5520_v63, %v866_v2  ;;  %v882_v45 = vshrl.u32 %v5518_v7, %v867_v54  ;;  %v3582_v25 = vadd.s32 4294967169, %v753_v34  ;;  %v4285_v49 = vsel %vm3581_vm10, 0, %v3580_v36 }
  0xfa   :  { %v4287_v28 = vshrl.u32 %v604_v37, 30  ;;  %v868_v43 = vshrl.u32 %v5527_v55, %v867_v54  ;;  %v880_v15 = vor.u32 %v879_v4, %v878_v18  ;;  %vm884_vm11 = vcmp.lt.s32.totalorder %v865_v50, 1 }
  0xfb   :  { %v883_v46 = vor.u32 %v882_v45, %v881_v10  ;;  %vm886_vm12 = vcmp.lt.s32.totalorder %v865_v50, 3  ;;  %vm887_vm13 = vcmp.lt.s32.totalorder %v865_v50, 4  ;;  %v892_v5 = vsel %vm884_vm11, %v871_v58, %v874_v39 }
  0xfc   :  { %5575 = vst [vmem:[#allocation9_spill] sm:$0xff] %v4287_v28  ;;  %v606_v3 = vshll.u32 %v4287_v28, 30  ;;  %v889_v0 = vsel %vm887_vm13, %v877_v41, 2102212464  ;;  %v893_v27 = vsel %vm887_vm13, %v880_v15, 920167782  ;;  %v896_v36 = vsel %vm884_vm11, %v874_v39, %v877_v41 }
  0xfd   :  { %v722_v2 = vsub.s32 4294967266, %v4285_v49  ;;  %vm885_vm14 = vcmp.lt.s32.totalorder %v865_v50, 2  ;;  %v894_v34 = vsel %vm886_vm12, %v877_v41, %v893_v27  ;;  %v888_v37 = vsel %vm884_vm11, %v868_v43, %v871_v58 }
  0xfe   :  { %v4292_v51 = vsub.s32 %v603_v35, %v606_v3  ;;  %v895_v54 = vsel %vm885_vm14, %v892_v5, %v894_v34  ;;  %v897_v18 = vsel %vm887_vm13, %v883_v46, 1326507024  ;;  %v890_v4 = vsel %vm886_vm12, %v874_v39, %v889_v0 }
  0xff   :  { %v898_v10 = vsel %vm886_vm12, %v880_v15, %v897_v18  ;;  %v4296_v45 = vmul.u32.u64.low %v4269_v38, %v895_v54  ;;  %v4297_v40 = vmul.u32.u64.high %v4269_v38, %v895_v54, %v4296_v45  ;;  %v4300_v33 = vmul.f32 %v522_v53, %v520_v12 }
 0x100   :  { %v609_v22 = vsub.s32 0, %v4292_v51  ;;  %v899_v27 = vsel %vm885_vm14, %v896_v36, %v898_v10  ;;  %v759_v41 = vadd.s32 1, %v3582_v25  ;;  %v4304_v35 = vor.u32 %v308_v16, %v307_v17 }
 0x101   :  { %v4306_v58 = vor.u32 4788187, %v312_v23  ;;  %v4309_v43 = vmul.u32.u64.low %v4269_v38, %v899_v27  ;;  %v4310_v39 = vmul.u32.u64.high %v4269_v38, %v899_v27, %v4309_v43  ;;  %v891_v46 = vsel %vm885_vm14, %v888_v37, %v890_v4 }
 0x102   :  { %v3575_v15 = vmin.u32 %v609_v22, %v4292_v51  ;;  %v756_v12 = vand.u32 8388607, %v5514_v60  ;;  %vm760_vm15 = vcmp.gt.s32.totalorder %v759_v41, 0  ;;  %v718_v53 = vsub.s32 32, %v4285_v49 }
 0x103   :  { %v723_v3 = vadd.s32 127, %v722_v2  ;;  %v910_v17 = vadd.s32 1, %v4297_v40  ;;  %v761_v16 = vsel %vm760_vm15, %v759_v41, 0  ;;  %v702_v25 = vadd.s32 %v4171_v47, %v4180_v26 }
 0x104   :  { %v611_v0 = vclz %v3575_v15  ;;  %v763_v5 = vand.u32 31, %v761_v16  ;;  %v314_v22 = vand.u32 2147483647, %v4306_v58  ;;  %v316_v50 = vcvt.s32.f32 %v4304_v35  ;;  %v4381_v58 = vld [vmem:[%s5506_s1] ss:$0 sm:$0xff]  ;;  %s3859_s1 = smov 16  }
 0x105   :  { %v907_v34 = vmul.u32 %v4269_v38, %v891_v46  ;;  %vm909_vm0 = vc.u32 %v4310_v39, %v4296_v45  ;;  %v757_v37 = vor.u32 8388608, %v756_v12  ;;  %v719_v18 = vshll.u32 %v4232_v1, %v4285_v49 }
 0x106   :  { %v3576_v2 = vadd.s32 4294967294, %v611_v0  ;;  %v911_v36 = vsel %vm909_vm0, %v910_v17, %v4297_v40  ;;  %v764_v54 = vsub.s32 32, %v763_v5  ;;  %v720_v47 = vshrl.u32 %v702_v25, %v718_v53 }
 0x107   :  { %v724_v26 = vshll.u32 %v723_v3, 23  ;;  %v912_v4 = vadd.s32 %v911_v36, %v907_v34  ;;  %v766_v10 = vshll.u32 %v5527_v55, %v763_v5  ;;  %v769_v38 = vshll.u32 %v5523_v57, %v763_v5 }
 0x108   :  { %v767_v27 = vshrl.u32 %v5523_v57, %v764_v54  ;;  %v770_v41 = vshrl.u32 %v5525_v59, %v764_v54  ;;  %v772_v15 = vshll.u32 %v5525_v59, %v763_v5  ;;  %v773_v40 = vshrl.u32 %v5516_v61, %v764_v54 }
 0x109   :  { %v913_v43 = vadd.s32 536870912, %v912_v4  ;;  %v776_v46 = vshrl.u32 %v5520_v63, %v764_v54  ;;  %vm3577_vm2 = vcmp.lt.s32.totalorder %v3576_v2, 0  ;;  %v762_v1 = vshrl.u32 %v761_v16, 5 }
 0x10a   :  { %v775_v49 = vshll.u32 %v5516_v61, %v763_v5  ;;  %v1061_v12 = vand.u32 2139095040, %v4211_v48  ;;  %v768_v3 = vor.u32 %v767_v27, %v766_v10  ;;  %v771_v17 = vor.u32 %v770_v41, %v769_v38 }
 0x10b   :  { %v4338_v53 = vshrl.u32 %v913_v43, 30  ;;  %v774_v25 = vor.u32 %v773_v40, %v772_v15  ;;  %v778_v34 = vshll.u32 %v5520_v63, %v763_v5  ;;  %v779_v36 = vshrl.u32 %v5518_v7, %v764_v54 }
 0x10c   :  { %v777_v0 = vor.u32 %v776_v46, %v775_v49  ;;  %v5522_v60 = vand.u32 2147483647, %v4211_v48  ;;  %v4343_v24 = vor.u32 %v720_v47, %v719_v18  ;;  %v4345_v23 = vor.u32 4788187, %v724_v26 }
 0x10d   :  { %5576 = vst [vmem:[#allocation10_spill] sm:$0xff] %v4338_v53  ;;  %v614_v16 = vsel %vm3577_vm2, 0, %v3576_v2  ;;  %v915_v29 = vshll.u32 %v4338_v53, 30  ;;  %v780_v61 = vor.u32 %v779_v36, %v778_v34  ;;  %vm781_vm3 = vcmp.lt.s32.totalorder %v762_v1, 1 }
 0x10e   :  { %vm784_vm4 = vcmp.lt.s32.totalorder %v762_v1, 4  ;;  %v797_v10 = vshll.u32 %v757_v37, 8  ;;  %v789_v5 = vsel %vm781_vm3, %v768_v3, %v771_v17  ;;  %v1062_v41 = vshrl.u32 %v1061_v12, 23 }
 0x10f   :  { %v4348_v27 = vsub.s32 %v912_v4, %v915_v29  ;;  %v786_v38 = vsel %vm784_vm4, %v774_v25, 2102212464  ;;  %v619_v43 = vsub.s32 4294967266, %v614_v16  ;;  %v765_v15 = vshrl.u32 %v5527_v55, %v764_v54 }
 0x110   :  { %vm783_vm5 = vcmp.lt.s32.totalorder %v762_v1, 3  ;;  %v790_v18 = vsel %vm784_vm4, %v777_v0, 920167782  ;;  %vm782_vm6 = vcmp.lt.s32.totalorder %v762_v1, 2  ;;  %v793_v26 = vsel %vm781_vm3, %v771_v17, %v774_v25 }
 0x111   :  { %v918_v2 = vsub.s32 0, %v4348_v27  ;;  %v791_v47 = vsel %vm783_vm5, %v774_v25, %v790_v18  ;;  %v785_v40 = vsel %vm781_vm3, %v765_v15, %v768_v3  ;;  %v787_v46 = vsel %vm783_vm5, %v771_v17, %v786_v38  ;;  %v72_v18 = vpop.permute.xlu0 %71 }
 0x112   :  { %v792_v29 = vsel %vm782_vm6, %v789_v5, %v791_v47  ;;  %v794_v37 = vsel %vm784_vm4, %v780_v61, 1326507024  ;;  %v615_v54 = vsub.s32 32, %v614_v16  ;;  %v620_v36 = vadd.s32 127, %v619_v43 }
 0x113   :  { %v3587_v4 = vmin.u32 %v918_v2, %v4348_v27  ;;  %v795_v49 = vsel %vm783_vm5, %v777_v0, %v794_v37  ;;  %v4357_v12 = vmul.u32.u64.low %v797_v10, %v792_v29  ;;  %v4358_v34 = vmul.u32.u64.high %v797_v10, %v792_v29, %v4357_v12 }
 0x114   :  { %v796_v7 = vsel %vm782_vm6, %v793_v26, %v795_v49  ;;  %v3594_v63 = vadd.s32 4294967169, %v1062_v41  ;;  %v4366_v3 = vmul.f32 %v316_v50, %v314_v22  ;;  %v599_v38 = vadd.s32 %v4250_v11, %v4256_v32 }
 0x115   :  { %v920_v61 = vclz %v3587_v4  ;;  %v4368_v17 = vmul.u32.u64.low %v797_v10, %v796_v7  ;;  %v4369_v25 = vmul.u32.u64.high %v797_v10, %v796_v7, %v4368_v17  ;;  %v788_v5 = vsel %vm782_vm6, %v785_v40, %v787_v46 }
 0x116   :  { %v1068_v43 = vadd.s32 1, %v3594_v63  ;;  %v807_v15 = vadd.s32 1, %v4358_v34  ;;  %v1065_v35 = vand.u32 8388607, %v5522_v60  ;;  %v4384_v7 = vmul.f32 %v4381_v58, %v72_v18 }
 0x117   :  { %v3588_v41 = vadd.s32 4294967294, %v920_v61  ;;  %v617_v32 = vshrl.u32 %v599_v38, %v615_v54  ;;  %v621_v11 = vshll.u32 %v620_v36, 23  ;;  %v804_v63 = vmul.u32 %v797_v10, %v788_v5 }
 0x118   :  { %5577 = vst [vmem:[#allocation11_spill] sm:$0xff] %v4384_v7  ;;  %vm1069_vm7 = vcmp.gt.s32.totalorder %v1068_v43, 0  ;;  %vm806_vm9 = vc.u32 %v4369_v25, %v4357_v12  ;;  %v616_v1 = vshll.u32 %v4292_v51, %v614_v16  ;;  %v908_v40 = vadd.s32 %v4296_v45, %v4310_v39 }
 0x119   :  { %vm3589_vm8 = vcmp.lt.s32.totalorder %v3588_v41, 0  ;;  %v1070_v50 = vsel %vm1069_vm7, %v1068_v43, 0  ;;  %v808_v47 = vsel %vm806_vm9, %v807_v15, %v4358_v34  ;;  %v1066_v29 = vor.u32 8388608, %v1065_v35 }
 0x11a   :  { %v4390_v2 = vsel %vm3589_vm8, 0, %v3588_v41  ;;  %v1072_v26 = vand.u32 31, %v1070_v50  ;;  %v809_v46 = vadd.s32 %v808_v47, %v804_v63  ;;  %v4396_v4 = vor.u32 %v617_v32, %v616_v1 }
 0x11b   :  { %v4398_v10 = vor.u32 4788187, %v621_v11  ;;  %v958_v54 = vand.u32 2139095040, %v4384_v7  ;;  %v928_v51 = vsub.s32 4294967266, %v4390_v2  ;;  %v5578_v61 = vmov 2102212464  }
 0x11c   :  { %v1073_v49 = vsub.s32 32, %v1072_v26  ;;  %v810_v16 = vadd.s32 536870912, %v809_v46  ;;  %v1075_v34 = vshll.u32 %v5527_v55, %v1072_v26  ;;  %v1078_v36 = vshll.u32 %v5523_v57, %v1072_v26 }
 0x11d   :  { %v1081_v18 = vshll.u32 %v5525_v59, %v1072_v26  ;;  %v1071_v5 = vshrl.u32 %v1070_v50, 5  ;;  %v1084_v43 = vshll.u32 %v5578_v61, %v1072_v26  ;;  %v5580_v41 = vmov 920167782  }
 0x11e   :  { %v1076_v45 = vshrl.u32 %v5523_v57, %v1073_v49  ;;  %v1079_v39 = vshrl.u32 %v5525_v59, %v1073_v49  ;;  %v1082_v17 = vshrl.u32 %v5578_v61, %v1073_v49  ;;  %v4408_v38 = vshrl.u32 %v810_v16, 30 }
 0x11f   :  { %v1085_v15 = vshrl.u32 %v5580_v41, %v1073_v49  ;;  %v623_v35 = vand.u32 2147483647, %v4398_v10  ;;  %v1106_v60 = vshll.u32 %v1066_v29, 8  ;;  %v959_v57 = vshrl.u32 %v958_v54, 23 }
 0x120   :  { %5579 = vst [vmem:[#allocation12_spill] sm:$0xff] %v4408_v38  ;;  %v1077_v32 = vor.u32 %v1076_v45, %v1075_v34  ;;  %v1080_v11 = vor.u32 %v1079_v39, %v1078_v36  ;;  %v1083_v63 = vor.u32 %v1082_v17, %v1081_v18  ;;  %v812_v1 = vshll.u32 %v4408_v38, 30 }
 0x121   :  { %v1086_v47 = vor.u32 %v1085_v15, %v1084_v43  ;;  %vm133_vm10 = vcmp.lt.s32.totalorder %v3935_v21, 0  ;;  %vm442_vm11 = vcmp.lt.s32.totalorder %v3946_v30, 0  ;;  %v924_v50 = vsub.s32 32, %v4390_v2 }
 0x122   :  { %v929_v16 = vadd.s32 127, %v928_v51  ;;  %v1087_v59 = vshll.u32 %v5580_v41, %v1072_v26  ;;  %v5581_v37 = vmov 1326507024   ;;  %v4419_v10 = vsub.s32 %v809_v46, %v812_v1 }
 0x123   :  { %v1088_v0 = vshrl.u32 %v5581_v37, %v1073_v49  ;;  %vm1090_vm12 = vcmp.lt.s32.totalorder %v1071_v5, 1  ;;  %vm1092_vm13 = vcmp.lt.s32.totalorder %v1071_v5, 3  ;;  %vm1093_vm14 = vcmp.lt.s32.totalorder %v1071_v5, 4 }
 0x124   :  { %v1095_v36 = vsel %vm1093_vm14, %v1083_v63, 2102212464  ;;  %v1098_v29 = vsel %vm1090_vm12, %v1077_v32, %v1080_v11  ;;  %v1099_v54 = vsel %vm1093_vm14, %v1086_v47, 920167782  ;;  %v815_v45 = vsub.s32 0, %v4419_v10 }
 0x125   :  { %v1089_v34 = vor.u32 %v1088_v0, %v1087_v59  ;;  %v1074_v39 = vshrl.u32 %v5527_v55, %v1073_v49  ;;  %vm1091_vm15 = vcmp.lt.s32.totalorder %v1071_v5, 2  ;;  %v1100_v51 = vsel %vm1092_vm13, %v1083_v63, %v1099_v54 }
 0x126   :  { %v926_v26 = vshrl.u32 %v908_v40, %v924_v50  ;;  %v1101_v18 = vsel %vm1091_vm15, %v1098_v29, %v1100_v51  ;;  %v1102_v46 = vsel %vm1090_vm12, %v1080_v11, %v1083_v63  ;;  %v930_v43 = vshll.u32 %v929_v16, 23 }
 0x127   :  { %v1103_v17 = vsel %vm1093_vm14, %v1089_v34, 1326507024  ;;  %v1094_v59 = vsel %vm1090_vm12, %v1074_v39, %v1077_v32  ;;  %v1096_v0 = vsel %vm1092_vm13, %v1080_v11, %v1095_v36  ;;  %v3590_v54 = vadd.s32 4294967169, %v959_v57 }
 0x128   :  { %v1104_v15 = vsel %vm1092_vm13, %v1086_v47, %v1103_v17  ;;  %v4431_v22 = vmul.u32.u64.low %v1106_v60, %v1101_v18  ;;  %v4432_v49 = vmul.u32.u64.high %v1106_v60, %v1101_v18, %v4431_v22  ;;  %v625_v40 = vcvt.s32.f32 %v4396_v4  ;;  %v82_v18 = vpop.permute.xlu0 %81 }
 0x129   :  { %v1105_v1 = vsel %vm1091_vm15, %v1102_v46, %v1104_v15  ;;  %v3583_v50 = vmin.u32 %v815_v45, %v4419_v10  ;;  %v5582_v32 = vand.u32 2147483647, %v4345_v23  ;;  %v5583_v11 = vcvt.s32.f32 %v4343_v24 }
 0x12a   :  { %v4437_v63 = vmul.u32.u64.low %v1106_v60, %v1105_v1  ;;  %v4438_v34 = vmul.u32.u64.high %v1106_v60, %v1105_v1, %v4437_v63  ;;  %v925_v47 = vshll.u32 %v4348_v27, %v4390_v2  ;;  %v1097_v36 = vsel %vm1091_vm15, %v1094_v59, %v1096_v0 }
 0x12b   :  { %v4444_v16 = vmul.f32 %v5583_v11, %v5582_v32  ;;  %v965_v29 = vadd.s32 1, %v3590_v54  ;;  %v5584_v57 = vxor.u32 2147483648, %v4196_v6  ;;  %v5585_v23 = vxor.u32 2147483648, %v4300_v33 }
 0x12c   :  { %v4463_v45 = vmul.f32 %v625_v40, %v623_v35  ;;  %v5586_v27 = vand.u32 2147483647, %v4384_v7  ;;  %v4467_v5 = vor.u32 %v926_v26, %v925_v47  ;;  %v4469_v39 = vor.u32 4788187, %v930_v43 }
 0x12d   :  { %v4454_v4 = vsel %vm133_vm10, %v5584_v57, %v4196_v6  ;;  %v4461_v24 = vsel %vm442_vm11, %v5585_v23, %v4300_v33  ;;  %v1116_v51 = vadd.s32 1, %v4432_v49  ;;  %vm966_vm0 = vcmp.gt.s32.totalorder %v965_v29, 0  ;;  %v87_v6 = vpop.permute.xlu1 %86 }
 0x12e   :  { %v962_v2 = vand.u32 8388607, %v5586_v27  ;;  %v817_v46 = vclz %v3583_v50  ;;  %v1113_v17 = vmul.u32 %v1106_v60, %v1097_v36  ;;  %vm1115_vm2 = vc.u32 %v4438_v34, %v4431_v22 }
 0x12f   :  { %v967_v33 = vsel %vm966_vm0, %v965_v29, 0  ;;  %v1117_v26 = vsel %vm1115_vm2, %v1116_v51, %v4432_v49  ;;  %v4479_v1 = vmul.f32 %v4381_v58, %v87_v6  ;;  %v4482_v54 = vmul.f32 %v4381_v58, %v82_v18 }
 0x130   :  { %v969_v0 = vand.u32 31, %v967_v33  ;;  %v1118_v15 = vadd.s32 %v1117_v26, %v1113_v17  ;;  %v963_v50 = vor.u32 8388608, %v962_v2  ;;  %v3584_v32 = vadd.s32 4294967294, %v817_v46 }
 0x131   :  { %5587 = vst [vmem:[#allocation13_spill] sm:$0xff] %v4479_v1  ;;  %5588 = vst [vmem:[#allocation14_spill] sm:$0xff] %v4482_v54  ;;  %v5589_v47 = vmov 2475754826   ;;  %v5590_v57 = vmov 2131351028  }
 0x132   :  { %v970_v63 = vsub.s32 32, %v969_v0  ;;  %v1119_v11 = vadd.s32 536870912, %v1118_v15  ;;  %v972_v49 = vshll.u32 %v5527_v55, %v969_v0  ;;  %v975_v36 = vshll.u32 %v5589_v47, %v969_v0 }
 0x133   :  { %v978_v27 = vshll.u32 %v5590_v57, %v969_v0  ;;  %v968_v18 = vshrl.u32 %v967_v33, 5  ;;  %v981_v2 = vshll.u32 %v5578_v61, %v969_v0  ;;  %v1003_v59 = vshll.u32 %v963_v50, 8 }
 0x134   :  { %v973_v29 = vshrl.u32 %v5589_v47, %v970_v63  ;;  %v976_v23 = vshrl.u32 %v5590_v57, %v970_v63  ;;  %v979_v51 = vshrl.u32 %v5578_v61, %v970_v63  ;;  %v4492_v6 = vshrl.u32 %v1119_v11, 30 }
 0x135   :  { %v982_v46 = vshrl.u32 %v5580_v41, %v970_v63  ;;  %v1267_v55 = vand.u32 2139095040, %v4479_v1  ;;  %vm3585_vm3 = vcmp.lt.s32.totalorder %v3584_v32, 0  ;;  %v984_v11 = vshll.u32 %v5580_v41, %v969_v0 }
 0x136   :  { %5591 = vst [vmem:[#allocation15_spill] sm:$0xff] %v4492_v6  ;;  %v974_v17 = vor.u32 %v973_v29, %v972_v49  ;;  %v977_v26 = vor.u32 %v976_v23, %v975_v36  ;;  %v980_v43 = vor.u32 %v979_v51, %v978_v27  ;;  %v1121_v35 = vshll.u32 %v4492_v6, 30 }
 0x137   :  { %v983_v40 = vor.u32 %v982_v46, %v981_v2  ;;  %v985_v33 = vshrl.u32 %v5581_v37, %v970_v63  ;;  %v1164_v53 = vand.u32 2139095040, %v4482_v54  ;;  %vm987_vm4 = vcmp.lt.s32.totalorder %v968_v18, 1 }
 0x138   :  { %v4502_v38 = vsub.s32 %v1118_v15, %v1121_v35  ;;  %vm989_vm5 = vcmp.lt.s32.totalorder %v968_v18, 3  ;;  %vm990_vm6 = vcmp.lt.s32.totalorder %v968_v18, 4  ;;  %v995_v36 = vsel %vm987_vm4, %v974_v17, %v977_v26 }
 0x139   :  { %v986_v50 = vor.u32 %v985_v33, %v984_v11  ;;  %v992_v49 = vsel %vm990_vm6, %v980_v43, 2102212464  ;;  %v996_v29 = vsel %vm990_vm6, %v983_v40, 920167782  ;;  %v5592_v27 = vmov 683565275  }
 0x13a   :  { %v1124_v23 = vsub.s32 0, %v4502_v38  ;;  %v971_v51 = vshrl.u32 %v5592_v27, %v970_v63  ;;  %vm988_vm7 = vcmp.lt.s32.totalorder %v968_v18, 2  ;;  %v997_v0 = vsel %vm989_vm5, %v980_v43, %v996_v29 }
 0x13b   :  { %vm236_vm8 = vcmp.lt.s32.totalorder %v3951_v42, 0  ;;  %v820_v35 = vsel %vm3585_vm3, 0, %v3584_v32  ;;  %v998_v15 = vsel %vm988_vm7, %v995_v36, %v997_v0  ;;  %v999_v2 = vsel %vm987_vm4, %v977_v26, %v980_v43 }
 0x13c   :  { %v1000_v46 = vsel %vm990_vm6, %v986_v50, 1326507024  ;;  %v3595_v11 = vmin.u32 %v1124_v23, %v4502_v38  ;;  %v991_v33 = vsel %vm987_vm4, %v971_v51, %v974_v17  ;;  %v993_v60 = vsel %vm989_vm5, %v977_v26, %v992_v49 }
 0x13d   :  { %v1001_v63 = vsel %vm989_vm5, %v983_v40, %v1000_v46  ;;  %vm648_vm9 = vcmp.lt.s32.totalorder %v4080_v62, 0  ;;  %vm545_vm12 = vcmp.lt.s32.totalorder %v4141_v44, 0  ;;  %v1268_v43 = vshrl.u32 %v1267_v55, 23 }
 0x13e   :  { %v1002_v29 = vsel %vm988_vm7, %v999_v2, %v1001_v63  ;;  %v4519_v32 = vmul.u32.u64.low %v1003_v59, %v998_v15  ;;  %v4520_v6 = vmul.u32.u64.high %v1003_v59, %v998_v15, %v4519_v32  ;;  %v821_v50 = vsub.s32 32, %v820_v35 }
 0x13f   :  { %v1126_v36 = vclz %v3595_v11  ;;  %v4523_v23 = vmul.u32.u64.low %v1003_v59, %v1002_v29  ;;  %v4524_v0 = vmul.u32.u64.high %v1003_v59, %v1002_v29, %v4523_v23  ;;  %v825_v17 = vsub.s32 4294967266, %v820_v35 }
 0x140   :  { %v994_v26 = vsel %vm988_vm7, %v991_v33, %v993_v60  ;;  %v3602_v40 = vadd.s32 4294967169, %v1268_v43  ;;  %v1165_v49 = vshrl.u32 %v1164_v53, 23  ;;  %v805_v51 = vadd.s32 %v4357_v12, %v4369_v25 }
 0x141   :  { %v3596_v46 = vadd.s32 4294967294, %v1126_v36  ;;  %v5593_v2 = vand.u32 2147483647, %v4479_v1  ;;  %v5535_v63 = vand.u32 2147483647, %v4482_v54  ;;  %v5595_v11 = vcvt.s32.f32 %v4467_v5 }
 0x142   :  { %v5594_v55 = vand.u32 2147483647, %v4469_v39  ;;  %v1013_v18 = vadd.s32 1, %v4520_v6  ;;  %v1274_v60 = vadd.s32 1, %v3602_v40  ;;  %v3598_v33 = vadd.s32 4294967169, %v1165_v49  ;;  %v97_v49 = vpop.permute.xlu1 %96 }
 0x143   :  { %v1271_v15 = vand.u32 8388607, %v5593_v2  ;;  %v823_v53 = vshrl.u32 %v805_v51, %v821_v50  ;;  %vm3597_vm13 = vcmp.lt.s32.totalorder %v3596_v46, 0  ;;  %v1010_v43 = vmul.u32 %v1003_v59, %v994_v26 }
 0x144   :  { %v4536_v29 = vmul.f32 %v5595_v11, %v5594_v55  ;;  %vm1012_vm14 = vc.u32 %v4524_v0, %v4519_v32  ;;  %v4541_v12 = vadd.s32 127, %v825_v17  ;;  %v4543_v25 = vsel %vm3597_vm13, 0, %v3596_v46 }
 0x145   :  { %v1014_v39 = vsel %vm1012_vm14, %v1013_v18, %v4520_v6  ;;  %vm1275_vm15 = vcmp.gt.s32.totalorder %v1274_v60, 0  ;;  %v5596_v5 = vxor.u32 2147483648, %v4366_v3  ;;  %v1272_v23 = vor.u32 8388608, %v1271_v15 }
 0x146   :  { %v1015_v50 = vadd.s32 %v1014_v39, %v1010_v43  ;;  %v4555_v59 = vand.u32 8388607, %v5535_v63  ;;  %v822_v17 = vshll.u32 %v4419_v10, %v820_v35  ;;  %v1130_v26 = vsub.s32 32, %v4543_v25 }
 0x147   :  { %v4551_v36 = vsel %vm236_vm8, %v5596_v5, %v4366_v3  ;;  %v1276_v40 = vsel %vm1275_vm15, %v1274_v60, 0  ;;  %v1171_v6 = vadd.s32 1, %v3598_v33  ;;  %v5597_v51 = vxor.u32 2147483648, %v4444_v16 }
 0x148   :  { %v5599_v46 = vxor.u32 2147483648, %v4463_v45  ;;  %v1016_v35 = vadd.s32 536870912, %v1015_v50  ;;  %v4574_v15 = vor.u32 %v823_v53, %v822_v17  ;;  %v827_v55 = vshll.u32 %v4541_v12, 23 }
 0x149   :  { %v4564_v3 = vsel %vm648_vm9, %v5597_v51, %v4444_v16  ;;  %v1114_v11 = vadd.s32 %v4431_v22, %v4438_v34  ;;  %v1278_v18 = vand.u32 31, %v1276_v40  ;;  %v4581_v60 = vshll.u32 %v1272_v23, 8 }
 0x14a   :  { %5598 = vst [vmem:[#allocation16_spill] sm:$0xff] %v4564_v3  ;;  %v4571_v2 = vsel %vm545_vm12, %v5599_v46, %v4463_v45  ;;  %v4579_v16 = vshrl.u32 %v1016_v35, 30  ;;  %v1169_v33 = vor.u32 8388608, %v4555_v59  ;;  %v4585_v45 = vmul.f32 %v4381_v58, %v97_v49 }
 0x14b   :  { %5600 = vst [vmem:[#allocation17_spill] sm:$0xff] %v4571_v2  ;;  %v1132_v43 = vshrl.u32 %v1114_v11, %v1130_v26  ;;  %v1134_v39 = vsub.s32 4294967266, %v4543_v25  ;;  %v1279_v53 = vsub.s32 32, %v1278_v18  ;;  %vm1172_vm0 = vcmp.gt.s32.totalorder %v1171_v6, 0 }
 0x14c   :  { %5601 = vst [vmem:[#allocation18_spill] sm:$0xff] %v4579_v16  ;;  %5602 = vst [vmem:[#allocation19_spill] sm:$0xff] %v4585_v45  ;;  %v1018_v12 = vshll.u32 %v4579_v16, 30  ;;  %v1277_v5 = vshrl.u32 %v1276_v40, 5  ;;  %v1281_v22 = vshll.u32 %v5592_v27, %v1278_v18  ;;  %v1284_v34 = vshll.u32 %v5589_v47, %v1278_v18 }
 0x14d   :  { %v1282_v23 = vshrl.u32 %v5589_v47, %v1279_v53  ;;  %v1285_v17 = vshrl.u32 %v5590_v57, %v1279_v53  ;;  %v1287_v59 = vshll.u32 %v5590_v57, %v1278_v18  ;;  %v1288_v49 = vshrl.u32 %v5578_v61, %v1279_v53 }
 0x14e   :  { %v4595_v26 = vsub.s32 %v1015_v50, %v1018_v12  ;;  %v1290_v51 = vshll.u32 %v5578_v61, %v1278_v18  ;;  %v1291_v46 = vshrl.u32 %v5580_v41, %v1279_v53  ;;  %v1293_v40 = vshll.u32 %v5580_v41, %v1278_v18 }
 0x14f   :  { %v1283_v35 = vor.u32 %v1282_v23, %v1281_v22  ;;  %v1286_v11 = vor.u32 %v1285_v17, %v1284_v34  ;;  %v1289_v63 = vor.u32 %v1288_v49, %v1287_v59  ;;  %v1294_v10 = vshrl.u32 %v5581_v37, %v1279_v53 }
 0x150   :  { %v1135_v16 = vadd.s32 127, %v1134_v39  ;;  %v1021_v3 = vsub.s32 0, %v4595_v26  ;;  %v1280_v56 = vshrl.u32 %v5592_v27, %v1279_v53  ;;  %v1292_v62 = vor.u32 %v1291_v46, %v1290_v51 }
 0x151   :  { %v1295_v2 = vor.u32 %v1294_v10, %v1293_v40  ;;  %vm1296_vm2 = vcmp.lt.s32.totalorder %v1277_v5, 1  ;;  %vm1298_vm3 = vcmp.lt.s32.totalorder %v1277_v5, 3  ;;  %vm1299_vm4 = vcmp.lt.s32.totalorder %v1277_v5, 4 }
 0x152   :  { %v3591_v50 = vmin.u32 %v1021_v3, %v4595_v26  ;;  %v1300_v12 = vsel %vm1296_vm2, %v1280_v56, %v1283_v35  ;;  %v1301_v54 = vsel %vm1299_vm4, %v1289_v63, 2102212464  ;;  %v1304_v18 = vsel %vm1296_vm2, %v1283_v35, %v1286_v11 }
 0x153   :  { %v1302_v22 = vsel %vm1298_vm3, %v1286_v11, %v1301_v54  ;;  %v1305_v34 = vsel %vm1299_vm4, %v1292_v62, 920167782  ;;  %v1308_v23 = vsel %vm1296_vm2, %v1286_v11, %v1289_v63  ;;  %v1309_v17 = vsel %vm1299_vm4, %v1295_v2, 1326507024 }
 0x154   :  { %v1023_v39 = vclz %v3591_v50  ;;  %vm1297_vm5 = vcmp.lt.s32.totalorder %v1277_v5, 2  ;;  %v1306_v59 = vsel %vm1298_vm3, %v1289_v63, %v1305_v34  ;;  %v1173_v53 = vsel %vm1172_vm0, %v1171_v6, 0 }
 0x155   :  { %v1136_v10 = vshll.u32 %v1135_v16, 23  ;;  %v1303_v49 = vsel %vm1297_vm5, %v1300_v12, %v1302_v22  ;;  %v1307_v51 = vsel %vm1297_vm5, %v1304_v18, %v1306_v59  ;;  %v1310_v46 = vsel %vm1298_vm3, %v1292_v62, %v1309_v17 }
 0x156   :  { %v3592_v3 = vadd.s32 4294967294, %v1023_v39  ;;  %v1311_v56 = vsel %vm1297_vm5, %v1308_v23, %v1310_v46  ;;  %v4609_v40 = vmul.u32.u64.low %v4581_v60, %v1307_v51  ;;  %v4610_v35 = vmul.u32.u64.high %v4581_v60, %v1307_v51, %v4609_v40 }
 0x157   :  { %v4614_v54 = vmul.u32.u64.low %v4581_v60, %v1311_v56  ;;  %v4615_v2 = vmul.u32.u64.high %v4581_v60, %v1311_v56, %v4614_v54  ;;  %v4617_v11 = vshrl.u32 %v1173_v53, 5  ;;  %v1175_v63 = vand.u32 31, %v1173_v53 }
 0x158   :  { %v4619_v6 = vor.u32 4788187, %v827_v55  ;;  %v1131_v16 = vshll.u32 %v4502_v38, %v4543_v25  ;;  %v1011_v62 = vadd.s32 %v4519_v32, %v4524_v0  ;;  %vm3593_vm6 = vcmp.lt.s32.totalorder %v3592_v3, 0 }
 0x159   :  { %v1176_v5 = vsub.s32 32, %v1175_v63  ;;  %v4625_v50 = vshll.u32 %v1169_v33, 8  ;;  %v5544_v12 = vand.u32 2147483647, %v4585_v45  ;;  %v1473_v18 = vand.u32 2139095040, %v4585_v45 }
 0x15a   :  { %v4629_v22 = vor.u32 %v1132_v43, %v1131_v16  ;;  %v4631_v34 = vor.u32 4788187, %v1136_v10  ;;  %v1319_v55 = vmul.u32 %v4581_v60, %v1303_v49  ;;  %v1322_v23 = vadd.s32 1, %v4610_v35 }
 0x15b   :  { %v1026_v38 = vsel %vm3593_vm6, 0, %v3592_v3  ;;  %vm1321_vm7 = vc.u32 %v4615_v2, %v4609_v40  ;;  %v1179_v32 = vshrl.u32 %v5589_v47, %v1176_v5  ;;  %vm1193_vm13 = vcmp.lt.s32.totalorder %v4617_v11, 1 }
 0x15c   :  { %v1323_v0 = vsel %vm1321_vm7, %v1322_v23, %v4610_v35  ;;  %v1178_v25 = vshll.u32 %v5592_v27, %v1175_v63  ;;  %v1181_v33 = vshll.u32 %v5589_v47, %v1175_v63  ;;  %v1182_v43 = vshrl.u32 %v5590_v57, %v1176_v5 }
 0x15d   :  { %vm1194_vm14 = vcmp.lt.s32.totalorder %v4617_v11, 2  ;;  %v1324_v60 = vadd.s32 %v1323_v0, %v1319_v55  ;;  %v1184_v17 = vshll.u32 %v5590_v57, %v1175_v63  ;;  %v1185_v39 = vshrl.u32 %v5578_v61, %v1176_v5 }
 0x15e   :  { %vm1195_vm15 = vcmp.lt.s32.totalorder %v4617_v11, 3  ;;  %v1027_v59 = vsub.s32 32, %v1026_v38  ;;  %v1031_v53 = vsub.s32 4294967266, %v1026_v38  ;;  %v1180_v10 = vor.u32 %v1179_v32, %v1178_v25 }
 0x15f   :  { %v1183_v49 = vor.u32 %v1182_v43, %v1181_v33  ;;  %v1325_v51 = vadd.s32 536870912, %v1324_v60  ;;  %v1186_v46 = vor.u32 %v1185_v39, %v1184_v17  ;;  %v1187_v3 = vshll.u32 %v5578_v61, %v1175_v63 }
 0x160   :  { %v1188_v56 = vshrl.u32 %v5580_v41, %v1176_v5  ;;  %v1028_v35 = vshll.u32 %v4595_v26, %v1026_v38  ;;  %v1190_v54 = vshll.u32 %v5580_v41, %v1175_v63  ;;  %v1191_v16 = vshrl.u32 %v5581_v37, %v1176_v5 }
 0x161   :  { %vm1196_vm0 = vcmp.lt.s32.totalorder %v4617_v11, 4  ;;  %v4653_v55 = vshrl.u32 %v1325_v51, 30  ;;  %v1177_v23 = vshrl.u32 %v5592_v27, %v1176_v5  ;;  %v1029_v25 = vshrl.u32 %v1011_v62, %v1027_v59 }
 0x162   :  { %v1189_v32 = vor.u32 %v1188_v56, %v1187_v3  ;;  %v1198_v0 = vsel %vm1196_vm0, %v1186_v46, 2102212464  ;;  %v1032_v33 = vadd.s32 127, %v1031_v53  ;;  %v1192_v43 = vor.u32 %v1191_v16, %v1190_v54  ;;  %v92_v54 = vpop.permute.xlu0 %91 }
 0x163   :  { %5603 = vst [vmem:[#allocation20_spill] sm:$0xff] %v4653_v55  ;;  %v1201_v26 = vsel %vm1193_vm13, %v1180_v10, %v1183_v49  ;;  %v1327_v63 = vshll.u32 %v4653_v55, 30  ;;  %v1205_v17 = vsel %vm1193_vm13, %v1183_v49, %v1186_v46  ;;  %v1474_v39 = vshrl.u32 %v1473_v18, 23 }
 0x164   :  { %v1202_v38 = vsel %vm1196_vm0, %v1189_v32, 920167782  ;;  %v1197_v5 = vsel %vm1193_vm13, %v1177_v23, %v1180_v10  ;;  %v1199_v62 = vsel %vm1195_vm15, %v1183_v49, %v1198_v0  ;;  %v1206_v53 = vsel %vm1196_vm0, %v1192_v43, 1326507024 }
 0x165   :  { %v1203_v59 = vsel %vm1195_vm15, %v1186_v46, %v1202_v38  ;;  %v4673_v51 = vsub.s32 %v1324_v60, %v1327_v63  ;;  %v1207_v18 = vsel %vm1195_vm15, %v1189_v32, %v1206_v53  ;;  %v3610_v56 = vadd.s32 4294967169, %v1474_v39 }
 0x166   :  { %v1204_v3 = vsel %vm1194_vm14, %v1201_v26, %v1203_v59  ;;  %v1033_v10 = vshll.u32 %v1032_v33, 23  ;;  %v1208_v49 = vsel %vm1194_vm14, %v1205_v17, %v1207_v18  ;;  %v1200_v23 = vsel %vm1194_vm14, %v1197_v5, %v1199_v62  ;;  %v107_v5 = vpop.permute.xlu1 %106 }
 0x167   :  { %v4682_v16 = vmul.u32.u64.low %v4625_v50, %v1204_v3  ;;  %v4683_v46 = vmul.u32.u64.high %v4625_v50, %v1204_v3, %v4682_v16  ;;  %v1330_v60 = vsub.s32 0, %v4673_v51  ;;  %v829_v32 = vand.u32 2147483647, %v4619_v6 }
 0x168   :  { %v4690_v0 = vmul.u32.u64.low %v4625_v50, %v1208_v49  ;;  %v4691_v43 = vmul.u32.u64.high %v4625_v50, %v1208_v49, %v4690_v0  ;;  %v831_v33 = vcvt.s32.f32 %v4574_v15  ;;  %v1480_v26 = vadd.s32 1, %v3610_v56 }
 0x169   :  { %v4696_v63 = vmul.f32 %v4381_v58, %v92_v54  ;;  %v1138_v38 = vand.u32 2147483647, %v4631_v34  ;;  %v1140_v17 = vcvt.s32.f32 %v4629_v22  ;;  %v1030_v39 = vor.u32 %v1029_v25, %v1028_v35 }
 0x16a   :  { %v3603_v11 = vmin.u32 %v1330_v60, %v4673_v51  ;;  %v1034_v62 = vor.u32 4788187, %v1033_v10  ;;  %v1216_v59 = vmul.u32 %v4625_v50, %v1200_v23  ;;  %v1219_v53 = vadd.s32 1, %v4683_v46 }
 0x16b   :  { %vm1481_vm2 = vcmp.gt.s32.totalorder %v1480_v26, 0  ;;  %vm1218_vm3 = vc.u32 %v4691_v43, %v4682_v16  ;;  %v1477_v15 = vand.u32 8388607, %v5544_v12  ;;  %v4707_v3 = vmul.f32 %v831_v33, %v829_v32 }
 0x16c   :  { %v1332_v6 = vclz %v3603_v11  ;;  %v1482_v34 = vsel %vm1481_vm2, %v1480_v26, 0  ;;  %v1220_v22 = vsel %vm1218_vm3, %v1219_v53, %v4683_v46  ;;  %v4711_v25 = vmul.f32 %v4381_v58, %v107_v5 }
 0x16d   :  { %v1484_v35 = vand.u32 31, %v1482_v34  ;;  %v4713_v50 = vmul.f32 %v1140_v17, %v1138_v38  ;;  %v1320_v18 = vadd.s32 %v4609_v40, %v4615_v2  ;;  %v1221_v54 = vadd.s32 %v1220_v22, %v1216_v59 }
 0x16e   :  { %v3604_v56 = vadd.s32 4294967294, %v1332_v6  ;;  %v1035_v10 = vand.u32 2147483647, %v1034_v62  ;;  %v1037_v49 = vcvt.s32.f32 %v1030_v39  ;;  %v1478_v32 = vor.u32 8388608, %v1477_v15 }
 0x16f   :  { %v1485_v60 = vsub.s32 32, %v1484_v35  ;;  %v1222_v0 = vadd.s32 536870912, %v1221_v54  ;;  %v1370_v46 = vand.u32 2139095040, %v4696_v63  ;;  %v4719_v33 = vshrl.u32 %v1482_v34, 5 }
 0x170   :  { %vm3605_vm4 = vcmp.lt.s32.totalorder %v3604_v56, 0  ;;  %v1487_v26 = vshll.u32 %v5592_v27, %v1484_v35  ;;  %v1490_v17 = vshll.u32 %v5589_v47, %v1484_v35  ;;  %v1493_v39 = vshll.u32 %v5590_v57, %v1484_v35 }
 0x171   :  { %v1488_v38 = vshrl.u32 %v5589_v47, %v1485_v60  ;;  %v1491_v40 = vshrl.u32 %v5590_v57, %v1485_v60  ;;  %v4724_v2 = vshrl.u32 %v1222_v0, 30  ;;  %v1496_v11 = vshll.u32 %v5578_v61, %v1484_v35 }
 0x172   :  { %v1335_v5 = vsel %vm3605_vm4, 0, %v3604_v56  ;;  %v1494_v62 = vshrl.u32 %v5578_v61, %v1485_v60  ;;  %v1497_v59 = vshrl.u32 %v5580_v41, %v1485_v60  ;;  %v1499_v53 = vshll.u32 %v5580_v41, %v1484_v35 }
 0x173   :  { %5604 = vst [vmem:[#allocation21_spill] sm:$0xff] %v4724_v2  ;;  %v1224_v6 = vshll.u32 %v4724_v2, 30  ;;  %v1489_v15 = vor.u32 %v1488_v38, %v1487_v26  ;;  %v1492_v34 = vor.u32 %v1491_v40, %v1490_v17  ;;  %v1500_v22 = vshrl.u32 %v5581_v37, %v1485_v60 }
 0x174   :  { %v1038_v0 = vmul.f32 %v1037_v49, %v1035_v10  ;;  %v1495_v12 = vor.u32 %v1494_v62, %v1493_v39  ;;  %v1498_v23 = vor.u32 %v1497_v59, %v1496_v11  ;;  %v5605_v55 = vand.u32 2147483647, %v4696_v63 }
 0x175   :  { %vm5568_vm5 = vcmp.lt.s32.totalorder %v4146_v8, 0  ;;  %v1336_v56 = vsub.s32 32, %v1335_v5  ;;  %v4739_v1 = vsub.s32 %v1221_v54, %v1224_v6  ;;  %v1501_v28 = vor.u32 %v1500_v22, %v1499_v53 }
 0x176   :  { %v4736_v45 = vand.u32 8388607, %v5605_v55  ;;  %v1518_v35 = vshll.u32 %v1478_v32, 8  ;;  %v1340_v44 = vsub.s32 4294967266, %v1335_v5  ;;  %v1486_v26 = vshrl.u32 %v5592_v27, %v1485_v60 }
 0x177   :  { %vm1502_vm6 = vcmp.lt.s32.totalorder %v4719_v33, 1  ;;  %v1371_v38 = vshrl.u32 %v1370_v46, 23  ;;  %v1227_v10 = vsub.s32 0, %v4739_v1  ;;  %vm1504_vm7 = vcmp.lt.s32.totalorder %v4719_v33, 3 }
 0x178   :  { %vm1505_vm13 = vcmp.lt.s32.totalorder %v4719_v33, 4  ;;  %v1510_v55 = vsel %vm1502_vm6, %v1489_v15, %v1492_v34  ;;  %vm751_vm14 = vcmp.lt.s32.totalorder %v4208_v52, 0  ;;  %vm5566_vm15 = vcmp.lt.s32.totalorder %v4211_v48, 0 }
 0x179   :  { %v1507_v54 = vsel %vm1505_vm13, %v1495_v12, 2102212464  ;;  %v1511_v49 = vsel %vm1505_vm13, %v1498_v23, 920167782  ;;  %v1514_v60 = vsel %vm1502_vm6, %v1492_v34, %v1495_v12  ;;  %v1515_v32 = vsel %vm1505_vm13, %v1501_v28, 1326507024 }
 0x17a   :  { %vm5567_vm0 = vcmp.lt.s32.totalorder %v4384_v7, 0  ;;  %v1338_v46 = vshrl.u32 %v1320_v18, %v1336_v56  ;;  %v3599_v40 = vmin.u32 %v1227_v10, %v4739_v1  ;;  %vm1503_vm2 = vcmp.lt.s32.totalorder %v4719_v33, 2 }
 0x17b   :  { %v1512_v17 = vsel %vm1504_vm7, %v1495_v12, %v1511_v49  ;;  %v1341_v39 = vadd.s32 127, %v1340_v44  ;;  %v1516_v62 = vsel %vm1504_vm7, %v1498_v23, %v1515_v32  ;;  %v3606_v59 = vadd.s32 4294967169, %v1371_v38 }
 0x17c   :  { %v1513_v11 = vsel %vm1503_vm2, %v1510_v55, %v1512_v17  ;;  %v1229_v53 = vclz %v3599_v40  ;;  %v1506_v28 = vsel %vm1502_vm6, %v1486_v26, %v1489_v15  ;;  %v1508_v18 = vsel %vm1504_vm7, %v1492_v34, %v1507_v54 }
 0x17d   :  { %v1517_v6 = vsel %vm1503_vm2, %v1514_v60, %v1516_v62  ;;  %v4770_v44 = vmul.u32.u64.low %v1518_v35, %v1513_v11  ;;  %v4771_v56 = vmul.u32.u64.high %v1518_v35, %v1513_v11, %v4770_v44  ;;  %v833_v23 = vxor.u32 2147483648, %v4707_v3 }
 0x17e   :  { %v4767_v22 = vmul.u32.u64.low %v1518_v35, %v1517_v6  ;;  %v4768_v12 = vmul.u32.u64.high %v1518_v35, %v1517_v6, %v4767_v22  ;;  %v1142_v38 = vxor.u32 2147483648, %v4713_v50  ;;  %v3600_v10 = vadd.s32 4294967294, %v1229_v53 }
 0x17f   :  { %v1377_v55 = vadd.s32 1, %v3606_v59  ;;  %v5606_v15 = vxor.u32 2147483648, %v4536_v29  ;;  %v1039_v26 = vxor.u32 2147483648, %v1038_v0  ;;  %v1337_v54 = vshll.u32 %v4673_v51, %v1335_v5 }
 0x180   :  { %v1509_v49 = vsel %vm1503_vm2, %v1506_v28, %v1508_v18  ;;  %v1342_v60 = vshll.u32 %v1341_v39, 23  ;;  %vm3601_vm3 = vcmp.lt.s32.totalorder %v3600_v10, 0  ;;  %v1375_v32 = vor.u32 8388608, %v4736_v45 }
 0x181   :  { %v4781_v34 = vsel %vm5568_vm5, %v5606_v15, %v4536_v29  ;;  %vm1378_vm4 = vcmp.gt.s32.totalorder %v1377_v55, 0  ;;  %v4787_v40 = vor.u32 %v1338_v46, %v1337_v54  ;;  %vm1527_vm6 = vc.u32 %v4768_v12, %v4770_v44 }
 0x182   :  { %v1528_v17 = vadd.s32 1, %v4771_v56  ;;  %v1679_v29 = vand.u32 2139095040, %v4711_v25  ;;  %v4796_v51 = vsel %vm751_vm14, %v833_v23, %v4707_v3  ;;  %v4801_v33 = vsel %vm5566_vm15, %v1142_v38, %v4713_v50 }
 0x183   :  { %5607 = vst [vmem:[#allocation22_spill] sm:$0xff] %v4801_v33  ;;  %v1525_v45 = vmul.u32 %v1518_v35, %v1509_v49  ;;  %v1379_v5 = vsel %vm1378_vm4, %v1377_v55, 0  ;;  %v4805_v46 = vsel %vm5567_vm0, %v1039_v26, %v1038_v0  ;;  %v4807_v39 = vsel %vm3601_vm3, 0, %v3600_v10 }
 0x184   :  { %5608 = vst [vmem:[#allocation23_spill] sm:$0xff] %v4805_v46  ;;  %v1529_v11 = vsel %vm1527_vm6, %v1528_v17, %v4771_v56  ;;  %v1381_v62 = vand.u32 31, %v1379_v5  ;;  %v4810_v59 = vor.u32 4788187, %v1342_v60  ;;  %v1217_v3 = vadd.s32 %v4682_v16, %v4691_v43 }
 0x185   :  { %v1530_v53 = vadd.s32 %v1529_v11, %v1525_v45  ;;  %v5559_v50 = vand.u32 2147483647, %v4711_v25  ;;  %v4816_v18 = vshll.u32 %v1375_v32, 8  ;;  %v1680_v0 = vshrl.u32 %v1679_v29, 23 }
 0x186   :  { %v1382_v28 = vsub.s32 32, %v1381_v62  ;;  %v1233_v6 = vsub.s32 32, %v4807_v39  ;;  %v1384_v56 = vshll.u32 %v5592_v27, %v1381_v62  ;;  %v1387_v23 = vshll.u32 %v5589_v47, %v1381_v62 }
 0x187   :  { %v1531_v22 = vadd.s32 536870912, %v1530_v53  ;;  %v1390_v43 = vshll.u32 %v5590_v57, %v1381_v62  ;;  %v1380_v15 = vshrl.u32 %v1379_v5, 5  ;;  %v1393_v26 = vshll.u32 %v5578_v61, %v1381_v62 }
 0x188   :  { %v1385_v38 = vshrl.u32 %v5589_v47, %v1382_v28  ;;  %v1388_v16 = vshrl.u32 %v5590_v57, %v1382_v28  ;;  %v1391_v10 = vshrl.u32 %v5578_v61, %v1382_v28  ;;  %v1394_v54 = vshrl.u32 %v5580_v41, %v1382_v28 }
 0x189   :  { %v4825_v55 = vshrl.u32 %v1531_v22, 30  ;;  %v1683_v17 = vand.u32 8388607, %v5559_v50  ;;  %v1396_v11 = vshll.u32 %v5580_v41, %v1381_v62  ;;  %v1397_v35 = vshrl.u32 %v5581_v37, %v1382_v28 }
 0x18a   :  { %v1386_v49 = vor.u32 %v1385_v38, %v1384_v56  ;;  %v1389_v60 = vor.u32 %v1388_v16, %v1387_v23  ;;  %v1392_v32 = vor.u32 %v1391_v10, %v1390_v43  ;;  %v1395_v45 = vor.u32 %v1394_v54, %v1393_v26 }
 0x18b   :  { %5609 = vst [vmem:[#allocation24_spill] sm:$0xff] %v4825_v55  ;;  %v1533_v29 = vshll.u32 %v4825_v55, 30  ;;  %v1235_v22 = vshrl.u32 %v1217_v3, %v1233_v6  ;;  %v1237_v5 = vsub.s32 4294967266, %v4807_v39  ;;  %v1383_v2 = vshrl.u32 %v5592_v27, %v1382_v28 }
 0x18c   :  { %v3618_v33 = vadd.s32 4294967169, %v1680_v0  ;;  %v1398_v56 = vor.u32 %v1397_v35, %v1396_v11  ;;  %vm1399_vm7 = vcmp.lt.s32.totalorder %v1380_v15, 1  ;;  %vm1402_vm13 = vcmp.lt.s32.totalorder %v1380_v15, 4 }
 0x18d   :  { %v4836_v48 = vsub.s32 %v1530_v53, %v1533_v29  ;;  %vm1401_vm2 = vcmp.lt.s32.totalorder %v1380_v15, 3  ;;  %v1404_v23 = vsel %vm1402_vm13, %v1392_v32, 2102212464  ;;  %v1407_v38 = vsel %vm1399_vm7, %v1386_v49, %v1389_v60 }
 0x18e   :  { %v1408_v16 = vsel %vm1402_vm13, %v1395_v45, 920167782  ;;  %vm1400_vm3 = vcmp.lt.s32.totalorder %v1380_v15, 2  ;;  %v1411_v10 = vsel %vm1399_vm7, %v1389_v60, %v1392_v32  ;;  %v4839_v3 = vadd.s32 127, %v1237_v5 }
 0x18f   :  { %v1536_v43 = vsub.s32 0, %v4836_v48  ;;  %v1409_v62 = vsel %vm1401_vm2, %v1392_v32, %v1408_v16  ;;  %v1412_v28 = vsel %vm1402_vm13, %v1398_v56, 1326507024  ;;  %v1686_v0 = vadd.s32 1, %v3618_v33  ;;  %v102_v32 = vpop.permute.xlu0 %101 }
 0x190   :  { %v1410_v6 = vsel %vm1400_vm3, %v1407_v38, %v1409_v62  ;;  %v1403_v35 = vsel %vm1399_vm7, %v1383_v2, %v1386_v49  ;;  %v1405_v26 = vsel %vm1401_vm2, %v1389_v60, %v1404_v23  ;;  %v1413_v54 = vsel %vm1401_vm2, %v1395_v45, %v1412_v28 }
 0x191   :  { %v3611_v53 = vmin.u32 %v1536_v43, %v4836_v48  ;;  %v1414_v29 = vsel %vm1400_vm3, %v1411_v10, %v1413_v54  ;;  %v4845_v11 = vmul.u32.u64.low %v4816_v18, %v1410_v6  ;;  %v4846_v50 = vmul.u32.u64.high %v4816_v18, %v1410_v6, %v4845_v11 }
 0x192   :  { %vm1687_vm4 = vcmp.gt.s32.totalorder %v1686_v0, 0  ;;  %v4850_v16 = vmul.u32.u64.low %v4816_v18, %v1414_v29  ;;  %v4851_v38 = vmul.u32.u64.high %v4816_v18, %v1414_v29, %v4850_v16  ;;  %v1234_v2 = vshll.u32 %v4739_v1, %v4807_v39 }
 0x193   :  { %v1538_v5 = vclz %v3611_v53  ;;  %v1688_v33 = vsel %vm1687_vm4, %v1686_v0, 0  ;;  %v1406_v49 = vsel %vm1400_vm3, %v1403_v35, %v1405_v26  ;;  %v1684_v23 = vor.u32 8388608, %v1683_v17 }
 0x194   :  { %v1690_v60 = vand.u32 31, %v1688_v33  ;;  %v4858_v43 = vmul.f32 %v4381_v58, %v102_v32  ;;  %v4861_v10 = vor.u32 %v1235_v22, %v1234_v2  ;;  %v1526_v6 = vadd.s32 %v4770_v44, %v4768_v12 }
 0x195   :  { %v3612_v45 = vadd.s32 4294967294, %v1538_v5  ;;  %v1425_v28 = vadd.s32 1, %v4846_v50  ;;  %v1239_v1 = vshll.u32 %v4839_v3, 23  ;;  %v1422_v39 = vmul.u32 %v4816_v18, %v1406_v49 }
 0x196   :  { %v1691_v0 = vsub.s32 32, %v1690_v60  ;;  %vm1424_vm7 = vc.u32 %v4851_v38, %v4845_v11  ;;  %v1689_v17 = vshrl.u32 %v1688_v33, 5  ;;  %v1693_v12 = vshll.u32 %v5592_v27, %v1690_v60 }
 0x197   :  { %vm3613_vm6 = vcmp.lt.s32.totalorder %v3612_v45, 0  ;;  %v1426_v15 = vsel %vm1424_vm7, %v1425_v28, %v4846_v50  ;;  %v1696_v44 = vshll.u32 %v5589_v47, %v1690_v60  ;;  %v4874_v35 = vshll.u32 %v1684_v23, 8 }
 0x198   :  { %v1541_v58 = vsel %vm3613_vm6, 0, %v3612_v45  ;;  %v1694_v22 = vshrl.u32 %v5589_v47, %v1691_v0  ;;  %v1427_v53 = vadd.s32 %v1426_v15, %v1422_v39  ;;  %v1697_v26 = vshrl.u32 %v5590_v57, %v1691_v0 }
 0x199   :  { %v1546_v3 = vsub.s32 4294967266, %v1541_v58  ;;  %v1699_v18 = vshll.u32 %v5590_v57, %v1690_v60  ;;  %v1700_v54 = vshrl.u32 %v5578_v61, %v1691_v0  ;;  %v1702_v50 = vshll.u32 %v5578_v61, %v1690_v60 }
 0x19a   :  { %v1428_v29 = vadd.s32 536870912, %v1427_v53  ;;  %v1695_v32 = vor.u32 %v1694_v22, %v1693_v12  ;;  %v1703_v5 = vshrl.u32 %v5580_v41, %v1691_v0  ;;  %v1698_v16 = vor.u32 %v1697_v26, %v1696_v44 }
 0x19b   :  { %v1701_v33 = vor.u32 %v1700_v54, %v1699_v18  ;;  %v1705_v2 = vshll.u32 %v5580_v41, %v1690_v60  ;;  %v1706_v49 = vshrl.u32 %v5581_v37, %v1691_v0  ;;  %v1576_v39 = vand.u32 2139095040, %v4858_v43 }
 0x19c   :  { %v4883_v45 = vshrl.u32 %v1428_v29, 30  ;;  %v1704_v23 = vor.u32 %v1703_v5, %v1702_v50  ;;  %v1542_v15 = vsub.s32 32, %v1541_v58  ;;  %v1543_v22 = vshll.u32 %v4836_v48, %v1541_v58 }
 0x19d   :  { %v1692_v12 = vshrl.u32 %v5592_v27, %v1691_v0  ;;  %v1707_v62 = vor.u32 %v1706_v49, %v1705_v2  ;;  %v1547_v56 = vadd.s32 127, %v1546_v3  ;;  %vm1708_vm13 = vcmp.lt.s32.totalorder %v1689_v17, 1 }
 0x19e   :  { %5610 = vst [vmem:[#allocation25_spill] sm:$0xff] %v4883_v45  ;;  %v1430_v44 = vshll.u32 %v4883_v45, 30  ;;  %vm1711_vm2 = vcmp.lt.s32.totalorder %v1689_v17, 4  ;;  %vm1710_vm3 = vcmp.lt.s32.totalorder %v1689_v17, 3  ;;  %v1716_v26 = vsel %vm1708_vm13, %v1695_v32, %v1698_v16 }
 0x19f   :  { %v1713_v60 = vsel %vm1711_vm2, %v1701_v33, 2102212464  ;;  %v1717_v18 = vsel %vm1711_vm2, %v1704_v23, 920167782  ;;  %vm1709_vm4 = vcmp.lt.s32.totalorder %v1689_v17, 2  ;;  %v1712_v29 = vsel %vm1708_vm13, %v1692_v12, %v1695_v32 }
 0x1a0   :  { %v4890_v54 = vsub.s32 %v1427_v53, %v1430_v44  ;;  %v1718_v50 = vsel %vm1710_vm3, %v1701_v33, %v1717_v18  ;;  %v1714_v5 = vsel %vm1710_vm3, %v1698_v16, %v1713_v60  ;;  %v1720_v48 = vsel %vm1708_vm13, %v1698_v16, %v1701_v33 }
 0x1a1   :  { %v1719_v28 = vsel %vm1709_vm4, %v1716_v26, %v1718_v50  ;;  %v1721_v58 = vsel %vm1711_vm2, %v1707_v62, 1326507024  ;;  %v1544_v0 = vshrl.u32 %v1526_v6, %v1542_v15  ;;  %v1548_v2 = vshll.u32 %v1547_v56, 23 }
 0x1a2   :  { %v1433_v3 = vsub.s32 0, %v4890_v54  ;;  %v1722_v49 = vsel %vm1710_vm3, %v1704_v23, %v1721_v58  ;;  %v4894_v45 = vmul.u32.u64.low %v4874_v35, %v1719_v28  ;;  %v4895_v46 = vmul.u32.u64.high %v4874_v35, %v1719_v28, %v4894_v45 }
 0x1a3   :  { %v1723_v55 = vsel %vm1709_vm4, %v1720_v48, %v1722_v49  ;;  %v1577_v7 = vshrl.u32 %v1576_v39, 23  ;;  %v1715_v17 = vsel %vm1709_vm4, %v1712_v29, %v1714_v5  ;;  %v5611_v62 = vand.u32 2147483647, %v4810_v59 }
 0x1a4   :  { %v3607_v53 = vmin.u32 %v1433_v3, %v4890_v54  ;;  %v4899_v32 = vmul.u32.u64.low %v4874_v35, %v1723_v55  ;;  %v4900_v12 = vmul.u32.u64.high %v4874_v35, %v1723_v55, %v4899_v32  ;;  %v5612_v56 = vcvt.s32.f32 %v4787_v40 }
 0x1a5   :  { %v4908_v16 = vor.u32 4788187, %v1239_v1  ;;  %v3614_v33 = vadd.s32 4294967169, %v1577_v7  ;;  %v5613_v23 = vand.u32 2147483647, %v3935_v21  ;;  %v1243_v39 = vcvt.s32.f32 %v4861_v10 }
 0x1a6   :  { %v4906_v6 = vmul.f32 %v5612_v56, %v5611_v62  ;;  %v4917_v15 = vor.u32 %v1544_v0, %v1543_v22  ;;  %v1435_v55 = vclz %v3607_v53  ;;  %v5616_v59 = vsub.s32 4, %v4058_v9 }
 0x1a7   :  { %vm4912_vm6 = vcmp.le.f32.partialorder %v5613_v23, 0.7853982  ;;  %v4924_v1 = vor.u32 4788187, %v1548_v2  ;;  %v1731_v7 = vmul.u32 %v4874_v35, %v1715_v17  ;;  %v1734_v44 = vadd.s32 1, %v4895_v46 }
 0x1a8   :  { %v218_v40 = vsel %vm133_vm10, %v5616_v59, %v4058_v9  ;;  %v1583_v60 = vadd.s32 1, %v3614_v33  ;;  %v3608_v26 = vadd.s32 4294967294, %v1435_v55  ;;  %vm1733_vm7 = vc.u32 %v4900_v12, %v4894_v45 }
 0x1a9   :  { %v5617_v22 = vand.u32 2147483647, %v4858_v43  ;;  %v219_v29 = vsel %vm4912_vm6, %v3935_v21, %v4454_v4  ;;  %v1241_v9 = vand.u32 2147483647, %v4908_v16  ;;  %v1423_v50 = vadd.s32 %v4845_v11, %v4851_v38 }
 0x1aa   :  { %v1735_v35 = vsel %vm1733_vm7, %v1734_v44, %v4895_v46  ;;  %vm1584_vm10 = vcmp.gt.s32.totalorder %v1583_v60, 0  ;;  %vm3609_vm13 = vcmp.lt.s32.totalorder %v3608_v26, 0  ;;  %v220_v58 = vsel %vm4912_vm6, 0, %v218_v40 }
 0x1ab   :  { %v1580_v18 = vand.u32 8388607, %v5617_v22  ;;  %v1736_v5 = vadd.s32 %v1735_v35, %v1731_v7  ;;  %v1585_v48 = vsel %vm1584_vm10, %v1583_v60, 0  ;;  %v1552_v0 = vcvt.s32.f32 %v4917_v15 }
 0x1ac   :  { %v4942_v2 = vsel %vm3609_vm13, 0, %v3608_v26  ;;  %v1587_v3 = vand.u32 31, %v1585_v48  ;;  %3763 = vcosq.f32 %v219_v29  ;;  %v1550_v4 = vand.u32 2147483647, %v4924_v1 }
 0x1ad   :  { %v1737_v49 = vadd.s32 536870912, %v1736_v5  ;;  %v1581_v53 = vor.u32 8388608, %v1580_v18  ;;  %3765 = vsinq.f32 %v219_v29  ;;  %v4946_v46 = vadd.s32 %v4894_v45, %v4900_v12 }
 0x1ae   :  { %v1586_v11 = vshrl.u32 %v1585_v48, 5  ;;  %v1588_v38 = vsub.s32 32, %v1587_v3  ;;  %v4948_v17 = vand.u32 3, %v220_v58  ;;  %v1443_v32 = vsub.s32 4294967266, %v4942_v2 }
 0x1af   :  { %v4951_v62 = vshrl.u32 %v1737_v49, 30  ;;  %v1590_v56 = vshll.u32 %v5592_v27, %v1587_v3  ;;  %v1593_v33 = vshll.u32 %v5589_v47, %v1587_v3  ;;  %v1596_v55 = vshll.u32 %v5590_v57, %v1587_v3 }
 0x1b0   :  { %v1591_v23 = vshrl.u32 %v5589_v47, %v1588_v38  ;;  %v1594_v28 = vshrl.u32 %v5590_v57, %v1588_v38  ;;  %v1597_v45 = vshrl.u32 %v5578_v61, %v1588_v38  ;;  %v1599_v59 = vshll.u32 %v5578_v61, %v1587_v3 }
 0x1b1   :  { %v1739_v12 = vshll.u32 %v4951_v62, 30  ;;  %v1600_v40 = vshrl.u32 %v5580_v41, %v1588_v38  ;;  %v4962_v7 = vshll.u32 %v1581_v53, 8  ;;  %v1889_v22 = vadd.s32 3, %v220_v58 }
 0x1b2   :  { %v1592_v44 = vor.u32 %v1591_v23, %v1590_v56  ;;  %v1595_v60 = vor.u32 %v1594_v28, %v1593_v33  ;;  %v1598_v26 = vor.u32 %v1597_v45, %v1596_v55  ;;  %v1439_v47 = vsub.s32 32, %v4942_v2 }
 0x1b3   :  { %v4965_v18 = vsub.s32 %v1736_v5, %v1739_v12  ;;  %v1589_v57 = vshrl.u32 %v5592_v27, %v1588_v38  ;;  %v1601_v29 = vor.u32 %v1600_v40, %v1599_v59  ;;  %vm226_vm2 = vcmp.eq.s32.totalorder %v4948_v17, 0 }
 0x1b4   :  { %v1444_v35 = vadd.s32 127, %v1443_v32  ;;  %v1602_v61 = vshll.u32 %v5580_v41, %v1587_v3  ;;  %v1603_v48 = vshrl.u32 %v5581_v37, %v1588_v38  ;;  %vm1605_vm3 = vcmp.lt.s32.totalorder %v1586_v11, 1 }
 0x1b5   :  { %v1742_v49 = vsub.s32 0, %v4965_v18  ;;  %vm1607_vm4 = vcmp.lt.s32.totalorder %v1586_v11, 3  ;;  %vm1608_vm6 = vcmp.lt.s32.totalorder %v1586_v11, 4  ;;  %v1609_v58 = vsel %vm1605_vm3, %v1589_v57, %v1592_v44 }
 0x1b6   :  { %v3764_v53 = vpop.eup %3763  ;;  %v1604_v5 = vor.u32 %v1603_v48, %v1602_v61  ;;  %v1610_v56 = vsel %vm1608_vm6, %v1598_v26, 2102212464  ;;  %v1613_v27 = vsel %vm1605_vm3, %v1592_v44, %v1595_v60  ;;  %v1614_v33 = vsel %vm1608_vm6, %v1601_v29, 920167782 }
 0x1b7   :  { %v3766_v23 = vpop.eup %3765  ;;  %v3619_v32 = vmin.u32 %v1742_v49, %v4965_v18  ;;  %vm1606_vm7 = vcmp.lt.s32.totalorder %v1586_v11, 2  ;;  %v1611_v41 = vsel %vm1607_vm4, %v1595_v60, %v1610_v56  ;;  %v1615_v37 = vsel %vm1607_vm4, %v1598_v26, %v1614_v33 }
 0x1b8   :  { %v1441_v3 = vshrl.u32 %v1423_v50, %v1439_v47  ;;  %v1616_v38 = vsel %vm1606_vm7, %v1613_v27, %v1615_v37  ;;  %v1617_v28 = vsel %vm1605_vm3, %v1595_v60, %v1598_v26  ;;  %v1618_v55 = vsel %vm1608_vm6, %v1604_v5, 1326507024 }
 0x1b9   :  { %v1445_v45 = vshll.u32 %v1444_v35, 23  ;;  %v1744_v12 = vclz %v3619_v32  ;;  %v1612_v59 = vsel %vm1606_vm7, %v1609_v58, %v1611_v41  ;;  %v1619_v40 = vsel %vm1607_vm4, %v1601_v29, %v1618_v55 }
 0x1ba   :  { %v1620_v44 = vsel %vm1606_vm7, %v1617_v28, %v1619_v40  ;;  %v4980_v57 = vmul.u32.u64.low %v4962_v7, %v1616_v38  ;;  %v4981_v61 = vmul.u32.u64.high %v4962_v7, %v1616_v38, %v4980_v57  ;;  %vm223_vm10 = vweird.f32 %v3935_v21 }
 0x1bb   :  { %v227_v48 = vxor.u32 2147483648, %v3766_v23  ;;  %v1440_v50 = vshll.u32 %v4890_v54, %v4942_v2  ;;  %v3620_v47 = vadd.s32 4294967294, %v1744_v12  ;;  %vm225_vm13 = vcmp.lt.s32.totalorder %v4948_v17, 2 }
 0x1bc   :  { %v4988_v60 = vmul.u32.u64.low %v4962_v7, %v1620_v44  ;;  %v4989_v26 = vmul.u32.u64.high %v4962_v7, %v1620_v44, %v4988_v60  ;;  %v230_v11 = vxor.u32 2147483648, %v3764_v53  ;;  %v1890_v29 = vand.u32 3, %v1889_v22 }
 0x1bd   :  { %v228_v35 = vsel %vm226_vm2, %v3764_v53, %v227_v48  ;;  %v1442_v49 = vor.u32 %v1441_v3, %v1440_v50  ;;  %v1446_v58 = vor.u32 4788187, %v1445_v45  ;;  %vm3621_vm3 = vcmp.lt.s32.totalorder %v3620_v47, 0 }
 0x1be   :  { %v1628_v5 = vmul.u32 %v4962_v7, %v1612_v59  ;;  %v1747_v56 = vsel %vm3621_vm3, 0, %v3620_v47  ;;  %v1631_v54 = vadd.s32 1, %v4981_v61  ;;  %vm229_vm4 = vcmp.eq.s32.totalorder %v4948_v17, 2 }
 0x1bf   :  { %v423_v2 = vsub.s32 4, %v4034_v31  ;;  %v1748_v27 = vsub.s32 32, %v1747_v56  ;;  %v1752_v33 = vsub.s32 4294967266, %v1747_v56  ;;  %vm1892_vm6 = vcmp.eq.s32.totalorder %v1890_v29, 0 }
 0x1c0   :  { %v5618_v22 = vand.u32 2147483647, %v3932_v20  ;;  %vm1630_vm2 = vc.u32 %v4989_v26, %v4980_v57  ;;  %v1894_v7 = vsel %vm1892_vm6, %v3764_v53, %v227_v48  ;;  %vm1895_vm3 = vcmp.eq.s32.totalorder %v1890_v29, 2 }
 0x1c1   :  { %v231_v41 = vsel %vm229_vm4, %v230_v11, %v3766_v23  ;;  %v1753_v37 = vadd.s32 127, %v1752_v33  ;;  %v1632_v3 = vsel %vm1630_vm2, %v1631_v54, %v4981_v61  ;;  %vm1891_vm15 = vcmp.lt.s32.totalorder %v1890_v29, 2 }
 0x1c2   :  { %vm5000_vm7 = vcmp.le.f32.partialorder %v5618_v22, 0.7853982  ;;  %v1897_v38 = vsel %vm1895_vm3, %v230_v11, %v3766_v23  ;;  %v1633_v28 = vadd.s32 %v1632_v3, %v1628_v5  ;;  %v232_v45 = vsel %vm225_vm13, %v228_v35, %v231_v41 }
 0x1c3   :  { %v1898_v55 = vsel %vm1891_vm15, %v1894_v7, %v1897_v38  ;;  %v424_v12 = vsel %vm339_vm1, %v423_v2, %v4034_v31  ;;  %v1750_v59 = vshrl.u32 %v4946_v46, %v1748_v27  ;;  %v1754_v40 = vshll.u32 %v1753_v37, 23 }
 0x1c4   :  { %v1899_v53 = vsel %vm223_vm10, nan, %v1898_v55  ;;  %v5017_v44 = vsel %vm223_vm10, nan, %v232_v45  ;;  %v5023_v17 = vmul.f32 %v1243_v39, %v1241_v9  ;;  %v1634_v23 = vadd.s32 536870912, %v1633_v28 }
 0x1c5   :  { %3476 = vrot.lane.b32.xlu0 %v1899_v53, %s3859_s1  ;;  %v425_v31 = vsel %vm5000_vm7, %v3932_v20, %v4202_v19  ;;  %v426_v21 = vsel %vm5000_vm7, 0, %v424_v12  ;;  %v5036_v16 = vmul.f32 %v1552_v0, %v1550_v4  ;;  %v1447_v10 = vand.u32 2147483647, %v1446_v58  ;;  %v5623_v12 = vld [vmem:[#allocation6_spill] sm:$0xff]  ;;  %v5627_v53 = vld [vmem:[#allocation9_spill] sm:$0xff] }
 0x1c6   :  { %v1749_v39 = vshll.u32 %v4965_v18, %v1747_v56  ;;  %3767 = vcosq.f32 %v425_v31  ;;  %v1755_v9 = vor.u32 4788187, %v1754_v40  ;;  %v5039_v46 = vshrl.u32 %v1634_v23, 30 }
 0x1c7   :  { %3769 = vsinq.f32 %v425_v31  ;;  %v320_v61 = vsub.s32 4, %v4152_v14  ;;  %v1449_v19 = vcvt.s32.f32 %v1442_v49  ;;  %v2097_v50 = vadd.s32 3, %v426_v21 }
 0x1c8   :  { %v1751_v48 = vor.u32 %v1750_v59, %v1749_v39  ;;  %v5621_v47 = vand.u32 2147483647, %v3951_v42  ;;  %v1636_v15 = vshll.u32 %v5039_v46, 30  ;;  %v430_v1 = vand.u32 3, %v426_v21 }
 0x1c9   :  { %v321_v0 = vsel %vm236_vm8, %v320_v61, %v4152_v14  ;;  %v1348_v18 = vxor.u32 2147483648, %v4906_v6  ;;  %v1245_v60 = vxor.u32 2147483648, %v5023_v17  ;;  %v1554_v29 = vxor.u32 2147483648, %v5036_v16 }
 0x1ca   :  { %vm235_vm1 = vcmp.le.f32.partialorder %v5621_v47, 0.7853982  ;;  %v5053_v35 = vmul.f32 %v1449_v19, %v1447_v10  ;;  %v1756_v49 = vand.u32 2147483647, %v1755_v9  ;;  %v5055_v58 = vsub.s32 %v1633_v28, %v1636_v15 }
 0x1cb   :  { %v322_v4 = vsel %vm235_vm1, %v3951_v42, %v4551_v36  ;;  %v323_v11 = vsel %vm235_vm1, 0, %v321_v0  ;;  %v1758_v5 = vcvt.s32.f32 %v1751_v48  ;;  %v5059_v14 = vadd.s32 %v4980_v57, %v4989_v26 }
 0x1cc   :  { %3771 = vcosq.f32 %v322_v4  ;;  %v2098_v56 = vand.u32 3, %v2097_v50  ;;  %v1639_v36 = vsub.s32 0, %v5055_v58  ;;  %vm429_vm8 = vweird.f32 %v3932_v20 }
 0x1cd   :  { %3773 = vsinq.f32 %v322_v4  ;;  %vm431_vm15 = vcmp.lt.s32.totalorder %v430_v1, 2  ;;  %v5063_v54 = vand.u32 3, %v323_v11  ;;  %v526_v2 = vsub.s32 4, %v4091_v13 }
 0x1ce   :  { %vm432_vm10 = vcmp.eq.s32.totalorder %v430_v1, 0  ;;  %vm435_vm13 = vcmp.eq.s32.totalorder %v430_v1, 2  ;;  %v1993_v27 = vadd.s32 3, %v323_v11  ;;  %v5622_v33 = vand.u32 2147483647, %v3946_v30  ;;  %v5628_v1 = vld [vmem:[#allocation13_spill] sm:$0xff] }
 0x1cf   :  { %v5068_v22 = vmul.f32 %v1758_v5, %v1756_v49  ;;  %v3615_v57 = vmin.u32 %v1639_v36, %v5055_v58  ;;  %v527_v26 = vsel %vm442_vm11, %v526_v2, %v4091_v13  ;;  %vm2099_vm6 = vcmp.lt.s32.totalorder %v2098_v56, 2 }
 0x1d0   :  { %vm441_vm4 = vcmp.le.f32.partialorder %v5622_v33, 0.7853982  ;;  %v3768_v7 = vpop.eup %3767  ;;  %vm2100_vm7 = vcmp.eq.s32.totalorder %v2098_v56, 0  ;;  %vm2103_vm2 = vcmp.eq.s32.totalorder %v2098_v56, 2  ;;  %vm328_vm3 = vcmp.lt.s32.totalorder %v5063_v54, 2 }
 0x1d1   :  { %v528_v32 = vsel %vm441_vm4, %v3946_v30, %v4461_v24  ;;  %v3770_v41 = vpop.eup %3769  ;;  %v1641_v37 = vclz %v3615_v57  ;;  %v436_v3 = vxor.u32 2147483648, %v3768_v7  ;;  %vm329_vm1 = vcmp.eq.s32.totalorder %v5063_v54, 0  ;;  %v5629_v57 = vld [vmem:[#allocation14_spill] sm:$0xff] }
 0x1d2   :  { %3775 = vcosq.f32 %v528_v32  ;;  %v529_v38 = vsel %vm441_vm4, 0, %v527_v26  ;;  %v433_v28 = vxor.u32 2147483648, %v3770_v41  ;;  %vm326_vm0 = vweird.f32 %v3951_v42 }
 0x1d3   :  { %vm332_vm11 = vcmp.eq.s32.totalorder %v5063_v54, 2  ;;  %v1994_v13 = vand.u32 3, %v1993_v27  ;;  %3777 = vsinq.f32 %v528_v32  ;;  %v3616_v24 = vadd.s32 4294967294, %v1641_v37 }
 0x1d4   :  { %v437_v55 = vsel %vm435_vm13, %v436_v3, %v3770_v41  ;;  %v2105_v45 = vsel %vm2103_vm2, %v436_v3, %v3770_v41  ;;  %v5624_v59 = vand.u32 2147483647, %v5623_v12  ;;  %v629_v23 = vsub.s32 4, %v5627_v53  ;;  %v5630_v41 = vld [vmem:[#allocation19_spill] sm:$0xff] }
 0x1d5   :  { %v434_v21 = vsel %vm432_vm10, %v3768_v7, %v433_v28  ;;  %v2102_v10 = vsel %vm2100_vm7, %v3768_v7, %v433_v28  ;;  %v533_v39 = vand.u32 3, %v529_v38  ;;  %v2201_v9 = vadd.s32 3, %v529_v38 }
 0x1d6   :  { %vm5083_vm5 = vcmp.le.f32.partialorder %v5624_v59, 0.7853982  ;;  %v3772_v31 = vpop.eup %3771  ;;  %vm3617_vm4 = vcmp.lt.s32.totalorder %v3616_v24, 0  ;;  %v438_v61 = vsel %vm431_vm15, %v434_v21, %v437_v55  ;;  %v2106_v19 = vsel %vm2099_vm6, %v2102_v10, %v2105_v45  ;;  %v5631_v55 = vld [vmem:[#allocation17_spill] sm:$0xff] }
 0x1d7   :  { %v333_v48 = vxor.u32 2147483648, %v3772_v31  ;;  %v3774_v50 = vpop.eup %3773  ;;  %v1644_v47 = vsel %vm3617_vm4, 0, %v3616_v24  ;;  %v5094_v15 = vsel %vm429_vm8, nan, %v438_v61  ;;  %v2107_v0 = vsel %vm429_vm8, nan, %v2106_v19 }
 0x1d8   :  { %vm1995_vm10 = vcmp.lt.s32.totalorder %v1994_v13, 2  ;;  %v1649_v4 = vsub.s32 4294967266, %v1644_v47  ;;  %3480 = vrot.lane.b32.xlu0 %v2107_v0, %s3859_s1  ;;  %v330_v11 = vxor.u32 2147483648, %v3774_v50  ;;  %vm1996_vm13 = vcmp.eq.s32.totalorder %v1994_v13, 0 }
 0x1d9   :  { %vm1999_vm7 = vcmp.eq.s32.totalorder %v1994_v13, 2  ;;  %vm1266_vm15 = vcmp.lt.s32.totalorder %v5628_v1, 0  ;;  %v1645_v49 = vsub.s32 32, %v1644_v47  ;;  %v334_v56 = vsel %vm332_vm11, %v333_v48, %v3774_v50 }
 0x1da   :  { %v2001_v5 = vsel %vm1999_vm7, %v333_v48, %v3774_v50  ;;  %vm532_vm6 = vweird.f32 %v3946_v30  ;;  %vm534_vm2 = vcmp.lt.s32.totalorder %v533_v39, 2  ;;  %v1650_v36 = vadd.s32 127, %v1649_v4 }
 0x1db   :  { %v1998_v20 = vsel %vm1996_vm13, %v3772_v31, %v330_v11  ;;  %v331_v2 = vsel %vm329_vm1, %v3772_v31, %v330_v11  ;;  %v2202_v27 = vand.u32 3, %v2201_v9  ;;  %vm1163_vm8 = vcmp.lt.s32.totalorder %v5629_v57, 0 }
 0x1dc   :  { %v3776_v33 = vpop.eup %3775  ;;  %v2002_v26 = vsel %vm1995_vm10, %v1998_v20, %v2001_v5  ;;  %v335_v32 = vsel %vm328_vm3, %v331_v2, %v334_v56  ;;  %vm535_vm4 = vcmp.eq.s32.totalorder %v533_v39, 0  ;;  %v630_v7 = vsel %vm545_vm12, %v629_v23, %v5627_v53 }
 0x1dd   :  { %vm1472_vm11 = vcmp.lt.s32.totalorder %v5630_v41, 0  ;;  %v1651_v37 = vshll.u32 %v1650_v36, 23  ;;  %v2003_v3 = vsel %vm326_vm0, nan, %v2002_v26  ;;  %v5117_v38 = vsel %vm326_vm0, nan, %v335_v32  ;;  %v3778_v28 = vpop.eup %3777 }
 0x1de   :  { %vm538_vm1 = vcmp.eq.s32.totalorder %v533_v39, 2  ;;  %v1646_v54 = vshll.u32 %v5055_v58, %v1644_v47  ;;  %v1647_v13 = vshrl.u32 %v5059_v14, %v1645_v49  ;;  %3478 = vrot.lane.b32.xlu1 %v2003_v3, %s3859_s1  ;;  %v539_v24 = vxor.u32 2147483648, %v3776_v33  ;;  %v5632_v47 = vld [vmem:[#allocation5_spill] sm:$0xff]  ;;  %v5635_v49 = vld [vmem:[#allocation16_spill] sm:$0xff] }
 0x1df   :  { %v631_v45 = vsel %vm5083_vm5, %v5623_v12, %v5631_v55  ;;  %vm1369_vm12 = vcmp.lt.s32.totalorder %v4696_v63, 0  ;;  %v536_v59 = vxor.u32 2147483648, %v3778_v28  ;;  %vm2207_vm3 = vcmp.eq.s32.totalorder %v2202_v27, 2 }
 0x1e0   :  { %v632_v42 = vsel %vm5083_vm5, 0, %v630_v7  ;;  %3779 = vcosq.f32 %v631_v45  ;;  %v540_v53 = vsel %vm538_vm1, %v539_v24, %v3778_v28  ;;  %vm2204_vm0 = vcmp.eq.s32.totalorder %v2202_v27, 0 }
 0x1e1   :  { %v2209_v58 = vsel %vm2207_vm3, %v539_v24, %v3778_v28  ;;  %3781 = vsinq.f32 %v631_v45  ;;  %v1652_v14 = vor.u32 4788187, %v1651_v37  ;;  %v537_v23 = vsel %vm535_vm4, %v3776_v33, %v536_v59 }
 0x1e2   :  { %vm2203_vm10 = vcmp.lt.s32.totalorder %v2202_v27, 2  ;;  %v2206_v31 = vsel %vm2204_vm0, %v3776_v33, %v536_v59  ;;  %v1648_v21 = vor.u32 %v1647_v13, %v1646_v54  ;;  %v541_v10 = vsel %vm534_vm2, %v537_v23, %v540_v53  ;;  %v5639_v33 = vld [vmem:[#allocation12_spill] sm:$0xff] }
 0x1e3   :  { %v2210_v9 = vsel %vm2203_vm10, %v2206_v31, %v2209_v58  ;;  %v2305_v61 = vadd.s32 3, %v632_v42  ;;  %v5136_v40 = vsel %vm1266_vm15, %v1348_v18, %v4906_v6  ;;  %vm5569_vm5 = vcmp.lt.s32.totalorder %v4711_v25, 0  ;;  %v5634_v6 = vld [vmem:[#allocation8_spill] sm:$0xff] }
 0x1e4   :  { %v5141_v19 = vsel %vm532_vm6, nan, %v541_v10  ;;  %v2211_v48 = vsel %vm532_vm6, nan, %v2210_v9  ;;  %v1451_v39 = vxor.u32 2147483648, %v5053_v35  ;;  %v1760_v50 = vxor.u32 2147483648, %v5068_v22  ;;  %v5643_v9 = vld [vmem:[#allocation10_spill] sm:$0xff] }
 0x1e5   :  { %3482 = vrot.lane.b32.xlu1 %v2211_v48, %s3859_s1  ;;  %v5633_v0 = vand.u32 2147483647, %v5632_v47  ;;  %v732_v18 = vsub.s32 4, %v5634_v6  ;;  %v5156_v4 = vsel %vm1163_vm8, %v1245_v60, %v5023_v17  ;;  %v1653_v30 = vand.u32 2147483647, %v1652_v14 }
 0x1e6   :  { %v636_v11 = vand.u32 3, %v632_v42  ;;  %v5165_v56 = vsel %vm1472_vm11, %v1554_v29, %v5036_v16  ;;  %v1655_v36 = vcvt.s32.f32 %v1648_v21  ;;  %v2306_v20 = vand.u32 3, %v2305_v61 }
 0x1e7   :  { %vm647_vm13 = vcmp.le.f32.partialorder %v5633_v0, 0.7853982  ;;  %v733_v2 = vsel %vm648_vm9, %v732_v18, %v5634_v6  ;;  %v5636_v60 = vand.u32 2147483647, %v4208_v52  ;;  %v835_v26 = vsub.s32 4, %v5639_v33 }
 0x1e8   :  { %v734_v5 = vsel %vm647_vm13, %v5632_v47, %v5635_v49  ;;  %v735_v17 = vsel %vm647_vm13, 0, %v733_v2  ;;  %v5180_v16 = vsel %vm1369_vm12, %v1451_v39, %v5053_v35  ;;  %v5185_v29 = vsel %vm5569_vm5, %v1760_v50, %v5068_v22 }
 0x1e9   :  { %3783 = vcosq.f32 %v734_v5  ;;  %vm5172_vm7 = vcmp.le.f32.partialorder %v5636_v60, 0.7853982  ;;  %v5191_v37 = vmul.f32 %v1655_v36, %v1653_v30  ;;  %vm637_vm9 = vcmp.lt.s32.totalorder %v636_v11, 2 }
 0x1ea   :  { %3785 = vsinq.f32 %v734_v5  ;;  %v837_v32 = vsel %vm5172_vm7, %v4208_v52, %v4796_v51  ;;  %v3780_v7 = vpop.eup %3779  ;;  %v836_v35 = vsel %vm751_vm14, %v835_v26, %v5639_v33  ;;  %vm638_vm6 = vcmp.eq.s32.totalorder %v636_v11, 0  ;;  %v5645_v5 = vld [vmem:[#allocation18_spill] sm:$0xff] }
 0x1eb   :  { %3787 = vcosq.f32 %v837_v32  ;;  %v3782_v3 = vpop.eup %3781  ;;  %vm641_vm2 = vcmp.eq.s32.totalorder %v636_v11, 2  ;;  %v642_v22 = vxor.u32 2147483648, %v3780_v7  ;;  %v2409_v28 = vadd.s32 3, %v735_v17 }
 0x1ec   :  { %v639_v54 = vxor.u32 2147483648, %v3782_v3  ;;  %vm2311_vm4 = vcmp.eq.s32.totalorder %v2306_v20, 2  ;;  %v838_v13 = vsel %vm5172_vm7, 0, %v836_v35  ;;  %3789 = vsinq.f32 %v837_v32 }
 0x1ed   :  { %vm2308_vm1 = vcmp.eq.s32.totalorder %v2306_v20, 0  ;;  %v2313_v51 = vsel %vm2311_vm4, %v642_v22, %v3782_v3  ;;  %v643_v24 = vsel %vm641_vm2, %v642_v22, %v3782_v3  ;;  %v739_v55 = vand.u32 3, %v735_v17 }
 0x1ee   :  { %vm2307_vm3 = vcmp.lt.s32.totalorder %v2306_v20, 2  ;;  %v2310_v45 = vsel %vm2308_vm1, %v3780_v7, %v639_v54  ;;  %v640_v59 = vsel %vm638_vm6, %v3780_v7, %v639_v54  ;;  %v2513_v42 = vadd.s32 3, %v838_v13 }
 0x1ef   :  { %vm5570_vm14 = vcmp.lt.s32.totalorder %v4858_v43, 0  ;;  %vm635_vm0 = vweird.f32 %v5623_v12  ;;  %v2314_v53 = vsel %vm2307_vm3, %v2310_v45, %v2313_v51  ;;  %v644_v58 = vsel %vm637_vm9, %v640_v59, %v643_v24  ;;  %v5649_v45 = vld [vmem:[#allocation23_spill] sm:$0xff] }
 0x1f0   :  { %v2410_v14 = vand.u32 3, %v2409_v28  ;;  %v1657_v23 = vxor.u32 2147483648, %v5191_v37  ;;  %v2315_v31 = vsel %vm635_vm0, nan, %v2314_v53  ;;  %vm738_vm10 = vweird.f32 %v5632_v47 }
 0x1f1   :  { %v5640_v21 = vand.u32 2147483647, %v4146_v8  ;;  %3484 = vrot.lane.b32.xlu0 %v2315_v31, %s3859_s1  ;;  %vm740_vm7 = vcmp.lt.s32.totalorder %v739_v55, 2  ;;  %vm741_vm6 = vcmp.eq.s32.totalorder %v739_v55, 0  ;;  %v938_v61 = vsub.s32 4, %v5643_v9 }
 0x1f2   :  { %vm744_vm9 = vcmp.eq.s32.totalorder %v739_v55, 2  ;;  %v5217_v50 = vand.u32 3, %v838_v13  ;;  %v2514_v0 = vand.u32 3, %v2513_v42  ;;  %vm2411_vm2 = vcmp.lt.s32.totalorder %v2410_v14, 2  ;;  %v5646_v13 = vld [vmem:[#allocation11_spill] sm:$0xff] }
 0x1f3   :  { %vm5207_vm13 = vcmp.le.f32.partialorder %v5640_v21, 0.7853982  ;;  %v3784_v39 = vpop.eup %3783  ;;  %vm2412_vm4 = vcmp.eq.s32.totalorder %v2410_v14, 0  ;;  %vm2415_vm1 = vcmp.eq.s32.totalorder %v2410_v14, 2  ;;  %vm5644_vm3 = vcmp.lt.s32.totalorder %v4146_v8, 0 }
 0x1f4   :  { %v940_v48 = vsel %vm5207_vm13, %v4146_v8, %v4781_v34  ;;  %v3786_v6 = vpop.eup %3785  ;;  %v745_v18 = vxor.u32 2147483648, %v3784_v39  ;;  %v939_v49 = vsel %vm5644_vm3, %v938_v61, %v5643_v9  ;;  %v1041_v34 = vsub.s32 4, %v5645_v5 }
 0x1f5   :  { %3791 = vcosq.f32 %v940_v48  ;;  %v3788_v30 = vpop.eup %3787  ;;  %v742_v11 = vxor.u32 2147483648, %v3786_v6  ;;  %v941_v17 = vsel %vm5207_vm13, 0, %v939_v49  ;;  %vm2519_vm5 = vcmp.eq.s32.totalorder %v2514_v0, 2 }
 0x1f6   :  { %3793 = vsinq.f32 %v940_v48  ;;  %v746_v36 = vsel %vm744_vm9, %v745_v18, %v3786_v6  ;;  %v2417_v20 = vsel %vm2415_vm1, %v745_v18, %v3786_v6  ;;  %v848_v2 = vxor.u32 2147483648, %v3788_v30  ;;  %v3790_v60 = vpop.eup %3789  ;;  %v5655_v6 = vld [vmem:[#allocation22_spill] sm:$0xff] }
 0x1f7   :  { %v743_v27 = vsel %vm741_vm6, %v3784_v39, %v742_v11  ;;  %v2414_v33 = vsel %vm2412_vm4, %v3784_v39, %v742_v11  ;;  %v2617_v26 = vadd.s32 3, %v941_v17  ;;  %v845_v35 = vxor.u32 2147483648, %v3790_v60  ;;  %v5654_v39 = vld [vmem:[#allocation15_spill] sm:$0xff] }
 0x1f8   :  { %v747_v32 = vsel %vm740_vm7, %v743_v27, %v746_v36  ;;  %v2418_v7 = vsel %vm2411_vm2, %v2414_v33, %v2417_v20  ;;  %v2521_v3 = vsel %vm2519_vm5, %v848_v2, %v3790_v60  ;;  %v5231_v22 = vsel %vm5570_vm14, %v1657_v23, %v5191_v37 }
 0x1f9   :  { %v2419_v28 = vsel %vm738_vm10, nan, %v2418_v7  ;;  %vm841_vm13 = vweird.f32 %v4208_v52  ;;  %vm2516_vm6 = vcmp.eq.s32.totalorder %v2514_v0, 0  ;;  %vm2515_vm9 = vcmp.lt.s32.totalorder %v2514_v0, 2 }
 0x1fa   :  { %3486 = vrot.lane.b32.xlu1 %v2419_v28, %s3859_s1  ;;  %v2518_v54 = vsel %vm2516_vm6, %v3788_v30, %v845_v35  ;;  %v5647_v51 = vand.u32 2147483647, %v5646_v13  ;;  %vm5648_vm5 = vcmp.lt.s32.totalorder %v5646_v13, 0  ;;  %vm843_vm2 = vcmp.lt.s32.totalorder %v5217_v50, 2  ;;  %v5660_v28 = vld [vmem:[#allocation21_spill] sm:$0xff] }
 0x1fb   :  { %v1042_v24 = vsel %vm5648_vm5, %v1041_v34, %v5645_v5  ;;  %v2522_v37 = vsel %vm2515_vm9, %v2518_v54, %v2521_v3  ;;  %v2618_v55 = vand.u32 3, %v2617_v26  ;;  %v5247_v42 = vsel %vm635_vm0, nan, %v644_v58  ;;  %v5650_v58 = vld [vmem:[#allocation7_spill] sm:$0xff] }
 0x1fc   :  { %vm956_vm7 = vcmp.le.f32.partialorder %v5647_v51, 0.7853982  ;;  %v2523_v53 = vsel %vm841_vm13, nan, %v2522_v37  ;;  %v945_v14 = vand.u32 3, %v941_v17  ;;  %vm844_vm4 = vcmp.eq.s32.totalorder %v5217_v50, 0 }
 0x1fd   :  { %v1043_v59 = vsel %vm956_vm7, %v5646_v13, %v5649_v45  ;;  %vm847_vm1 = vcmp.eq.s32.totalorder %v5217_v50, 2  ;;  %3488 = vrot.lane.b32.xlu0 %v2523_v53, %s3859_s1  ;;  %v1044_v31 = vsel %vm956_vm7, 0, %v1042_v24  ;;  %vm944_vm3 = vweird.f32 %v4146_v8  ;;  %v5661_v45 = vld [vmem:[#allocation20_spill] sm:$0xff] }
 0x1fe   :  { %3795 = vcosq.f32 %v1043_v59  ;;  %v849_v21 = vsel %vm847_vm1, %v848_v2, %v3790_v60  ;;  %v5651_v10 = vand.u32 2147483647, %v5650_v58  ;;  %v846_v48 = vsel %vm844_vm4, %v3788_v30, %v845_v35 }
 0x1ff   :  { %v3792_v23 = vpop.eup %3791  ;;  %3797 = vsinq.f32 %v1043_v59  ;;  %vm2623_vm6 = vcmp.eq.s32.totalorder %v2618_v55, 2  ;;  %v1144_v0 = vsub.s32 4, %v5654_v39  ;;  %vm947_vm9 = vcmp.eq.s32.totalorder %v945_v14, 0 }
 0x200   :  { %v951_v12 = vxor.u32 2147483648, %v3792_v23  ;;  %vm5257_vm0 = vcmp.le.f32.partialorder %v5651_v10, 0.7853982  ;;  %v3794_v61 = vpop.eup %3793  ;;  %v2721_v5 = vadd.s32 3, %v1044_v31  ;;  %vm950_vm7 = vcmp.eq.s32.totalorder %v945_v14, 2 }
 0x201   :  { %v1146_v18 = vsel %vm5257_vm0, %v5650_v58, %v5655_v6  ;;  %v948_v11 = vxor.u32 2147483648, %v3794_v61  ;;  %vm2619_vm5 = vcmp.lt.s32.totalorder %v2618_v55, 2  ;;  %vm2620_vm1 = vcmp.eq.s32.totalorder %v2618_v55, 0 }
 0x202   :  { %v2625_v49 = vsel %vm2623_vm6, %v951_v12, %v3794_v61  ;;  %vm5656_vm14 = vcmp.lt.s32.totalorder %v5650_v58, 0  ;;  %v1048_v36 = vand.u32 3, %v1044_v31  ;;  %3799 = vcosq.f32 %v1146_v18 }
 0x203   :  { %v1145_v34 = vsel %vm5656_vm14, %v1144_v0, %v5654_v39  ;;  %v2622_v30 = vsel %vm2620_vm1, %v3792_v23, %v948_v11  ;;  %v850_v2 = vsel %vm843_vm2, %v846_v48, %v849_v21  ;;  %v952_v17 = vsel %vm950_vm7, %v951_v12, %v3794_v61 }
 0x204   :  { %v1147_v20 = vsel %vm5257_vm0, 0, %v1145_v34  ;;  %v2626_v60 = vsel %vm2619_vm5, %v2622_v30, %v2625_v49  ;;  %vm1047_vm4 = vweird.f32 %v5646_v13  ;;  %v5657_v27 = vand.u32 2147483647, %v5629_v57 }
 0x205   :  { %v949_v26 = vsel %vm947_vm9, %v3792_v23, %v948_v11  ;;  %v2627_v7 = vsel %vm944_vm3, nan, %v2626_v60  ;;  %v2722_v35 = vand.u32 3, %v2721_v5  ;;  %3801 = vsinq.f32 %v1146_v18 }
 0x206   :  { %vm5276_vm6 = vcmp.le.f32.partialorder %v5657_v27, 0.7853982  ;;  %v5285_v50 = vsel %vm738_vm10, nan, %v747_v32  ;;  %3490 = vrot.lane.b32.xlu1 %v2627_v7, %s3859_s1  ;;  %v2825_v3 = vadd.s32 3, %v1147_v20  ;;  %v1247_v54 = vsub.s32 4, %v5660_v28 }
 0x207   :  { %v1249_v51 = vsel %vm5276_vm6, %v5629_v57, %v5156_v4  ;;  %v5295_v37 = vsel %vm841_vm13, nan, %v850_v2  ;;  %vm946_vm14 = vcmp.lt.s32.totalorder %v945_v14, 2  ;;  %vm1050_vm2 = vcmp.eq.s32.totalorder %v1048_v36, 0 }
 0x208   :  { %v3796_v24 = vpop.eup %3795  ;;  %3803 = vcosq.f32 %v1249_v51  ;;  %v953_v32 = vsel %vm946_vm14, %v949_v26, %v952_v17  ;;  %vm1053_vm10 = vcmp.eq.s32.totalorder %v1048_v36, 2  ;;  %v1350_v59 = vsub.s32 4, %v5661_v45 }
 0x209   :  { %v3798_v47 = vpop.eup %3797  ;;  %v1054_v55 = vxor.u32 2147483648, %v3796_v24  ;;  %vm2727_vm0 = vcmp.eq.s32.totalorder %v2722_v35, 2  ;;  %v1248_v4 = vsel %vm1163_vm8, %v1247_v54, %v5660_v28  ;;  %3805 = vsinq.f32 %v1249_v51 }
 0x20a   :  { %v1051_v53 = vxor.u32 2147483648, %v3798_v47  ;;  %vm2724_vm9 = vcmp.eq.s32.totalorder %v2722_v35, 0  ;;  %v2826_v23 = vand.u32 3, %v2825_v3  ;;  %v1250_v14 = vsel %vm5276_vm6, 0, %v1248_v4 }
 0x20b   :  { %v2729_v52 = vsel %vm2727_vm0, %v1054_v55, %v3798_v47  ;;  %vm2723_vm13 = vcmp.lt.s32.totalorder %v2722_v35, 2  ;;  %v1055_v12 = vsel %vm1053_vm10, %v1054_v55, %v3798_v47  ;;  %vm1150_vm7 = vweird.f32 %v5650_v58 }
 0x20c   :  { %v2726_v31 = vsel %vm2724_vm9, %v3796_v24, %v1051_v53  ;;  %v1052_v21 = vsel %vm1050_vm2, %v3796_v24, %v1051_v53  ;;  %v1151_v9 = vand.u32 3, %v1147_v20  ;;  %v5662_v61 = vand.u32 2147483647, %v5628_v1  ;;  %v3800_v0 = vpop.eup %3799 }
 0x20d   :  { %v2730_v10 = vsel %vm2723_vm13, %v2726_v31, %v2729_v52  ;;  %v1351_v39 = vsel %vm1266_vm15, %v1350_v59, %v5661_v45  ;;  %vm1049_vm8 = vcmp.lt.s32.totalorder %v1048_v36, 2  ;;  %v2929_v18 = vadd.s32 3, %v1250_v14  ;;  %v5668_v59 = vld [vmem:[#allocation25_spill] sm:$0xff] }
 0x20e   :  { %vm5307_vm5 = vcmp.le.f32.partialorder %v5662_v61, 0.7853982  ;;  %v2731_v6 = vsel %vm1047_vm4, nan, %v2730_v10  ;;  %v5322_v49 = vsel %vm944_vm3, nan, %v953_v32  ;;  %v1056_v5 = vsel %vm1049_vm8, %v1052_v21, %v1055_v12 }
 0x20f   :  { %v1352_v11 = vsel %vm5307_vm5, %v5628_v1, %v5136_v40  ;;  %3492 = vrot.lane.b32.xlu0 %v2731_v6, %s3859_s1  ;;  %v1157_v34 = vxor.u32 2147483648, %v3800_v0  ;;  %vm2831_vm15 = vcmp.eq.s32.totalorder %v2826_v23, 2  ;;  %v3802_v30 = vpop.eup %3801  ;;  %vm1253_vm1 = vweird.f32 %v5629_v57 }
 0x210   :  { %v1254_v36 = vand.u32 3, %v1250_v14  ;;  %v2930_v20 = vand.u32 3, %v2929_v18  ;;  %v1353_v2 = vsel %vm5307_vm5, 0, %v1351_v39  ;;  %3807 = vcosq.f32 %v1352_v11  ;;  %v5672_v18 = vld [vmem:[#allocation24_spill] sm:$0xff] }
 0x211   :  { %vm1152_vm6 = vcmp.lt.s32.totalorder %v1151_v9, 2  ;;  %v1154_v40 = vxor.u32 2147483648, %v3802_v30  ;;  %v2833_v17 = vsel %vm2831_vm15, %v1157_v34, %v3802_v30  ;;  %3809 = vsinq.f32 %v1352_v11 }
 0x212   :  { %v3804_v8 = vpop.eup %3803  ;;  %vm1153_vm3 = vcmp.eq.s32.totalorder %v1151_v9, 0  ;;  %vm1156_vm14 = vcmp.eq.s32.totalorder %v1151_v9, 2  ;;  %vm2827_vm2 = vcmp.lt.s32.totalorder %v2826_v23, 2  ;;  %vm2828_vm10 = vcmp.eq.s32.totalorder %v2826_v23, 0 }
 0x213   :  { %v5330_v60 = vsel %vm1047_vm4, nan, %v1056_v5  ;;  %v2830_v27 = vsel %vm2828_vm10, %v3800_v0, %v1154_v40  ;;  %v1260_v33 = vxor.u32 2147483648, %v3804_v8  ;;  %v3033_v26 = vadd.s32 3, %v1353_v2  ;;  %v3806_v7 = vpop.eup %3805 }
 0x214   :  { %v1158_v35 = vsel %vm1156_vm14, %v1157_v34, %v3802_v30  ;;  %v2834_v3 = vsel %vm2827_vm2, %v2830_v27, %v2833_v17  ;;  %vm1255_vm0 = vcmp.lt.s32.totalorder %v1254_v36, 2  ;;  %vm2935_vm9 = vcmp.eq.s32.totalorder %v2930_v20, 2 }
 0x215   :  { %v1357_v28 = vand.u32 3, %v1353_v2  ;;  %v1155_v54 = vsel %vm1153_vm3, %v3800_v0, %v1154_v40  ;;  %v2835_v51 = vsel %vm1150_vm7, nan, %v2834_v3  ;;  %v1257_v24 = vxor.u32 2147483648, %v3806_v7 }
 0x216   :  { %v2937_v47 = vsel %vm2935_vm9, %v1260_v33, %v3806_v7  ;;  %3494 = vrot.lane.b32.xlu1 %v2835_v51, %s3859_s1  ;;  %vm1256_vm13 = vcmp.eq.s32.totalorder %v1254_v36, 0  ;;  %vm2931_vm4 = vcmp.lt.s32.totalorder %v2930_v20, 2  ;;  %vm2932_vm5 = vcmp.eq.s32.totalorder %v2930_v20, 0 }
 0x217   :  { %v5665_v13 = vand.u32 2147483647, %v4696_v63  ;;  %v2934_v55 = vsel %vm2932_vm5, %v3804_v8, %v1257_v24  ;;  %v3034_v45 = vand.u32 3, %v3033_v26  ;;  %v1453_v53 = vsub.s32 4, %v5668_v59 }
 0x218   :  { %v1159_v52 = vsel %vm1152_vm6, %v1155_v54, %v1158_v35  ;;  %vm1259_vm15 = vcmp.eq.s32.totalorder %v1254_v36, 2  ;;  %v2938_v23 = vsel %vm2931_vm4, %v2934_v55, %v2937_v47  ;;  %vm1356_vm3 = vweird.f32 %v5628_v1 }
 0x219   :  { %vm5337_vm8 = vcmp.le.f32.partialorder %v5665_v13, 0.7853982  ;;  %v2939_v14 = vsel %vm1253_vm1, nan, %v2938_v23  ;;  %vm1358_vm14 = vcmp.lt.s32.totalorder %v1357_v28, 2  ;;  %vm1359_vm2 = vcmp.eq.s32.totalorder %v1357_v28, 0 }
 0x21a   :  { %v1455_v4 = vsel %vm5337_vm8, %v4696_v63, %v5180_v16  ;;  %v1454_v31 = vsel %vm1369_vm12, %v1453_v53, %v5668_v59  ;;  %v3808_v21 = vpop.eup %3807  ;;  %3496 = vrot.lane.b32.xlu0 %v2939_v14, %s3859_s1  ;;  %v1258_v16 = vsel %vm1256_vm13, %v3804_v8, %v1257_v24  ;;  %v1261_v12 = vsel %vm1259_vm15, %v1260_v33, %v3806_v7 }
 0x21b   :  { %v1456_v10 = vsel %vm5337_vm8, 0, %v1454_v31  ;;  %3811 = vcosq.f32 %v1455_v4  ;;  %v3810_v9 = vpop.eup %3809  ;;  %v1363_v61 = vxor.u32 2147483648, %v3808_v21  ;;  %vm3039_vm6 = vcmp.eq.s32.totalorder %v3034_v45, 2 }
 0x21c   :  { %3813 = vsinq.f32 %v1455_v4  ;;  %v5669_v48 = vand.u32 2147483647, %v5630_v41  ;;  %v1360_v0 = vxor.u32 2147483648, %v3810_v9  ;;  %v3137_v6 = vadd.s32 3, %v1456_v10 }
 0x21d   :  { %v1556_v11 = vsub.s32 4, %v5672_v18  ;;  %v1262_v34 = vsel %vm1255_vm0, %v1258_v16, %v1261_v12  ;;  %vm1362_vm12 = vcmp.eq.s32.totalorder %v1357_v28, 2  ;;  %vm3036_vm9 = vcmp.eq.s32.totalorder %v3034_v45, 0 }
 0x21e   :  { %vm5359_vm10 = vcmp.le.f32.partialorder %v5669_v48, 0.7853982  ;;  %v3041_v30 = vsel %vm3039_vm6, %v1363_v61, %v3810_v9  ;;  %v1361_v20 = vsel %vm1359_vm2, %v3808_v21, %v1360_v0  ;;  %v1364_v2 = vsel %vm1362_vm12, %v1363_v61, %v3810_v9 }
 0x21f   :  { %v1558_v5 = vsel %vm5359_vm10, %v5630_v41, %v5165_v56  ;;  %vm3035_vm13 = vcmp.lt.s32.totalorder %v3034_v45, 2  ;;  %v3038_v40 = vsel %vm3036_vm9, %v3808_v21, %v1360_v0  ;;  %v1460_v8 = vand.u32 3, %v1456_v10 }
 0x220   :  { %v3042_v17 = vsel %vm3035_vm13, %v3038_v40, %v3041_v30  ;;  %v1557_v27 = vsel %vm1472_vm11, %v1556_v11, %v5672_v18  ;;  %3815 = vcosq.f32 %v1558_v5  ;;  %v5375_v56 = vsel %vm1150_vm7, nan, %v1159_v52 }
 0x221   :  { %v5379_v36 = vsel %vm1253_vm1, nan, %v1262_v34  ;;  %v3043_v33 = vsel %vm1356_vm3, nan, %v3042_v17  ;;  %v3138_v26 = vand.u32 3, %v3137_v6  ;;  %v1365_v7 = vsel %vm1358_vm14, %v1361_v20, %v1364_v2 }
 0x222   :  { %3498 = vrot.lane.b32.xlu1 %v3043_v33, %s3859_s1  ;;  %vm1459_vm0 = vweird.f32 %v4696_v63  ;;  %v1559_v35 = vsel %vm5359_vm10, 0, %v1557_v27  ;;  %3817 = vsinq.f32 %v1558_v5  ;;  %v5673_v58 = vand.u32 2147483647, %v4858_v43 }
 0x223   :  { %v1563_v3 = vand.u32 3, %v1559_v35  ;;  %v3241_v54 = vadd.s32 3, %v1559_v35  ;;  %v1659_v51 = vsub.s32 4, %v5039_v46  ;;  %vm1461_vm7 = vcmp.lt.s32.totalorder %v1460_v8, 2 }
 0x224   :  { %vm5390_vm11 = vcmp.le.f32.partialorder %v5673_v58, 0.7853982  ;;  %vm1462_vm1 = vcmp.eq.s32.totalorder %v1460_v8, 0  ;;  %vm1465_vm4 = vcmp.eq.s32.totalorder %v1460_v8, 2  ;;  %v5401_v47 = vsel %vm1356_vm3, nan, %v1365_v7 }
 0x225   :  { %v1661_v28 = vsel %vm5390_vm11, %v4858_v43, %v5231_v22  ;;  %v3812_v24 = vpop.eup %3811  ;;  %vm3139_vm5 = vcmp.lt.s32.totalorder %v3138_v26, 2  ;;  %vm3140_vm8 = vcmp.eq.s32.totalorder %v3138_v26, 0  ;;  %v1762_v13 = vsub.s32 4, %v4951_v62 }
 0x226   :  { %3819 = vcosq.f32 %v1661_v28  ;;  %v3814_v32 = vpop.eup %3813  ;;  %v1466_v55 = vxor.u32 2147483648, %v3812_v24  ;;  %vm3143_vm15 = vcmp.eq.s32.totalorder %v3138_v26, 2  ;;  %vm5676_vm14 = vcmp.lt.s32.totalorder %v4858_v43, 0 }
 0x227   :  { %v1660_v22 = vsel %vm5676_vm14, %v1659_v51, %v5039_v46  ;;  %3821 = vsinq.f32 %v1661_v28  ;;  %v1463_v45 = vxor.u32 2147483648, %v3814_v32  ;;  %vm1564_vm2 = vcmp.lt.s32.totalorder %v1563_v3, 2 }
 0x228   :  { %v3242_v59 = vand.u32 3, %v3241_v54  ;;  %v5677_v53 = vand.u32 2147483647, %v4711_v25  ;;  %v3145_v4 = vsel %vm3143_vm15, %v1466_v55, %v3814_v32  ;;  %v1467_v52 = vsel %vm1465_vm4, %v1466_v55, %v3814_v32 }
 0x229   :  { %vm1562_vm3 = vweird.f32 %v5630_v41  ;;  %v1662_v23 = vsel %vm5390_vm11, 0, %v1660_v22  ;;  %v3142_v14 = vsel %vm3140_vm8, %v3812_v24, %v1463_v45  ;;  %v1464_v31 = vsel %vm1462_vm1, %v3812_v24, %v1463_v45 }
 0x22a   :  { %vm5409_vm6 = vcmp.le.f32.partialorder %v5677_v53, 0.7853982  ;;  %v3345_v21 = vadd.s32 3, %v1662_v23  ;;  %vm5680_vm10 = vcmp.lt.s32.totalorder %v4711_v25, 0  ;;  %v3816_v12 = vpop.eup %3815  ;;  %v3146_v10 = vsel %vm3139_vm5, %v3142_v14, %v3145_v4 }
 0x22b   :  { %v1764_v46 = vsel %vm5409_vm6, %v4711_v25, %v5185_v29  ;;  %v1763_v16 = vsel %vm5680_vm10, %v1762_v13, %v4951_v62  ;;  %vm1565_vm12 = vcmp.eq.s32.totalorder %v1563_v3, 0  ;;  %v1666_v9 = vand.u32 3, %v1662_v23 }
 0x22c   :  { %3823 = vcosq.f32 %v1764_v46  ;;  %v3147_v61 = vsel %vm1459_vm0, nan, %v3146_v10  ;;  %v1468_v29 = vsel %vm1461_vm7, %v1464_v31, %v1467_v52  ;;  %vm1568_vm9 = vcmp.eq.s32.totalorder %v1563_v3, 2  ;;  %v3818_v39 = vpop.eup %3817 }
 0x22d   :  { %v1569_v48 = vxor.u32 2147483648, %v3816_v12  ;;  %3500 = vrot.lane.b32.xlu0 %v3147_v61, %s3859_s1  ;;  %vm3247_vm13 = vcmp.eq.s32.totalorder %v3242_v59, 2  ;;  %v3346_v0 = vand.u32 3, %v3345_v21  ;;  %v1765_v62 = vsel %vm5409_vm6, 0, %v1763_v16 }
 0x22e   :  { %3825 = vsinq.f32 %v1764_v46  ;;  %v1566_v6 = vxor.u32 2147483648, %v3818_v39  ;;  %vm3243_vm11 = vcmp.lt.s32.totalorder %v3242_v59, 2  ;;  %v1469_v34 = vsel %vm1459_vm0, nan, %v1468_v29 }
 0x22f   :  { %v1570_v18 = vsel %vm1568_vm9, %v1569_v48, %v3818_v39  ;;  %v3249_v11 = vsel %vm3247_vm13, %v1569_v48, %v3818_v39  ;;  %vm3244_vm7 = vcmp.eq.s32.totalorder %v3242_v59, 0  ;;  %vm1668_vm1 = vcmp.eq.s32.totalorder %v1666_v9, 0 }
 0x230   :  { %v3820_v5 = vpop.eup %3819  ;;  %vm1671_vm4 = vcmp.eq.s32.totalorder %v1666_v9, 2  ;;  %v1567_v30 = vsel %vm1565_vm12, %v3816_v12, %v1566_v6  ;;  %v3246_v20 = vsel %vm3244_vm7, %v3816_v12, %v1566_v6  ;;  %v3449_v40 = vadd.s32 3, %v1765_v62 }
 0x231   :  { %v1672_v2 = vxor.u32 2147483648, %v3820_v5  ;;  %v3822_v17 = vpop.eup %3821  ;;  %v1571_v8 = vsel %vm1564_vm2, %v1567_v30, %v1570_v18  ;;  %v3250_v27 = vsel %vm3243_vm11, %v3246_v20, %v3249_v11  ;;  %vm3348_vm5 = vcmp.eq.s32.totalorder %v3346_v0, 0 }
 0x232   :  { %vm3351_vm8 = vcmp.eq.s32.totalorder %v3346_v0, 2  ;;  %v1572_v33 = vsel %vm1562_vm3, nan, %v1571_v8  ;;  %v3251_v63 = vsel %vm1562_vm3, nan, %v3250_v27  ;;  %v1669_v26 = vxor.u32 2147483648, %v3822_v17 }
 0x233   :  { %v3353_v7 = vsel %vm3351_vm8, %v1672_v2, %v3822_v17  ;;  %3502 = vrot.lane.b32.xlu1 %v3251_v63, %s3859_s1  ;;  %v1673_v35 = vsel %vm1671_vm4, %v1672_v2, %v3822_v17  ;;  %v1769_v58 = vand.u32 3, %v1765_v62  ;;  %v3450_v57 = vand.u32 3, %v3449_v40 }
 0x234   :  { %vm1779_vm0 = vcmask 130048   ;;  %vm1667_vm15 = vcmp.lt.s32.totalorder %v1666_v9, 2  ;;  %vm3347_vm14 = vcmp.lt.s32.totalorder %v3346_v0, 2  ;;  %v3350_v3 = vsel %vm3348_vm5, %v3820_v5, %v1669_v26 }
 0x235   :  { %v1670_v54 = vsel %vm1668_vm1, %v3820_v5, %v1669_v26  ;;  %1780 = vst.msk [vmem:[#allocation2] sm:$0xff] %vm1779_vm0, %v5017_v44  ;;  %1781 = vst.msk [vmem:[#allocation2 + $0x8] sm:$0xff] %vm1779_vm0, %v5117_v38  ;;  %vm1665_vm2 = vweird.f32 %v4858_v43  ;;  %vm1774_vm6 = vcmp.eq.s32.totalorder %v1769_v58, 2  ;;  %vm3455_vm3 = vcmp.eq.s32.totalorder %v3450_v57, 2 }
 0x236   :  { %1782 = vst.msk [vmem:[#allocation2 + $0x10] sm:$0xff] %vm1779_vm0, %v5094_v15  ;;  %1783 = vst.msk [vmem:[#allocation2 + $0x18] sm:$0xff] %vm1779_vm0, %v5141_v19  ;;  %v3824_v44 = vpop.eup %3823  ;;  %v3354_v15 = vsel %vm3347_vm14, %v3350_v3, %v3353_v7  ;;  %v1674_v41 = vsel %vm1667_vm15, %v1670_v54, %v1673_v35  ;;  %vm1771_vm10 = vcmp.eq.s32.totalorder %v1769_v58, 0  ;;  %vm3452_vm12 = vcmp.eq.s32.totalorder %v3450_v57, 0 }
 0x237   :  { %1784 = vst.msk [vmem:[#allocation2 + $0x20] sm:$0xff] %vm1779_vm0, %v5247_v42  ;;  %1785 = vst.msk [vmem:[#allocation2 + $0x28] sm:$0xff] %vm1779_vm0, %v5285_v50  ;;  %v3355_v38 = vsel %vm1665_vm2, nan, %v3354_v15  ;;  %v1675_v19 = vsel %vm1665_vm2, nan, %v1674_v41  ;;  %v1775_v42 = vxor.u32 2147483648, %v3824_v44  ;;  %vm1770_vm9 = vcmp.lt.s32.totalorder %v1769_v58, 2 }
 0x238   :  { %1786 = vst.msk [vmem:[#allocation2 + $0x30] sm:$0xff] %vm1779_vm0, %v5295_v37  ;;  %1787 = vst.msk [vmem:[#allocation2 + $0x38] sm:$0xff] %vm1779_vm0, %v5322_v49  ;;  %v3826_v50 = vpop.eup %3825  ;;  %3504 = vrot.lane.b32.xlu0 %v3355_v38, %s3859_s1  ;;  %vm3451_vm13 = vcmp.lt.s32.totalorder %v3450_v57, 2  ;;  %vm1768_vm11 = vweird.f32 %v4711_v25  ;;  %vm3524_vm7 = vcmask 261248  }
 0x239   :  { %1788 = vst.msk [vmem:[#allocation2 + $0x40] sm:$0xff] %vm1779_vm0, %v5330_v60  ;;  %1789 = vst.msk [vmem:[#allocation2 + $0x48] sm:$0xff] %vm1779_vm0, %v5375_v56  ;;  %v1772_v37 = vxor.u32 2147483648, %v3826_v50  ;;  %v1776_v49 = vsel %vm1774_vm6, %v1775_v42, %v3826_v50  ;;  %v3457_v60 = vsel %vm3455_vm3, %v1775_v42, %v3826_v50 }
 0x23a   :  { %1790 = vst.msk [vmem:[#allocation2 + $0x50] sm:$0xff] %vm1779_vm0, %v5379_v36  ;;  %1791 = vst.msk [vmem:[#allocation2 + $0x58] sm:$0xff] %vm1779_vm0, %v5401_v47  ;;  %v3477_v47 = vpop.permute.xlu0 %3476 }
 0x23b   :  { %1792 = vst.msk [vmem:[#allocation2 + $0x60] sm:$0xff] %vm1779_vm0, %v1469_v34  ;;  %1793 = vst.msk [vmem:[#allocation2 + $0x68] sm:$0xff] %vm1779_vm0, %v1572_v33  ;;  %v1773_v43 = vsel %vm1771_vm10, %v3824_v44, %v1772_v37  ;;  %v3454_v56 = vsel %vm3452_vm12, %v3824_v44, %v1772_v37 }
 0x23c   :  { %1794 = vst.msk [vmem:[#allocation2 + $0x70] sm:$0xff] %vm1779_vm0, %v1675_v19  ;;  %v1777_v36 = vsel %vm1770_vm9, %v1773_v43, %v1776_v49  ;;  %v3458_v51 = vsel %vm3451_vm13, %v3454_v56, %v3457_v60 }
 0x23d   :  { %v1778_v28 = vsel %vm1768_vm11, nan, %v1777_v36  ;;  %v3459_v24 = vsel %vm1768_vm11, nan, %v3458_v51  ;;  %3525 = vst.msk [vmem:[#allocation2] sm:$0xff] %vm3524_vm7, %v3477_v47 }
 0x23e   :  { %3506 = vrot.lane.b32.xlu1 %v3459_v24, %s3859_s1  ;;  %1795 = vst.msk [vmem:[#allocation2 + $0x78] sm:$0xff] %vm1779_vm0, %v1778_v28 }
 0x24a   :  { %v3481_v13 = vpop.permute.xlu0 %3480 }
 0x24b   :  { %3527 = vst.msk [vmem:[#allocation2 + $0x10] sm:$0xff] %vm3524_vm7, %v3481_v13 }
 0x250   :  { %v3479_v32 = vpop.permute.xlu1 %3478 }
 0x251   :  { %3526 = vst.msk [vmem:[#allocation2 + $0x8] sm:$0xff] %vm3524_vm7, %v3479_v32 }
 0x257   :  { %v3483_v55 = vpop.permute.xlu1 %3482 }
 0x258   :  { %3528 = vst.msk [vmem:[#allocation2 + $0x18] sm:$0xff] %vm3524_vm7, %v3483_v55 }
 0x263   :  { %v3485_v25 = vpop.permute.xlu0 %3484 }
 0x264   :  { %3529 = vst.msk [vmem:[#allocation2 + $0x20] sm:$0xff] %vm3524_vm7, %v3485_v25 }
 0x26c   :  { %v3487_v22 = vpop.permute.xlu1 %3486 }
 0x26d   :  { %3530 = vst.msk [vmem:[#allocation2 + $0x28] sm:$0xff] %vm3524_vm7, %v3487_v22 }
 0x26f   :  { %v3489_v45 = vpop.permute.xlu0 %3488 }
 0x270   :  { %3531 = vst.msk [vmem:[#allocation2 + $0x30] sm:$0xff] %vm3524_vm7, %v3489_v45 }
 0x278   :  { %v3491_v59 = vpop.permute.xlu1 %3490 }
 0x279   :  { %3532 = vst.msk [vmem:[#allocation2 + $0x38] sm:$0xff] %vm3524_vm7, %v3491_v59 }
 0x281   :  { %v3493_v53 = vpop.permute.xlu0 %3492 }
 0x282   :  { %3533 = vst.msk [vmem:[#allocation2 + $0x40] sm:$0xff] %vm3524_vm7, %v3493_v53 }
 0x288   :  { %v3495_v1 = vpop.permute.xlu1 %3494 }
 0x289   :  { %3534 = vst.msk [vmem:[#allocation2 + $0x48] sm:$0xff] %vm3524_vm7, %v3495_v1 }
 0x28c   :  { %v3497_v4 = vpop.permute.xlu0 %3496 }
 0x28d   :  { %3535 = vst.msk [vmem:[#allocation2 + $0x50] sm:$0xff] %vm3524_vm7, %v3497_v4 }
 0x294   :  { %v3499_v52 = vpop.permute.xlu1 %3498 }
 0x295   :  { %3536 = vst.msk [vmem:[#allocation2 + $0x58] sm:$0xff] %vm3524_vm7, %v3499_v52 }
 0x29f   :  { %v3501_v23 = vpop.permute.xlu0 %3500 }
 0x2a0   :  { %3537 = vst.msk [vmem:[#allocation2 + $0x60] sm:$0xff] %vm3524_vm7, %v3501_v23 }
 0x2a5   :  { %v3503_v46 = vpop.permute.xlu1 %3502 }
 0x2a6   :  { %3538 = vst.msk [vmem:[#allocation2 + $0x68] sm:$0xff] %vm3524_vm7, %v3503_v46 }
 0x2aa   :  { %v3505_v14 = vpop.permute.xlu0 %3504 }
 0x2ab   :  { %3539 = vst.msk [vmem:[#allocation2 + $0x70] sm:$0xff] %vm3524_vm7, %v3505_v14 }
 0x2b0   :  { %v3507_v31 = vpop.permute.xlu1 %3506 }
 0x2b1   :  { %3540 = vst.msk [vmem:[#allocation2 + $0x78] sm:$0xff] %vm3524_vm7, %v3507_v31 }
 0x2b2   :  { %3545 = vsyncadd [#allocation3], 1792  ;;  %s3860_s16 = smov [#allocation2]  }
 0x2b3   :  { %s3546_s17 = sshll.u32 %s3860_s16, 4  ;;  %s3547_s17 = int_to_ptr.vmem [resolvable:$true] %s3546_s17 }
 0x2b4   :  { %s3828_s18 = scalar_lea.vmem %s3547_s17, 256  ;;  %s3832_s19 = scalar_lea.vmem %s3547_s17, 2048 }
 0x2b5   :  { %p3829_p0 = scmp.ne.s32.totalorder %s3547_s17, %s3828_s18  ;;  %p3833_p1 = scmp.lt.s32.totalorder %s3547_s17, %s3547_s17 }
 0x2b6   :  { %p3834_p2 = scmp.lt.s32.totalorder %s3832_s19, %s3828_s18 }
 0x2b8   :  { %p3835_p3 = por %p3834_p2, %p3833_p1 }
 0x2ba   :  { %p3836_p4 = pnand %p3835_p3, %p3829_p0 }
 0x2bc   :  { %3839 = shalt.err (!%p3836_p4)
}
 0x2bd   :  { %s3840_s22 = scalar_lea.hbm %s5507_s2, 256 }
 0x2be   :  { %p3841_p5 = scmp.ne.s32.totalorder %s5507_s2, %s3840_s22  ;;  %p3844_p6 = scmp.lt.u32.totalorder %s3840_s22, %s5507_s2 }
 0x2c0   :  { %p3846_p7 = pnand %p3844_p6, %p3841_p5 }
 0x2c2   :  { %3849 = shalt.err (!%p3846_p7)
}
 0x2c3   :  { %s3861_s27 = smov 128   ;;  %s3862_s28 = smov 8  }
 0x2c4   :  { %3552 = dma.vmem_to_hbm [thread:$0]  %s3547_s17, 256, %s5507_s2, [#allocation3], %s3861_s27, %s3861_s27, %s3862_s28  }
 0x2c5   :  { %3850 = dma.done.wait [#allocation3], 2048  }
 0x2c6   :  { %3851 = vsyncadd [#allocation3], 4294965248 }
 0x2c7   :  { %3556 = vsyncpa [#allocation3], 1 }

</bundles_post_ra>
